<compile_context>
chip_gen: v7x
topology: tpu7x:2x2x1
jax: 0.10.0
libtpu: 0.0.40
codegen_flags: <defaults>
</compile_context>

<pallas_src>
import math
import numpy as np
import jax
import jax.numpy as jnp
from jax import lax
from jax.experimental import pallas as pl
from jax.experimental.pallas import tpu as pltpu

# ----------------------------- config (small, synthetic CLIP) ----------------
B = 2            # batch (number of prompts)
L = 8            # context length (77 in real CLIP)
D = 32           # transformer width
H = 4            # attention heads
DH = D // H      # head dim
NLAYERS = 2      # transformer layers
FF = 4 * D       # MLP hidden
E = 16           # text_projection output dim
EPS = 1e-5
NEG_INF = -1e30
SCALE = 1.0 / math.sqrt(DH)


# ----------------------------- in-kernel helpers -------------------------------
def _layernorm(x, w, b):
    """Single-pass LayerNorm: E[x] and E[x^2] together, f32 math."""
    inv_d = 1.0 / x.shape[-1]
    mu = jnp.sum(x, axis=-1, keepdims=True) * inv_d
    ms = jnp.sum(x * x, axis=-1, keepdims=True) * inv_d
    var = ms - mu * mu
    return (x - mu) * lax.rsqrt(var + EPS) * w + b


def _mm(a_f32, w_bf16):
    """2-D matmul on the MXU: bf16 operands, f32 accumulation."""
    return jnp.dot(a_f32.astype(jnp.bfloat16), w_bf16,
                   preferred_element_type=jnp.float32)


# ----------------------------- fused kernel ------------------------------------
def text_encoder_kernel(x_ref, pos_ref, eot_ref,
                        ln1w_ref, ln1b_ref, wqkv_ref, bqkv_ref,
                        wo_ref, bo_ref, ln2w_ref, ln2b_ref,
                        w1_ref, b1_ref, w2_ref, b2_ref,
                        lnfw_ref, lnfb_ref, proj_ref,
                        o_ref, xn_scratch):
    # x = prompts + positional_embedding ; fold batch into rows -> (B*L, D)
    x = (x_ref[...] + pos_ref[...]).reshape(B * L, D)

    # causal mask shared by all layers / heads
    row = lax.broadcasted_iota(jnp.int32, (L, L), 0)
    col = lax.broadcasted_iota(jnp.int32, (L, L), 1)
    causal = (col <= row)[None, :, :]                       # (1, L, L)

    for l in range(NLAYERS):       # static unroll; all weights VMEM-resident
        # ---- multi-head self-attention (pre-LN, causal) ----
        xn = _layernorm(x, ln1w_ref[l], ln1b_ref[l])        # (B*L, D)
        qkv = _mm(xn, wqkv_ref[l]) + bqkv_ref[l]            # (B*L, 3D) f32
        qkv3 = qkv.reshape(B, L, 3 * D)                     # (B, L, 3D)

        attn_proj = jnp.zeros((B * L, D), jnp.float32)
        for h in range(H):                                  # per head, batched over B
            qh = qkv3[:, :, h * DH:(h + 1) * DH].astype(jnp.bfloat16)
            kh = qkv3[:, :, D + h * DH:D + (h + 1) * DH].astype(jnp.bfloat16)
            vh = qkv3[:, :, 2 * D + h * DH:2 * D + (h + 1) * DH].astype(jnp.bfloat16)
            s = jnp.einsum('bqd,bkd->bqk', qh, kh,
                           preferred_element_type=jnp.float32) * SCALE    # (B, L, L)
            s = jnp.where(causal, s, NEG_INF)
            s = s - jnp.max(s, axis=-1, keepdims=True)
            p = jnp.exp(s)
            p = p * pl.reciprocal(jnp.sum(p, axis=-1, keepdims=True), approx=True)
            oh = jnp.einsum('bqk,bkd->bqd', p.astype(jnp.bfloat16), vh,
                            preferred_element_type=jnp.float32)           # (B, L, DH)
            # concat(heads) @ Wo  ==  sum_h  o_h @ Wo[h]   (no lane concat)
            attn_proj = attn_proj + _mm(oh.reshape(B * L, DH), wo_ref[l, h])
        x = x + attn_proj + bo_ref[l]

        # ---- MLP with QuickGELU (CLIP) ----
        xn2 = _layernorm(x, ln2w_ref[l], ln2b_ref[l])
        h1 = _mm(xn2, w1_ref[l]) + b1_ref[l]                # (B*L, FF)
        h1 = h1 * jax.nn.sigmoid(1.702 * h1)
        x = x + _mm(h1, w2_ref[l]) + b2_ref[l]

    # ---- ln_final + EOT-token select (argmax precomputed) + projection ----
    xn_scratch[...] = _layernorm(x, lnfw_ref[...], lnfb_ref[...])
    rows = []
    for b in range(B):                                      # scalar-indexed row reads
        idx = eot_ref[b]                                    # SMEM int32 scalar
        rows.append(xn_scratch[pl.ds(b * L + idx, 1), :])   # (1, D)
    eot = jnp.concatenate(rows, axis=0)                     # (B, D)
    o_ref[...] = _mm(eot, proj_ref[...])                    # (B, E)


# ----------------------------- wrapper ------------------------------------------
def text_encoder_forward(prompts, tokenized_prompts, params):
    # torch.argmax(dim=-1) on the tokenized prompt done wrapper-side (scalar index)
    eot_idx = jnp.argmax(tokenized_prompts, axis=-1).astype(jnp.int32)    # (B,)

    args = (prompts, params["pos"], eot_idx,
            params["ln1w"], params["ln1b"], params["wqkv"], params["bqkv"],
            params["wo"], params["bo"], params["ln2w"], params["ln2b"],
            params["w1"], params["b1"], params["w2"], params["b2"],
            params["lnf_w"], params["lnf_b"], params["proj"])

    vmem = lambda: pl.BlockSpec(memory_space=pltpu.MemorySpace.VMEM)
    smem = lambda: pl.BlockSpec(memory_space=pltpu.MemorySpace.SMEM)
    in_specs = [vmem(), vmem(), smem()] + [vmem() for _ in range(len(args) - 3)]

    return pl.pallas_call(
        text_encoder_kernel,
        out_shape=jax.ShapeDtypeStruct((B, E), jnp.float32),
        in_specs=in_specs,
        out_specs=vmem(),
        scratch_shapes=[pltpu.VMEM((B * L, D), jnp.float32)],
    )(*args)


# ----------------------------- deterministic parameter init ---------------------
def init_params(key):
    ks = jax.random.split(key, 16)

    def nrm(k, shape, scale=0.02):
        return scale * jax.random.normal(k, shape, jnp.float32)

    bf16 = jnp.bfloat16
    return dict(
        pos=0.01 * jax.random.normal(ks[0], (L, D), jnp.float32),
        ln1w=1.0 + 0.01 * jax.random.normal(ks[1], (NLAYERS, 1, D), jnp.float32),
        ln1b=0.01 * jax.random.normal(ks[2], (NLAYERS, 1, D), jnp.float32),
        wqkv=nrm(ks[3], (NLAYERS, D, 3 * D)).astype(bf16),
        bqkv=nrm(ks[4], (NLAYERS, 1, 3 * D)),
        # Wo stored head-split (NL, H, DH, D) so the kernel indexes wo[l, h]
        wo=nrm(ks[5], (NLAYERS, D, D)).reshape(NLAYERS, H, DH, D).astype(bf16),
        bo=nrm(ks[6], (NLAYERS, 1, D)),
        ln2w=1.0 + 0.01 * jax.random.normal(ks[7], (NLAYERS, 1, D), jnp.float32),
        ln2b=0.01 * jax.random.normal(ks[8], (NLAYERS, 1, D), jnp.float32),
        w1=nrm(ks[9], (NLAYERS, D, FF)).astype(bf16),
        b1=nrm(ks[10], (NLAYERS, 1, FF)),
        w2=nrm(ks[11], (NLAYERS, FF, D)).astype(bf16),
        b2=nrm(ks[12], (NLAYERS, 1, D)),
        lnf_w=1.0 + 0.01 * jax.random.normal(ks[13], (1, D), jnp.float32),
        lnf_b=0.01 * jax.random.normal(ks[14], (1, D), jnp.float32),
        proj=nrm(ks[15], (D, E)).astype(bf16),
    )


# ----------------------------- pure-JAX reference --------------------------------
def _ref_ln(x, w, b):
    mu = jnp.mean(x, axis=-1, keepdims=True)
    var = jnp.mean((x - mu) ** 2, axis=-1, keepdims=True)
    return (x - mu) * lax.rsqrt(var + EPS) * w + b


def _ref_mm(a, w):
    return jnp.einsum("...k,kn->...n", a.astype(jnp.bfloat16), w.astype(jnp.bfloat16),
                      preferred_element_type=jnp.float32)


def reference_forward(prompts, tokenized, params):
    x = prompts + params["pos"][None]
    row = lax.broadcasted_iota(jnp.int32, (L, L), 0)
    col = lax.broadcasted_iota(jnp.int32, (L, L), 1)
    causal = col <= row
    for l in range(NLAYERS):
        xn = _ref_ln(x, params["ln1w"][l], params["ln1b"][l])
        qkv = _ref_mm(xn, params["wqkv"][l]) + params["bqkv"][l]        # (B, L, 3D)
        q, k, v = jnp.split(qkv, 3, axis=-1)
        q = q.reshape(B, L, H, DH).transpose(0, 2, 1, 3)
        k = k.reshape(B, L, H, DH).transpose(0, 2, 1, 3)
        v = v.reshape(B, L, H, DH).transpose(0, 2, 1, 3)
        s = jnp.einsum("bhqd,bhkd->bhqk", q.astype(jnp.bfloat16), k.astype(jnp.bfloat16),
                       preferred_element_type=jnp.float32) * SCALE
        s = jnp.where(causal[None, None], s, NEG_INF)
        a = jax.nn.softmax(s, axis=-1)
        o = jnp.einsum("bhqk,bhkd->bhqd", a.astype(jnp.bfloat16), v.astype(jnp.bfloat16),
                       preferred_element_type=jnp.float32)
        o = o.transpose(0, 2, 1, 3).reshape(B, L, D)
        wo_full = params["wo"][l].reshape(D, D)
        x = x + _ref_mm(o, wo_full) + params["bo"][l]
        xn2 = _ref_ln(x, params["ln2w"][l], params["ln2b"][l])
        h1 = _ref_mm(xn2, params["w1"][l]) + params["b1"][l]
        h1 = h1 * jax.nn.sigmoid(1.702 * h1)
        x = x + _ref_mm(h1, params["w2"][l]) + params["b2"][l]
    xn = _ref_ln(x, params["lnf_w"], params["lnf_b"])
    idx = jnp.argmax(tokenized, axis=-1)
    eot = xn[jnp.arange(B), idx]                                        # (B, D)
    return _ref_mm(eot, params["proj"])                                 # (B, E)


# ----------------------------- main -----------------------------------------------
if __name__ == "__main__":
    key = jax.random.PRNGKey(0)
    k_prompt, k_tok, k_param = jax.random.split(key, 3)

    # prompts are already embeddings (if_embedding=True path of the module)
    prompts = jax.random.normal(k_prompt, (B, L, D), jnp.float32)
    tokenized_prompts = jax.random.randint(k_tok, (B, L), 0, 1000, jnp.int32)
    params = init_params(k_param)

    out = text_encoder_forward(prompts, tokenized_prompts, params)
    out = jax.block_until_ready(out)
    assert out.shape == (B, E) and out.dtype == jnp.float32

    ref = reference_forward(prompts, tokenized_prompts, params)
    np.testing.assert_allclose(np.asarray(out), np.asarray(ref),
                               rtol=2e-2, atol=5e-3)
    print("KERNEL_OK")
</pallas_src>

<mosaic_0001>
module attributes {stable_mosaic.version = 11 : i64} {
  func.func @text_encoder_kernel(%arg0: memref<2x8x32xf32, #tpu.memory_space<vmem>>, %arg1: memref<8x32xf32, #tpu.memory_space<vmem>>, %arg2: memref<2xi32, #tpu.memory_space<smem>>, %arg3: memref<2x1x32xf32, #tpu.memory_space<vmem>>, %arg4: memref<2x1x32xf32, #tpu.memory_space<vmem>>, %arg5: memref<2x32x96xbf16, #tpu.memory_space<vmem>>, %arg6: memref<2x1x96xf32, #tpu.memory_space<vmem>>, %arg7: memref<2x4x8x32xbf16, #tpu.memory_space<vmem>>, %arg8: memref<2x1x32xf32, #tpu.memory_space<vmem>>, %arg9: memref<2x1x32xf32, #tpu.memory_space<vmem>>, %arg10: memref<2x1x32xf32, #tpu.memory_space<vmem>>, %arg11: memref<2x32x128xbf16, #tpu.memory_space<vmem>>, %arg12: memref<2x1x128xf32, #tpu.memory_space<vmem>>, %arg13: memref<2x128x32xbf16, #tpu.memory_space<vmem>>, %arg14: memref<2x1x32xf32, #tpu.memory_space<vmem>>, %arg15: memref<1x32xf32, #tpu.memory_space<vmem>>, %arg16: memref<1x32xf32, #tpu.memory_space<vmem>>, %arg17: memref<32x16xbf16, #tpu.memory_space<vmem>>, %arg18: memref<2x16xf32, #tpu.memory_space<vmem>>, %arg19: memref<16x32xf32, #tpu.memory_space<vmem>>) attributes {dimension_semantics = [], scalar_prefetch = 0 : i64, scratch_operands = 1 : i64, tpu.core_type = #tpu.core_type<tc>} {
    %c0 = arith.constant 0 : index
    %c0_0 = arith.constant 0 : index
    %c0_1 = arith.constant 0 : index
    %0 = vector.load %arg0[%c0, %c0_0, %c0_1] : memref<2x8x32xf32, #tpu.memory_space<vmem>>, vector<2x8x32xf32>
    %c0_2 = arith.constant 0 : index
    %c0_3 = arith.constant 0 : index
    %1 = vector.load %arg1[%c0_2, %c0_3] : memref<8x32xf32, #tpu.memory_space<vmem>>, vector<8x32xf32>
    %2 = vector.shape_cast %1 : vector<8x32xf32> to vector<1x8x32xf32>
    %3 = vector.broadcast %2 : vector<1x8x32xf32> to vector<2x8x32xf32>
    %4 = arith.addf %0, %3 : vector<2x8x32xf32>
    %5 = vector.shape_cast %4 : vector<2x8x32xf32> to vector<16x32xf32>
    %6 = tpu.iota {dimensions = array<i32: 0>} : vector<8x8xi32>
    %7 = tpu.iota {dimensions = array<i32: 1>} : vector<8x8xi32>
    %8 = arith.cmpi sle, %7, %6 : vector<8x8xi32>
    %9 = vector.shape_cast %8 : vector<8x8xi1> to vector<1x8x8xi1>
    %c0_4 = arith.constant 0 : index
    %c0_5 = arith.constant 0 : index
    %c0_6 = arith.constant 0 : index
    %10 = vector.load %arg3[%c0_4, %c0_5, %c0_6] : memref<2x1x32xf32, #tpu.memory_space<vmem>>, vector<1x1x32xf32>
    %11 = vector.shape_cast %10 : vector<1x1x32xf32> to vector<1x32xf32>
    %c0_7 = arith.constant 0 : index
    %c0_8 = arith.constant 0 : index
    %c0_9 = arith.constant 0 : index
    %12 = vector.load %arg4[%c0_7, %c0_8, %c0_9] : memref<2x1x32xf32, #tpu.memory_space<vmem>>, vector<1x1x32xf32>
    %13 = vector.shape_cast %12 : vector<1x1x32xf32> to vector<1x32xf32>
    %cst = arith.constant dense<0.000000e+00> : vector<16xf32>
    %14 = vector.multi_reduction <add>, %5, %cst [1] : vector<16x32xf32> to vector<16xf32>
    %15 = vector.shape_cast %14 : vector<16xf32> to vector<16x1xf32>
    %cst_10 = arith.constant 3.125000e-02 : f32
    %16 = vector.broadcast %cst_10 : f32 to vector<16x1xf32>
    %17 = arith.mulf %15, %16 : vector<16x1xf32>
    %18 = arith.mulf %5, %5 : vector<16x32xf32>
    %cst_11 = arith.constant dense<0.000000e+00> : vector<16xf32>
    %19 = vector.multi_reduction <add>, %18, %cst_11 [1] : vector<16x32xf32> to vector<16xf32>
    %20 = vector.shape_cast %19 : vector<16xf32> to vector<16x1xf32>
    %cst_12 = arith.constant 3.125000e-02 : f32
    %21 = vector.broadcast %cst_12 : f32 to vector<16x1xf32>
    %22 = arith.mulf %20, %21 : vector<16x1xf32>
    %23 = arith.mulf %17, %17 : vector<16x1xf32>
    %24 = arith.subf %22, %23 : vector<16x1xf32>
    %25 = vector.broadcast %17 : vector<16x1xf32> to vector<16x32xf32>
    %26 = arith.subf %5, %25 : vector<16x32xf32>
    %cst_13 = arith.constant 9.99999974E-6 : f32
    %27 = vector.broadcast %cst_13 : f32 to vector<16x1xf32>
    %28 = arith.addf %24, %27 : vector<16x1xf32>
    %29 = math.rsqrt %28 : vector<16x1xf32>
    %30 = vector.broadcast %29 : vector<16x1xf32> to vector<16x32xf32>
    %31 = arith.mulf %26, %30 : vector<16x32xf32>
    %32 = vector.broadcast %11 : vector<1x32xf32> to vector<16x32xf32>
    %33 = arith.mulf %31, %32 : vector<16x32xf32>
    %34 = vector.broadcast %13 : vector<1x32xf32> to vector<16x32xf32>
    %35 = arith.addf %33, %34 : vector<16x32xf32>
    %c0_14 = arith.constant 0 : index
    %c0_15 = arith.constant 0 : index
    %c0_16 = arith.constant 0 : index
    %36 = vector.load %arg5[%c0_14, %c0_15, %c0_16] : memref<2x32x96xbf16, #tpu.memory_space<vmem>>, vector<1x32x96xbf16>
    %37 = vector.shape_cast %36 : vector<1x32x96xbf16> to vector<32x96xbf16>
    %38 = arith.truncf %35 : vector<16x32xf32> to vector<16x32xbf16>
    %cst_17 = arith.constant dense<0.000000e+00> : vector<16x96xf32>
    %39 = tpu.matmul %38, %37, %cst_17 {dimension_numbers = #tpu.dot_dimension_numbers<[1], [0], [0], [1], [0, 0, 1, 1], [], []>} : vector<16x32xbf16>, vector<32x96xbf16>, vector<16x96xf32> -> vector<16x96xf32>
    %c0_18 = arith.constant 0 : index
    %c0_19 = arith.constant 0 : index
    %c0_20 = arith.constant 0 : index
    %40 = vector.load %arg6[%c0_18, %c0_19, %c0_20] : memref<2x1x96xf32, #tpu.memory_space<vmem>>, vector<1x1x96xf32>
    %41 = vector.shape_cast %40 : vector<1x1x96xf32> to vector<1x96xf32>
    %42 = vector.broadcast %41 : vector<1x96xf32> to vector<16x96xf32>
    %43 = arith.addf %39, %42 : vector<16x96xf32>
    %44 = vector.shape_cast %43 : vector<16x96xf32> to vector<2x8x96xf32>
    %cst_21 = arith.constant 0.000000e+00 : f32
    %45 = vector.broadcast %cst_21 : f32 to vector<16x32xf32>
    %46 = vector.extract_strided_slice %44 {offsets = [0, 0, 0], sizes = [2, 8, 8], strides = [1, 1, 1]} : vector<2x8x96xf32> to vector<2x8x8xf32>
    %47 = arith.truncf %46 : vector<2x8x8xf32> to vector<2x8x8xbf16>
    %48 = vector.extract_strided_slice %44 {offsets = [0, 0, 32], sizes = [2, 8, 8], strides = [1, 1, 1]} : vector<2x8x96xf32> to vector<2x8x8xf32>
    %49 = arith.truncf %48 : vector<2x8x8xf32> to vector<2x8x8xbf16>
    %50 = vector.extract_strided_slice %44 {offsets = [0, 0, 64], sizes = [2, 8, 8], strides = [1, 1, 1]} : vector<2x8x96xf32> to vector<2x8x8xf32>
    %51 = arith.truncf %50 : vector<2x8x8xf32> to vector<2x8x8xbf16>
    "tpu.trace_start"() <{level = 10 : i32, message = "bqd,bkd->bqk"}> : () -> ()
    %cst_22 = arith.constant dense<0.000000e+00> : vector<2x8x8xf32>
    %52 = tpu.matmul %47, %49, %cst_22 {dimension_numbers = #tpu.dot_dimension_numbers<[2], [2], [1], [1], [0, 0, 0, 1, 1, 1], [0], [0]>} : vector<2x8x8xbf16>, vector<2x8x8xbf16>, vector<2x8x8xf32> -> vector<2x8x8xf32>
    "tpu.trace_stop"() : () -> ()
    %cst_23 = arith.constant 0.353553385 : f32
    %53 = vector.broadcast %cst_23 : f32 to vector<2x8x8xf32>
    %54 = arith.mulf %52, %53 : vector<2x8x8xf32>
    %cst_24 = arith.constant -1.000000e+30 : f32
    %55 = vector.shape_cast %9 : vector<1x8x8xi1> to vector<1x8x8xi1>
    %56 = vector.broadcast %55 : vector<1x8x8xi1> to vector<2x8x8xi1>
    %57 = vector.broadcast %cst_24 : f32 to vector<2x8x8xf32>
    %58 = arith.select %56, %54, %57 : vector<2x8x8xi1>, vector<2x8x8xf32>
    %cst_25 = arith.constant dense<0xFF800000> : vector<2x8xf32>
    %59 = vector.multi_reduction <maximumf>, %58, %cst_25 [2] : vector<2x8x8xf32> to vector<2x8xf32>
    %60 = vector.shape_cast %59 : vector<2x8xf32> to vector<2x8x1xf32>
    %61 = vector.broadcast %60 : vector<2x8x1xf32> to vector<2x8x8xf32>
    %62 = arith.subf %58, %61 : vector<2x8x8xf32>
    %63 = math.exp %62 : vector<2x8x8xf32>
    %cst_26 = arith.constant dense<0.000000e+00> : vector<2x8xf32>
    %64 = vector.multi_reduction <add>, %63, %cst_26 [2] : vector<2x8x8xf32> to vector<2x8xf32>
    %65 = vector.shape_cast %64 : vector<2x8xf32> to vector<2x8x1xf32>
    %66 = tpu.reciprocal %65 {approx = true} : vector<2x8x1xf32> -> vector<2x8x1xf32>
    %67 = vector.broadcast %66 : vector<2x8x1xf32> to vector<2x8x8xf32>
    %68 = arith.mulf %63, %67 : vector<2x8x8xf32>
    %69 = arith.truncf %68 : vector<2x8x8xf32> to vector<2x8x8xbf16>
    "tpu.trace_start"() <{level = 10 : i32, message = "bqk,bkd->bqd"}> : () -> ()
    %cst_27 = arith.constant dense<0.000000e+00> : vector<2x8x8xf32>
    %70 = tpu.matmul %69, %51, %cst_27 {dimension_numbers = #tpu.dot_dimension_numbers<[2], [1], [1], [2], [0, 0, 0, 1, 1, 2], [0], [0]>} : vector<2x8x8xbf16>, vector<2x8x8xbf16>, vector<2x8x8xf32> -> vector<2x8x8xf32>
    "tpu.trace_stop"() : () -> ()
    %71 = vector.shape_cast %70 : vector<2x8x8xf32> to vector<16x8xf32>
    %c0_28 = arith.constant 0 : index
    %c0_29 = arith.constant 0 : index
    %c0_30 = arith.constant 0 : index
    %c0_31 = arith.constant 0 : index
    %72 = vector.load %arg7[%c0_28, %c0_29, %c0_30, %c0_31] : memref<2x4x8x32xbf16, #tpu.memory_space<vmem>>, vector<1x1x8x32xbf16>
    %73 = vector.shape_cast %72 : vector<1x1x8x32xbf16> to vector<8x32xbf16>
    %74 = arith.truncf %71 : vector<16x8xf32> to vector<16x8xbf16>
    %cst_32 = arith.constant dense<0.000000e+00> : vector<16x32xf32>
    %75 = tpu.matmul %74, %73, %cst_32 {dimension_numbers = #tpu.dot_dimension_numbers<[1], [0], [0], [1], [0, 0, 1, 1], [], []>} : vector<16x8xbf16>, vector<8x32xbf16>, vector<16x32xf32> -> vector<16x32xf32>
    %76 = arith.addf %45, %75 : vector<16x32xf32>
    %77 = vector.extract_strided_slice %44 {offsets = [0, 0, 8], sizes = [2, 8, 8], strides = [1, 1, 1]} : vector<2x8x96xf32> to vector<2x8x8xf32>
    %78 = arith.truncf %77 : vector<2x8x8xf32> to vector<2x8x8xbf16>
    %79 = vector.extract_strided_slice %44 {offsets = [0, 0, 40], sizes = [2, 8, 8], strides = [1, 1, 1]} : vector<2x8x96xf32> to vector<2x8x8xf32>
    %80 = arith.truncf %79 : vector<2x8x8xf32> to vector<2x8x8xbf16>
    %81 = vector.extract_strided_slice %44 {offsets = [0, 0, 72], sizes = [2, 8, 8], strides = [1, 1, 1]} : vector<2x8x96xf32> to vector<2x8x8xf32>
    %82 = arith.truncf %81 : vector<2x8x8xf32> to vector<2x8x8xbf16>
    "tpu.trace_start"() <{level = 10 : i32, message = "bqd,bkd->bqk"}> : () -> ()
    %cst_33 = arith.constant dense<0.000000e+00> : vector<2x8x8xf32>
    %83 = tpu.matmul %78, %80, %cst_33 {dimension_numbers = #tpu.dot_dimension_numbers<[2], [2], [1], [1], [0, 0, 0, 1, 1, 1], [0], [0]>} : vector<2x8x8xbf16>, vector<2x8x8xbf16>, vector<2x8x8xf32> -> vector<2x8x8xf32>
    "tpu.trace_stop"() : () -> ()
    %cst_34 = arith.constant 0.353553385 : f32
    %84 = vector.broadcast %cst_34 : f32 to vector<2x8x8xf32>
    %85 = arith.mulf %83, %84 : vector<2x8x8xf32>
    %cst_35 = arith.constant -1.000000e+30 : f32
    %86 = vector.shape_cast %9 : vector<1x8x8xi1> to vector<1x8x8xi1>
    %87 = vector.broadcast %86 : vector<1x8x8xi1> to vector<2x8x8xi1>
    %88 = vector.broadcast %cst_35 : f32 to vector<2x8x8xf32>
    %89 = arith.select %87, %85, %88 : vector<2x8x8xi1>, vector<2x8x8xf32>
    %cst_36 = arith.constant dense<0xFF800000> : vector<2x8xf32>
    %90 = vector.multi_reduction <maximumf>, %89, %cst_36 [2] : vector<2x8x8xf32> to vector<2x8xf32>
    %91 = vector.shape_cast %90 : vector<2x8xf32> to vector<2x8x1xf32>
    %92 = vector.broadcast %91 : vector<2x8x1xf32> to vector<2x8x8xf32>
    %93 = arith.subf %89, %92 : vector<2x8x8xf32>
    %94 = math.exp %93 : vector<2x8x8xf32>
    %cst_37 = arith.constant dense<0.000000e+00> : vector<2x8xf32>
    %95 = vector.multi_reduction <add>, %94, %cst_37 [2] : vector<2x8x8xf32> to vector<2x8xf32>
    %96 = vector.shape_cast %95 : vector<2x8xf32> to vector<2x8x1xf32>
    %97 = tpu.reciprocal %96 {approx = true} : vector<2x8x1xf32> -> vector<2x8x1xf32>
    %98 = vector.broadcast %97 : vector<2x8x1xf32> to vector<2x8x8xf32>
    %99 = arith.mulf %94, %98 : vector<2x8x8xf32>
    %100 = arith.truncf %99 : vector<2x8x8xf32> to vector<2x8x8xbf16>
    "tpu.trace_start"() <{level = 10 : i32, message = "bqk,bkd->bqd"}> : () -> ()
    %cst_38 = arith.constant dense<0.000000e+00> : vector<2x8x8xf32>
    %101 = tpu.matmul %100, %82, %cst_38 {dimension_numbers = #tpu.dot_dimension_numbers<[2], [1], [1], [2], [0, 0, 0, 1, 1, 2], [0], [0]>} : vector<2x8x8xbf16>, vector<2x8x8xbf16>, vector<2x8x8xf32> -> vector<2x8x8xf32>
    "tpu.trace_stop"() : () -> ()
    %102 = vector.shape_cast %101 : vector<2x8x8xf32> to vector<16x8xf32>
    %c0_39 = arith.constant 0 : index
    %c1 = arith.constant 1 : index
    %c0_40 = arith.constant 0 : index
    %c0_41 = arith.constant 0 : index
    %103 = vector.load %arg7[%c0_39, %c1, %c0_40, %c0_41] : memref<2x4x8x32xbf16, #tpu.memory_space<vmem>>, vector<1x1x8x32xbf16>
    %104 = vector.shape_cast %103 : vector<1x1x8x32xbf16> to vector<8x32xbf16>
    %105 = arith.truncf %102 : vector<16x8xf32> to vector<16x8xbf16>
    %cst_42 = arith.constant dense<0.000000e+00> : vector<16x32xf32>
    %106 = tpu.matmul %105, %104, %cst_42 {dimension_numbers = #tpu.dot_dimension_numbers<[1], [0], [0], [1], [0, 0, 1, 1], [], []>} : vector<16x8xbf16>, vector<8x32xbf16>, vector<16x32xf32> -> vector<16x32xf32>
    %107 = arith.addf %76, %106 : vector<16x32xf32>
    %108 = vector.extract_strided_slice %44 {offsets = [0, 0, 16], sizes = [2, 8, 8], strides = [1, 1, 1]} : vector<2x8x96xf32> to vector<2x8x8xf32>
    %109 = arith.truncf %108 : vector<2x8x8xf32> to vector<2x8x8xbf16>
    %110 = vector.extract_strided_slice %44 {offsets = [0, 0, 48], sizes = [2, 8, 8], strides = [1, 1, 1]} : vector<2x8x96xf32> to vector<2x8x8xf32>
    %111 = arith.truncf %110 : vector<2x8x8xf32> to vector<2x8x8xbf16>
    %112 = vector.extract_strided_slice %44 {offsets = [0, 0, 80], sizes = [2, 8, 8], strides = [1, 1, 1]} : vector<2x8x96xf32> to vector<2x8x8xf32>
    %113 = arith.truncf %112 : vector<2x8x8xf32> to vector<2x8x8xbf16>
    "tpu.trace_start"() <{level = 10 : i32, message = "bqd,bkd->bqk"}> : () -> ()
    %cst_43 = arith.constant dense<0.000000e+00> : vector<2x8x8xf32>
    %114 = tpu.matmul %109, %111, %cst_43 {dimension_numbers = #tpu.dot_dimension_numbers<[2], [2], [1], [1], [0, 0, 0, 1, 1, 1], [0], [0]>} : vector<2x8x8xbf16>, vector<2x8x8xbf16>, vector<2x8x8xf32> -> vector<2x8x8xf32>
    "tpu.trace_stop"() : () -> ()
    %cst_44 = arith.constant 0.353553385 : f32
    %115 = vector.broadcast %cst_44 : f32 to vector<2x8x8xf32>
    %116 = arith.mulf %114, %115 : vector<2x8x8xf32>
    %cst_45 = arith.constant -1.000000e+30 : f32
    %117 = vector.shape_cast %9 : vector<1x8x8xi1> to vector<1x8x8xi1>
    %118 = vector.broadcast %117 : vector<1x8x8xi1> to vector<2x8x8xi1>
    %119 = vector.broadcast %cst_45 : f32 to vector<2x8x8xf32>
    %120 = arith.select %118, %116, %119 : vector<2x8x8xi1>, vector<2x8x8xf32>
    %cst_46 = arith.constant dense<0xFF800000> : vector<2x8xf32>
    %121 = vector.multi_reduction <maximumf>, %120, %cst_46 [2] : vector<2x8x8xf32> to vector<2x8xf32>
    %122 = vector.shape_cast %121 : vector<2x8xf32> to vector<2x8x1xf32>
    %123 = vector.broadcast %122 : vector<2x8x1xf32> to vector<2x8x8xf32>
    %124 = arith.subf %120, %123 : vector<2x8x8xf32>
    %125 = math.exp %124 : vector<2x8x8xf32>
    %cst_47 = arith.constant dense<0.000000e+00> : vector<2x8xf32>
    %126 = vector.multi_reduction <add>, %125, %cst_47 [2] : vector<2x8x8xf32> to vector<2x8xf32>
    %127 = vector.shape_cast %126 : vector<2x8xf32> to vector<2x8x1xf32>
    %128 = tpu.reciprocal %127 {approx = true} : vector<2x8x1xf32> -> vector<2x8x1xf32>
    %129 = vector.broadcast %128 : vector<2x8x1xf32> to vector<2x8x8xf32>
    %130 = arith.mulf %125, %129 : vector<2x8x8xf32>
    %131 = arith.truncf %130 : vector<2x8x8xf32> to vector<2x8x8xbf16>
    "tpu.trace_start"() <{level = 10 : i32, message = "bqk,bkd->bqd"}> : () -> ()
    %cst_48 = arith.constant dense<0.000000e+00> : vector<2x8x8xf32>
    %132 = tpu.matmul %131, %113, %cst_48 {dimension_numbers = #tpu.dot_dimension_numbers<[2], [1], [1], [2], [0, 0, 0, 1, 1, 2], [0], [0]>} : vector<2x8x8xbf16>, vector<2x8x8xbf16>, vector<2x8x8xf32> -> vector<2x8x8xf32>
    "tpu.trace_stop"() : () -> ()
    %133 = vector.shape_cast %132 : vector<2x8x8xf32> to vector<16x8xf32>
    %c0_49 = arith.constant 0 : index
    %c2 = arith.constant 2 : index
    %c0_50 = arith.constant 0 : index
    %c0_51 = arith.constant 0 : index
    %134 = vector.load %arg7[%c0_49, %c2, %c0_50, %c0_51] : memref<2x4x8x32xbf16, #tpu.memory_space<vmem>>, vector<1x1x8x32xbf16>
    %135 = vector.shape_cast %134 : vector<1x1x8x32xbf16> to vector<8x32xbf16>
    %136 = arith.truncf %133 : vector<16x8xf32> to vector<16x8xbf16>
    %cst_52 = arith.constant dense<0.000000e+00> : vector<16x32xf32>
    %137 = tpu.matmul %136, %135, %cst_52 {dimension_numbers = #tpu.dot_dimension_numbers<[1], [0], [0], [1], [0, 0, 1, 1], [], []>} : vector<16x8xbf16>, vector<8x32xbf16>, vector<16x32xf32> -> vector<16x32xf32>
    %138 = arith.addf %107, %137 : vector<16x32xf32>
    %139 = vector.extract_strided_slice %44 {offsets = [0, 0, 24], sizes = [2, 8, 8], strides = [1, 1, 1]} : vector<2x8x96xf32> to vector<2x8x8xf32>
    %140 = arith.truncf %139 : vector<2x8x8xf32> to vector<2x8x8xbf16>
    %141 = vector.extract_strided_slice %44 {offsets = [0, 0, 56], sizes = [2, 8, 8], strides = [1, 1, 1]} : vector<2x8x96xf32> to vector<2x8x8xf32>
    %142 = arith.truncf %141 : vector<2x8x8xf32> to vector<2x8x8xbf16>
    %143 = vector.extract_strided_slice %44 {offsets = [0, 0, 88], sizes = [2, 8, 8], strides = [1, 1, 1]} : vector<2x8x96xf32> to vector<2x8x8xf32>
    %144 = arith.truncf %143 : vector<2x8x8xf32> to vector<2x8x8xbf16>
    "tpu.trace_start"() <{level = 10 : i32, message = "bqd,bkd->bqk"}> : () -> ()
    %cst_53 = arith.constant dense<0.000000e+00> : vector<2x8x8xf32>
    %145 = tpu.matmul %140, %142, %cst_53 {dimension_numbers = #tpu.dot_dimension_numbers<[2], [2], [1], [1], [0, 0, 0, 1, 1, 1], [0], [0]>} : vector<2x8x8xbf16>, vector<2x8x8xbf16>, vector<2x8x8xf32> -> vector<2x8x8xf32>
    "tpu.trace_stop"() : () -> ()
    %cst_54 = arith.constant 0.353553385 : f32
    %146 = vector.broadcast %cst_54 : f32 to vector<2x8x8xf32>
    %147 = arith.mulf %145, %146 : vector<2x8x8xf32>
    %cst_55 = arith.constant -1.000000e+30 : f32
    %148 = vector.shape_cast %9 : vector<1x8x8xi1> to vector<1x8x8xi1>
    %149 = vector.broadcast %148 : vector<1x8x8xi1> to vector<2x8x8xi1>
    %150 = vector.broadcast %cst_55 : f32 to vector<2x8x8xf32>
    %151 = arith.select %149, %147, %150 : vector<2x8x8xi1>, vector<2x8x8xf32>
    %cst_56 = arith.constant dense<0xFF800000> : vector<2x8xf32>
    %152 = vector.multi_reduction <maximumf>, %151, %cst_56 [2] : vector<2x8x8xf32> to vector<2x8xf32>
    %153 = vector.shape_cast %152 : vector<2x8xf32> to vector<2x8x1xf32>
    %154 = vector.broadcast %153 : vector<2x8x1xf32> to vector<2x8x8xf32>
    %155 = arith.subf %151, %154 : vector<2x8x8xf32>
    %156 = math.exp %155 : vector<2x8x8xf32>
    %cst_57 = arith.constant dense<0.000000e+00> : vector<2x8xf32>
    %157 = vector.multi_reduction <add>, %156, %cst_57 [2] : vector<2x8x8xf32> to vector<2x8xf32>
    %158 = vector.shape_cast %157 : vector<2x8xf32> to vector<2x8x1xf32>
    %159 = tpu.reciprocal %158 {approx = true} : vector<2x8x1xf32> -> vector<2x8x1xf32>
    %160 = vector.broadcast %159 : vector<2x8x1xf32> to vector<2x8x8xf32>
    %161 = arith.mulf %156, %160 : vector<2x8x8xf32>
    %162 = arith.truncf %161 : vector<2x8x8xf32> to vector<2x8x8xbf16>
    "tpu.trace_start"() <{level = 10 : i32, message = "bqk,bkd->bqd"}> : () -> ()
    %cst_58 = arith.constant dense<0.000000e+00> : vector<2x8x8xf32>
    %163 = tpu.matmul %162, %144, %cst_58 {dimension_numbers = #tpu.dot_dimension_numbers<[2], [1], [1], [2], [0, 0, 0, 1, 1, 2], [0], [0]>} : vector<2x8x8xbf16>, vector<2x8x8xbf16>, vector<2x8x8xf32> -> vector<2x8x8xf32>
    "tpu.trace_stop"() : () -> ()
    %164 = vector.shape_cast %163 : vector<2x8x8xf32> to vector<16x8xf32>
    %c0_59 = arith.constant 0 : index
    %c3 = arith.constant 3 : index
    %c0_60 = arith.constant 0 : index
    %c0_61 = arith.constant 0 : index
    %165 = vector.load %arg7[%c0_59, %c3, %c0_60, %c0_61] : memref<2x4x8x32xbf16, #tpu.memory_space<vmem>>, vector<1x1x8x32xbf16>
    %166 = vector.shape_cast %165 : vector<1x1x8x32xbf16> to vector<8x32xbf16>
    %167 = arith.truncf %164 : vector<16x8xf32> to vector<16x8xbf16>
    %cst_62 = arith.constant dense<0.000000e+00> : vector<16x32xf32>
    %168 = tpu.matmul %167, %166, %cst_62 {dimension_numbers = #tpu.dot_dimension_numbers<[1], [0], [0], [1], [0, 0, 1, 1], [], []>} : vector<16x8xbf16>, vector<8x32xbf16>, vector<16x32xf32> -> vector<16x32xf32>
    %169 = arith.addf %138, %168 : vector<16x32xf32>
    %170 = arith.addf %5, %169 : vector<16x32xf32>
    %c0_63 = arith.constant 0 : index
    %c0_64 = arith.constant 0 : index
    %c0_65 = arith.constant 0 : index
    %171 = vector.load %arg8[%c0_63, %c0_64, %c0_65] : memref<2x1x32xf32, #tpu.memory_space<vmem>>, vector<1x1x32xf32>
    %172 = vector.shape_cast %171 : vector<1x1x32xf32> to vector<1x32xf32>
    %173 = vector.broadcast %172 : vector<1x32xf32> to vector<16x32xf32>
    %174 = arith.addf %170, %173 : vector<16x32xf32>
    %c0_66 = arith.constant 0 : index
    %c0_67 = arith.constant 0 : index
    %c0_68 = arith.constant 0 : index
    %175 = vector.load %arg9[%c0_66, %c0_67, %c0_68] : memref<2x1x32xf32, #tpu.memory_space<vmem>>, vector<1x1x32xf32>
    %176 = vector.shape_cast %175 : vector<1x1x32xf32> to vector<1x32xf32>
    %c0_69 = arith.constant 0 : index
    %c0_70 = arith.constant 0 : index
    %c0_71 = arith.constant 0 : index
    %177 = vector.load %arg10[%c0_69, %c0_70, %c0_71] : memref<2x1x32xf32, #tpu.memory_space<vmem>>, vector<1x1x32xf32>
    %178 = vector.shape_cast %177 : vector<1x1x32xf32> to vector<1x32xf32>
    %cst_72 = arith.constant dense<0.000000e+00> : vector<16xf32>
    %179 = vector.multi_reduction <add>, %174, %cst_72 [1] : vector<16x32xf32> to vector<16xf32>
    %180 = vector.shape_cast %179 : vector<16xf32> to vector<16x1xf32>
    %cst_73 = arith.constant 3.125000e-02 : f32
    %181 = vector.broadcast %cst_73 : f32 to vector<16x1xf32>
    %182 = arith.mulf %180, %181 : vector<16x1xf32>
    %183 = arith.mulf %174, %174 : vector<16x32xf32>
    %cst_74 = arith.constant dense<0.000000e+00> : vector<16xf32>
    %184 = vector.multi_reduction <add>, %183, %cst_74 [1] : vector<16x32xf32> to vector<16xf32>
    %185 = vector.shape_cast %184 : vector<16xf32> to vector<16x1xf32>
    %cst_75 = arith.constant 3.125000e-02 : f32
    %186 = vector.broadcast %cst_75 : f32 to vector<16x1xf32>
    %187 = arith.mulf %185, %186 : vector<16x1xf32>
    %188 = arith.mulf %182, %182 : vector<16x1xf32>
    %189 = arith.subf %187, %188 : vector<16x1xf32>
    %190 = vector.broadcast %182 : vector<16x1xf32> to vector<16x32xf32>
    %191 = arith.subf %174, %190 : vector<16x32xf32>
    %cst_76 = arith.constant 9.99999974E-6 : f32
    %192 = vector.broadcast %cst_76 : f32 to vector<16x1xf32>
    %193 = arith.addf %189, %192 : vector<16x1xf32>
    %194 = math.rsqrt %193 : vector<16x1xf32>
    %195 = vector.broadcast %194 : vector<16x1xf32> to vector<16x32xf32>
    %196 = arith.mulf %191, %195 : vector<16x32xf32>
    %197 = vector.broadcast %176 : vector<1x32xf32> to vector<16x32xf32>
    %198 = arith.mulf %196, %197 : vector<16x32xf32>
    %199 = vector.broadcast %178 : vector<1x32xf32> to vector<16x32xf32>
    %200 = arith.addf %198, %199 : vector<16x32xf32>
    %c0_77 = arith.constant 0 : index
    %c0_78 = arith.constant 0 : index
    %c0_79 = arith.constant 0 : index
    %201 = vector.load %arg11[%c0_77, %c0_78, %c0_79] : memref<2x32x128xbf16, #tpu.memory_space<vmem>>, vector<1x32x128xbf16>
    %202 = vector.shape_cast %201 : vector<1x32x128xbf16> to vector<32x128xbf16>
    %203 = arith.truncf %200 : vector<16x32xf32> to vector<16x32xbf16>
    %cst_80 = arith.constant dense<0.000000e+00> : vector<16x128xf32>
    %204 = tpu.matmul %203, %202, %cst_80 {dimension_numbers = #tpu.dot_dimension_numbers<[1], [0], [0], [1], [0, 0, 1, 1], [], []>} : vector<16x32xbf16>, vector<32x128xbf16>, vector<16x128xf32> -> vector<16x128xf32>
    %c0_81 = arith.constant 0 : index
    %c0_82 = arith.constant 0 : index
    %c0_83 = arith.constant 0 : index
    %205 = vector.load %arg12[%c0_81, %c0_82, %c0_83] : memref<2x1x128xf32, #tpu.memory_space<vmem>>, vector<1x1x128xf32>
    %206 = vector.shape_cast %205 : vector<1x1x128xf32> to vector<1x128xf32>
    %207 = vector.broadcast %206 : vector<1x128xf32> to vector<16x128xf32>
    %208 = arith.addf %204, %207 : vector<16x128xf32>
    %cst_84 = arith.constant 1.702000e+00 : f32
    %209 = vector.broadcast %cst_84 : f32 to vector<16x128xf32>
    %210 = arith.mulf %209, %208 : vector<16x128xf32>
    %211 = arith.negf %210 : vector<16x128xf32>
    %212 = math.exp %211 : vector<16x128xf32>
    %cst_85 = arith.constant 1.000000e+00 : f32
    %213 = vector.broadcast %cst_85 : f32 to vector<16x128xf32>
    %214 = arith.addf %213, %212 : vector<16x128xf32>
    %215 = arith.divf %213, %214 : vector<16x128xf32>
    %216 = arith.mulf %208, %215 : vector<16x128xf32>
    %c0_86 = arith.constant 0 : index
    %c0_87 = arith.constant 0 : index
    %c0_88 = arith.constant 0 : index
    %217 = vector.load %arg13[%c0_86, %c0_87, %c0_88] : memref<2x128x32xbf16, #tpu.memory_space<vmem>>, vector<1x128x32xbf16>
    %218 = vector.shape_cast %217 : vector<1x128x32xbf16> to vector<128x32xbf16>
    %219 = arith.truncf %216 : vector<16x128xf32> to vector<16x128xbf16>
    %cst_89 = arith.constant dense<0.000000e+00> : vector<16x32xf32>
    %220 = tpu.matmul %219, %218, %cst_89 {dimension_numbers = #tpu.dot_dimension_numbers<[1], [0], [0], [1], [0, 0, 1, 1], [], []>} : vector<16x128xbf16>, vector<128x32xbf16>, vector<16x32xf32> -> vector<16x32xf32>
    %221 = arith.addf %174, %220 : vector<16x32xf32>
    %c0_90 = arith.constant 0 : index
    %c0_91 = arith.constant 0 : index
    %c0_92 = arith.constant 0 : index
    %222 = vector.load %arg14[%c0_90, %c0_91, %c0_92] : memref<2x1x32xf32, #tpu.memory_space<vmem>>, vector<1x1x32xf32>
    %223 = vector.shape_cast %222 : vector<1x1x32xf32> to vector<1x32xf32>
    %224 = vector.broadcast %223 : vector<1x32xf32> to vector<16x32xf32>
    %225 = arith.addf %221, %224 : vector<16x32xf32>
    %c1_93 = arith.constant 1 : index
    %c0_94 = arith.constant 0 : index
    %c0_95 = arith.constant 0 : index
    %226 = vector.load %arg3[%c1_93, %c0_94, %c0_95] : memref<2x1x32xf32, #tpu.memory_space<vmem>>, vector<1x1x32xf32>
    %227 = vector.shape_cast %226 : vector<1x1x32xf32> to vector<1x32xf32>
    %c1_96 = arith.constant 1 : index
    %c0_97 = arith.constant 0 : index
    %c0_98 = arith.constant 0 : index
    %228 = vector.load %arg4[%c1_96, %c0_97, %c0_98] : memref<2x1x32xf32, #tpu.memory_space<vmem>>, vector<1x1x32xf32>
    %229 = vector.shape_cast %228 : vector<1x1x32xf32> to vector<1x32xf32>
    %cst_99 = arith.constant dense<0.000000e+00> : vector<16xf32>
    %230 = vector.multi_reduction <add>, %225, %cst_99 [1] : vector<16x32xf32> to vector<16xf32>
    %231 = vector.shape_cast %230 : vector<16xf32> to vector<16x1xf32>
    %cst_100 = arith.constant 3.125000e-02 : f32
    %232 = vector.broadcast %cst_100 : f32 to vector<16x1xf32>
    %233 = arith.mulf %231, %232 : vector<16x1xf32>
    %234 = arith.mulf %225, %225 : vector<16x32xf32>
    %cst_101 = arith.constant dense<0.000000e+00> : vector<16xf32>
    %235 = vector.multi_reduction <add>, %234, %cst_101 [1] : vector<16x32xf32> to vector<16xf32>
    %236 = vector.shape_cast %235 : vector<16xf32> to vector<16x1xf32>
    %cst_102 = arith.constant 3.125000e-02 : f32
    %237 = vector.broadcast %cst_102 : f32 to vector<16x1xf32>
    %238 = arith.mulf %236, %237 : vector<16x1xf32>
    %239 = arith.mulf %233, %233 : vector<16x1xf32>
    %240 = arith.subf %238, %239 : vector<16x1xf32>
    %241 = vector.broadcast %233 : vector<16x1xf32> to vector<16x32xf32>
    %242 = arith.subf %225, %241 : vector<16x32xf32>
    %cst_103 = arith.constant 9.99999974E-6 : f32
    %243 = vector.broadcast %cst_103 : f32 to vector<16x1xf32>
    %244 = arith.addf %240, %243 : vector<16x1xf32>
    %245 = math.rsqrt %244 : vector<16x1xf32>
    %246 = vector.broadcast %245 : vector<16x1xf32> to vector<16x32xf32>
    %247 = arith.mulf %242, %246 : vector<16x32xf32>
    %248 = vector.broadcast %227 : vector<1x32xf32> to vector<16x32xf32>
    %249 = arith.mulf %247, %248 : vector<16x32xf32>
    %250 = vector.broadcast %229 : vector<1x32xf32> to vector<16x32xf32>
    %251 = arith.addf %249, %250 : vector<16x32xf32>
    %c1_104 = arith.constant 1 : index
    %c0_105 = arith.constant 0 : index
    %c0_106 = arith.constant 0 : index
    %252 = vector.load %arg5[%c1_104, %c0_105, %c0_106] : memref<2x32x96xbf16, #tpu.memory_space<vmem>>, vector<1x32x96xbf16>
    %253 = vector.shape_cast %252 : vector<1x32x96xbf16> to vector<32x96xbf16>
    %254 = arith.truncf %251 : vector<16x32xf32> to vector<16x32xbf16>
    %cst_107 = arith.constant dense<0.000000e+00> : vector<16x96xf32>
    %255 = tpu.matmul %254, %253, %cst_107 {dimension_numbers = #tpu.dot_dimension_numbers<[1], [0], [0], [1], [0, 0, 1, 1], [], []>} : vector<16x32xbf16>, vector<32x96xbf16>, vector<16x96xf32> -> vector<16x96xf32>
    %c1_108 = arith.constant 1 : index
    %c0_109 = arith.constant 0 : index
    %c0_110 = arith.constant 0 : index
    %256 = vector.load %arg6[%c1_108, %c0_109, %c0_110] : memref<2x1x96xf32, #tpu.memory_space<vmem>>, vector<1x1x96xf32>
    %257 = vector.shape_cast %256 : vector<1x1x96xf32> to vector<1x96xf32>
    %258 = vector.broadcast %257 : vector<1x96xf32> to vector<16x96xf32>
    %259 = arith.addf %255, %258 : vector<16x96xf32>
    %260 = vector.shape_cast %259 : vector<16x96xf32> to vector<2x8x96xf32>
    %cst_111 = arith.constant 0.000000e+00 : f32
    %261 = vector.broadcast %cst_111 : f32 to vector<16x32xf32>
    %262 = vector.extract_strided_slice %260 {offsets = [0, 0, 0], sizes = [2, 8, 8], strides = [1, 1, 1]} : vector<2x8x96xf32> to vector<2x8x8xf32>
    %263 = arith.truncf %262 : vector<2x8x8xf32> to vector<2x8x8xbf16>
    %264 = vector.extract_strided_slice %260 {offsets = [0, 0, 32], sizes = [2, 8, 8], strides = [1, 1, 1]} : vector<2x8x96xf32> to vector<2x8x8xf32>
    %265 = arith.truncf %264 : vector<2x8x8xf32> to vector<2x8x8xbf16>
    %266 = vector.extract_strided_slice %260 {offsets = [0, 0, 64], sizes = [2, 8, 8], strides = [1, 1, 1]} : vector<2x8x96xf32> to vector<2x8x8xf32>
    %267 = arith.truncf %266 : vector<2x8x8xf32> to vector<2x8x8xbf16>
    "tpu.trace_start"() <{level = 10 : i32, message = "bqd,bkd->bqk"}> : () -> ()
    %cst_112 = arith.constant dense<0.000000e+00> : vector<2x8x8xf32>
    %268 = tpu.matmul %263, %265, %cst_112 {dimension_numbers = #tpu.dot_dimension_numbers<[2], [2], [1], [1], [0, 0, 0, 1, 1, 1], [0], [0]>} : vector<2x8x8xbf16>, vector<2x8x8xbf16>, vector<2x8x8xf32> -> vector<2x8x8xf32>
    "tpu.trace_stop"() : () -> ()
    %cst_113 = arith.constant 0.353553385 : f32
    %269 = vector.broadcast %cst_113 : f32 to vector<2x8x8xf32>
    %270 = arith.mulf %268, %269 : vector<2x8x8xf32>
    %cst_114 = arith.constant -1.000000e+30 : f32
    %271 = vector.shape_cast %9 : vector<1x8x8xi1> to vector<1x8x8xi1>
    %272 = vector.broadcast %271 : vector<1x8x8xi1> to vector<2x8x8xi1>
    %273 = vector.broadcast %cst_114 : f32 to vector<2x8x8xf32>
    %274 = arith.select %272, %270, %273 : vector<2x8x8xi1>, vector<2x8x8xf32>
    %cst_115 = arith.constant dense<0xFF800000> : vector<2x8xf32>
    %275 = vector.multi_reduction <maximumf>, %274, %cst_115 [2] : vector<2x8x8xf32> to vector<2x8xf32>
    %276 = vector.shape_cast %275 : vector<2x8xf32> to vector<2x8x1xf32>
    %277 = vector.broadcast %276 : vector<2x8x1xf32> to vector<2x8x8xf32>
    %278 = arith.subf %274, %277 : vector<2x8x8xf32>
    %279 = math.exp %278 : vector<2x8x8xf32>
    %cst_116 = arith.constant dense<0.000000e+00> : vector<2x8xf32>
    %280 = vector.multi_reduction <add>, %279, %cst_116 [2] : vector<2x8x8xf32> to vector<2x8xf32>
    %281 = vector.shape_cast %280 : vector<2x8xf32> to vector<2x8x1xf32>
    %282 = tpu.reciprocal %281 {approx = true} : vector<2x8x1xf32> -> vector<2x8x1xf32>
    %283 = vector.broadcast %282 : vector<2x8x1xf32> to vector<2x8x8xf32>
    %284 = arith.mulf %279, %283 : vector<2x8x8xf32>
    %285 = arith.truncf %284 : vector<2x8x8xf32> to vector<2x8x8xbf16>
    "tpu.trace_start"() <{level = 10 : i32, message = "bqk,bkd->bqd"}> : () -> ()
    %cst_117 = arith.constant dense<0.000000e+00> : vector<2x8x8xf32>
    %286 = tpu.matmul %285, %267, %cst_117 {dimension_numbers = #tpu.dot_dimension_numbers<[2], [1], [1], [2], [0, 0, 0, 1, 1, 2], [0], [0]>} : vector<2x8x8xbf16>, vector<2x8x8xbf16>, vector<2x8x8xf32> -> vector<2x8x8xf32>
    "tpu.trace_stop"() : () -> ()
    %287 = vector.shape_cast %286 : vector<2x8x8xf32> to vector<16x8xf32>
    %c1_118 = arith.constant 1 : index
    %c0_119 = arith.constant 0 : index
    %c0_120 = arith.constant 0 : index
    %c0_121 = arith.constant 0 : index
    %288 = vector.load %arg7[%c1_118, %c0_119, %c0_120, %c0_121] : memref<2x4x8x32xbf16, #tpu.memory_space<vmem>>, vector<1x1x8x32xbf16>
    %289 = vector.shape_cast %288 : vector<1x1x8x32xbf16> to vector<8x32xbf16>
    %290 = arith.truncf %287 : vector<16x8xf32> to vector<16x8xbf16>
    %cst_122 = arith.constant dense<0.000000e+00> : vector<16x32xf32>
    %291 = tpu.matmul %290, %289, %cst_122 {dimension_numbers = #tpu.dot_dimension_numbers<[1], [0], [0], [1], [0, 0, 1, 1], [], []>} : vector<16x8xbf16>, vector<8x32xbf16>, vector<16x32xf32> -> vector<16x32xf32>
    %292 = arith.addf %261, %291 : vector<16x32xf32>
    %293 = vector.extract_strided_slice %260 {offsets = [0, 0, 8], sizes = [2, 8, 8], strides = [1, 1, 1]} : vector<2x8x96xf32> to vector<2x8x8xf32>
    %294 = arith.truncf %293 : vector<2x8x8xf32> to vector<2x8x8xbf16>
    %295 = vector.extract_strided_slice %260 {offsets = [0, 0, 40], sizes = [2, 8, 8], strides = [1, 1, 1]} : vector<2x8x96xf32> to vector<2x8x8xf32>
    %296 = arith.truncf %295 : vector<2x8x8xf32> to vector<2x8x8xbf16>
    %297 = vector.extract_strided_slice %260 {offsets = [0, 0, 72], sizes = [2, 8, 8], strides = [1, 1, 1]} : vector<2x8x96xf32> to vector<2x8x8xf32>
    %298 = arith.truncf %297 : vector<2x8x8xf32> to vector<2x8x8xbf16>
    "tpu.trace_start"() <{level = 10 : i32, message = "bqd,bkd->bqk"}> : () -> ()
    %cst_123 = arith.constant dense<0.000000e+00> : vector<2x8x8xf32>
    %299 = tpu.matmul %294, %296, %cst_123 {dimension_numbers = #tpu.dot_dimension_numbers<[2], [2], [1], [1], [0, 0, 0, 1, 1, 1], [0], [0]>} : vector<2x8x8xbf16>, vector<2x8x8xbf16>, vector<2x8x8xf32> -> vector<2x8x8xf32>
    "tpu.trace_stop"() : () -> ()
    %cst_124 = arith.constant 0.353553385 : f32
    %300 = vector.broadcast %cst_124 : f32 to vector<2x8x8xf32>
    %301 = arith.mulf %299, %300 : vector<2x8x8xf32>
    %cst_125 = arith.constant -1.000000e+30 : f32
    %302 = vector.shape_cast %9 : vector<1x8x8xi1> to vector<1x8x8xi1>
    %303 = vector.broadcast %302 : vector<1x8x8xi1> to vector<2x8x8xi1>
    %304 = vector.broadcast %cst_125 : f32 to vector<2x8x8xf32>
    %305 = arith.select %303, %301, %304 : vector<2x8x8xi1>, vector<2x8x8xf32>
    %cst_126 = arith.constant dense<0xFF800000> : vector<2x8xf32>
    %306 = vector.multi_reduction <maximumf>, %305, %cst_126 [2] : vector<2x8x8xf32> to vector<2x8xf32>
    %307 = vector.shape_cast %306 : vector<2x8xf32> to vector<2x8x1xf32>
    %308 = vector.broadcast %307 : vector<2x8x1xf32> to vector<2x8x8xf32>
    %309 = arith.subf %305, %308 : vector<2x8x8xf32>
    %310 = math.exp %309 : vector<2x8x8xf32>
    %cst_127 = arith.constant dense<0.000000e+00> : vector<2x8xf32>
    %311 = vector.multi_reduction <add>, %310, %cst_127 [2] : vector<2x8x8xf32> to vector<2x8xf32>
    %312 = vector.shape_cast %311 : vector<2x8xf32> to vector<2x8x1xf32>
    %313 = tpu.reciprocal %312 {approx = true} : vector<2x8x1xf32> -> vector<2x8x1xf32>
    %314 = vector.broadcast %313 : vector<2x8x1xf32> to vector<2x8x8xf32>
    %315 = arith.mulf %310, %314 : vector<2x8x8xf32>
    %316 = arith.truncf %315 : vector<2x8x8xf32> to vector<2x8x8xbf16>
    "tpu.trace_start"() <{level = 10 : i32, message = "bqk,bkd->bqd"}> : () -> ()
    %cst_128 = arith.constant dense<0.000000e+00> : vector<2x8x8xf32>
    %317 = tpu.matmul %316, %298, %cst_128 {dimension_numbers = #tpu.dot_dimension_numbers<[2], [1], [1], [2], [0, 0, 0, 1, 1, 2], [0], [0]>} : vector<2x8x8xbf16>, vector<2x8x8xbf16>, vector<2x8x8xf32> -> vector<2x8x8xf32>
    "tpu.trace_stop"() : () -> ()
    %318 = vector.shape_cast %317 : vector<2x8x8xf32> to vector<16x8xf32>
    %c1_129 = arith.constant 1 : index
    %c1_130 = arith.constant 1 : index
    %c0_131 = arith.constant 0 : index
    %c0_132 = arith.constant 0 : index
    %319 = vector.load %arg7[%c1_129, %c1_130, %c0_131, %c0_132] : memref<2x4x8x32xbf16, #tpu.memory_space<vmem>>, vector<1x1x8x32xbf16>
    %320 = vector.shape_cast %319 : vector<1x1x8x32xbf16> to vector<8x32xbf16>
    %321 = arith.truncf %318 : vector<16x8xf32> to vector<16x8xbf16>
    %cst_133 = arith.constant dense<0.000000e+00> : vector<16x32xf32>
    %322 = tpu.matmul %321, %320, %cst_133 {dimension_numbers = #tpu.dot_dimension_numbers<[1], [0], [0], [1], [0, 0, 1, 1], [], []>} : vector<16x8xbf16>, vector<8x32xbf16>, vector<16x32xf32> -> vector<16x32xf32>
    %323 = arith.addf %292, %322 : vector<16x32xf32>
    %324 = vector.extract_strided_slice %260 {offsets = [0, 0, 16], sizes = [2, 8, 8], strides = [1, 1, 1]} : vector<2x8x96xf32> to vector<2x8x8xf32>
    %325 = arith.truncf %324 : vector<2x8x8xf32> to vector<2x8x8xbf16>
    %326 = vector.extract_strided_slice %260 {offsets = [0, 0, 48], sizes = [2, 8, 8], strides = [1, 1, 1]} : vector<2x8x96xf32> to vector<2x8x8xf32>
    %327 = arith.truncf %326 : vector<2x8x8xf32> to vector<2x8x8xbf16>
    %328 = vector.extract_strided_slice %260 {offsets = [0, 0, 80], sizes = [2, 8, 8], strides = [1, 1, 1]} : vector<2x8x96xf32> to vector<2x8x8xf32>
    %329 = arith.truncf %328 : vector<2x8x8xf32> to vector<2x8x8xbf16>
    "tpu.trace_start"() <{level = 10 : i32, message = "bqd,bkd->bqk"}> : () -> ()
    %cst_134 = arith.constant dense<0.000000e+00> : vector<2x8x8xf32>
    %330 = tpu.matmul %325, %327, %cst_134 {dimension_numbers = #tpu.dot_dimension_numbers<[2], [2], [1], [1], [0, 0, 0, 1, 1, 1], [0], [0]>} : vector<2x8x8xbf16>, vector<2x8x8xbf16>, vector<2x8x8xf32> -> vector<2x8x8xf32>
    "tpu.trace_stop"() : () -> ()
    %cst_135 = arith.constant 0.353553385 : f32
    %331 = vector.broadcast %cst_135 : f32 to vector<2x8x8xf32>
    %332 = arith.mulf %330, %331 : vector<2x8x8xf32>
    %cst_136 = arith.constant -1.000000e+30 : f32
    %333 = vector.shape_cast %9 : vector<1x8x8xi1> to vector<1x8x8xi1>
    %334 = vector.broadcast %333 : vector<1x8x8xi1> to vector<2x8x8xi1>
    %335 = vector.broadcast %cst_136 : f32 to vector<2x8x8xf32>
    %336 = arith.select %334, %332, %335 : vector<2x8x8xi1>, vector<2x8x8xf32>
    %cst_137 = arith.constant dense<0xFF800000> : vector<2x8xf32>
    %337 = vector.multi_reduction <maximumf>, %336, %cst_137 [2] : vector<2x8x8xf32> to vector<2x8xf32>
    %338 = vector.shape_cast %337 : vector<2x8xf32> to vector<2x8x1xf32>
    %339 = vector.broadcast %338 : vector<2x8x1xf32> to vector<2x8x8xf32>
    %340 = arith.subf %336, %339 : vector<2x8x8xf32>
    %341 = math.exp %340 : vector<2x8x8xf32>
    %cst_138 = arith.constant dense<0.000000e+00> : vector<2x8xf32>
    %342 = vector.multi_reduction <add>, %341, %cst_138 [2] : vector<2x8x8xf32> to vector<2x8xf32>
    %343 = vector.shape_cast %342 : vector<2x8xf32> to vector<2x8x1xf32>
    %344 = tpu.reciprocal %343 {approx = true} : vector<2x8x1xf32> -> vector<2x8x1xf32>
    %345 = vector.broadcast %344 : vector<2x8x1xf32> to vector<2x8x8xf32>
    %346 = arith.mulf %341, %345 : vector<2x8x8xf32>
    %347 = arith.truncf %346 : vector<2x8x8xf32> to vector<2x8x8xbf16>
    "tpu.trace_start"() <{level = 10 : i32, message = "bqk,bkd->bqd"}> : () -> ()
    %cst_139 = arith.constant dense<0.000000e+00> : vector<2x8x8xf32>
    %348 = tpu.matmul %347, %329, %cst_139 {dimension_numbers = #tpu.dot_dimension_numbers<[2], [1], [1], [2], [0, 0, 0, 1, 1, 2], [0], [0]>} : vector<2x8x8xbf16>, vector<2x8x8xbf16>, vector<2x8x8xf32> -> vector<2x8x8xf32>
    "tpu.trace_stop"() : () -> ()
    %349 = vector.shape_cast %348 : vector<2x8x8xf32> to vector<16x8xf32>
    %c1_140 = arith.constant 1 : index
    %c2_141 = arith.constant 2 : index
    %c0_142 = arith.constant 0 : index
    %c0_143 = arith.constant 0 : index
    %350 = vector.load %arg7[%c1_140, %c2_141, %c0_142, %c0_143] : memref<2x4x8x32xbf16, #tpu.memory_space<vmem>>, vector<1x1x8x32xbf16>
    %351 = vector.shape_cast %350 : vector<1x1x8x32xbf16> to vector<8x32xbf16>
    %352 = arith.truncf %349 : vector<16x8xf32> to vector<16x8xbf16>
    %cst_144 = arith.constant dense<0.000000e+00> : vector<16x32xf32>
    %353 = tpu.matmul %352, %351, %cst_144 {dimension_numbers = #tpu.dot_dimension_numbers<[1], [0], [0], [1], [0, 0, 1, 1], [], []>} : vector<16x8xbf16>, vector<8x32xbf16>, vector<16x32xf32> -> vector<16x32xf32>
    %354 = arith.addf %323, %353 : vector<16x32xf32>
    %355 = vector.extract_strided_slice %260 {offsets = [0, 0, 24], sizes = [2, 8, 8], strides = [1, 1, 1]} : vector<2x8x96xf32> to vector<2x8x8xf32>
    %356 = arith.truncf %355 : vector<2x8x8xf32> to vector<2x8x8xbf16>
    %357 = vector.extract_strided_slice %260 {offsets = [0, 0, 56], sizes = [2, 8, 8], strides = [1, 1, 1]} : vector<2x8x96xf32> to vector<2x8x8xf32>
    %358 = arith.truncf %357 : vector<2x8x8xf32> to vector<2x8x8xbf16>
    %359 = vector.extract_strided_slice %260 {offsets = [0, 0, 88], sizes = [2, 8, 8], strides = [1, 1, 1]} : vector<2x8x96xf32> to vector<2x8x8xf32>
    %360 = arith.truncf %359 : vector<2x8x8xf32> to vector<2x8x8xbf16>
    "tpu.trace_start"() <{level = 10 : i32, message = "bqd,bkd->bqk"}> : () -> ()
    %cst_145 = arith.constant dense<0.000000e+00> : vector<2x8x8xf32>
    %361 = tpu.matmul %356, %358, %cst_145 {dimension_numbers = #tpu.dot_dimension_numbers<[2], [2], [1], [1], [0, 0, 0, 1, 1, 1], [0], [0]>} : vector<2x8x8xbf16>, vector<2x8x8xbf16>, vector<2x8x8xf32> -> vector<2x8x8xf32>
    "tpu.trace_stop"() : () -> ()
    %cst_146 = arith.constant 0.353553385 : f32
    %362 = vector.broadcast %cst_146 : f32 to vector<2x8x8xf32>
    %363 = arith.mulf %361, %362 : vector<2x8x8xf32>
    %cst_147 = arith.constant -1.000000e+30 : f32
    %364 = vector.shape_cast %9 : vector<1x8x8xi1> to vector<1x8x8xi1>
    %365 = vector.broadcast %364 : vector<1x8x8xi1> to vector<2x8x8xi1>
    %366 = vector.broadcast %cst_147 : f32 to vector<2x8x8xf32>
    %367 = arith.select %365, %363, %366 : vector<2x8x8xi1>, vector<2x8x8xf32>
    %cst_148 = arith.constant dense<0xFF800000> : vector<2x8xf32>
    %368 = vector.multi_reduction <maximumf>, %367, %cst_148 [2] : vector<2x8x8xf32> to vector<2x8xf32>
    %369 = vector.shape_cast %368 : vector<2x8xf32> to vector<2x8x1xf32>
    %370 = vector.broadcast %369 : vector<2x8x1xf32> to vector<2x8x8xf32>
    %371 = arith.subf %367, %370 : vector<2x8x8xf32>
    %372 = math.exp %371 : vector<2x8x8xf32>
    %cst_149 = arith.constant dense<0.000000e+00> : vector<2x8xf32>
    %373 = vector.multi_reduction <add>, %372, %cst_149 [2] : vector<2x8x8xf32> to vector<2x8xf32>
    %374 = vector.shape_cast %373 : vector<2x8xf32> to vector<2x8x1xf32>
    %375 = tpu.reciprocal %374 {approx = true} : vector<2x8x1xf32> -> vector<2x8x1xf32>
    %376 = vector.broadcast %375 : vector<2x8x1xf32> to vector<2x8x8xf32>
    %377 = arith.mulf %372, %376 : vector<2x8x8xf32>
    %378 = arith.truncf %377 : vector<2x8x8xf32> to vector<2x8x8xbf16>
    "tpu.trace_start"() <{level = 10 : i32, message = "bqk,bkd->bqd"}> : () -> ()
    %cst_150 = arith.constant dense<0.000000e+00> : vector<2x8x8xf32>
    %379 = tpu.matmul %378, %360, %cst_150 {dimension_numbers = #tpu.dot_dimension_numbers<[2], [1], [1], [2], [0, 0, 0, 1, 1, 2], [0], [0]>} : vector<2x8x8xbf16>, vector<2x8x8xbf16>, vector<2x8x8xf32> -> vector<2x8x8xf32>
    "tpu.trace_stop"() : () -> ()
    %380 = vector.shape_cast %379 : vector<2x8x8xf32> to vector<16x8xf32>
    %c1_151 = arith.constant 1 : index
    %c3_152 = arith.constant 3 : index
    %c0_153 = arith.constant 0 : index
    %c0_154 = arith.constant 0 : index
    %381 = vector.load %arg7[%c1_151, %c3_152, %c0_153, %c0_154] : memref<2x4x8x32xbf16, #tpu.memory_space<vmem>>, vector<1x1x8x32xbf16>
    %382 = vector.shape_cast %381 : vector<1x1x8x32xbf16> to vector<8x32xbf16>
    %383 = arith.truncf %380 : vector<16x8xf32> to vector<16x8xbf16>
    %cst_155 = arith.constant dense<0.000000e+00> : vector<16x32xf32>
    %384 = tpu.matmul %383, %382, %cst_155 {dimension_numbers = #tpu.dot_dimension_numbers<[1], [0], [0], [1], [0, 0, 1, 1], [], []>} : vector<16x8xbf16>, vector<8x32xbf16>, vector<16x32xf32> -> vector<16x32xf32>
    %385 = arith.addf %354, %384 : vector<16x32xf32>
    %386 = arith.addf %225, %385 : vector<16x32xf32>
    %c1_156 = arith.constant 1 : index
    %c0_157 = arith.constant 0 : index
    %c0_158 = arith.constant 0 : index
    %387 = vector.load %arg8[%c1_156, %c0_157, %c0_158] : memref<2x1x32xf32, #tpu.memory_space<vmem>>, vector<1x1x32xf32>
    %388 = vector.shape_cast %387 : vector<1x1x32xf32> to vector<1x32xf32>
    %389 = vector.broadcast %388 : vector<1x32xf32> to vector<16x32xf32>
    %390 = arith.addf %386, %389 : vector<16x32xf32>
    %c1_159 = arith.constant 1 : index
    %c0_160 = arith.constant 0 : index
    %c0_161 = arith.constant 0 : index
    %391 = vector.load %arg9[%c1_159, %c0_160, %c0_161] : memref<2x1x32xf32, #tpu.memory_space<vmem>>, vector<1x1x32xf32>
    %392 = vector.shape_cast %391 : vector<1x1x32xf32> to vector<1x32xf32>
    %c1_162 = arith.constant 1 : index
    %c0_163 = arith.constant 0 : index
    %c0_164 = arith.constant 0 : index
    %393 = vector.load %arg10[%c1_162, %c0_163, %c0_164] : memref<2x1x32xf32, #tpu.memory_space<vmem>>, vector<1x1x32xf32>
    %394 = vector.shape_cast %393 : vector<1x1x32xf32> to vector<1x32xf32>
    %cst_165 = arith.constant dense<0.000000e+00> : vector<16xf32>
    %395 = vector.multi_reduction <add>, %390, %cst_165 [1] : vector<16x32xf32> to vector<16xf32>
    %396 = vector.shape_cast %395 : vector<16xf32> to vector<16x1xf32>
    %cst_166 = arith.constant 3.125000e-02 : f32
    %397 = vector.broadcast %cst_166 : f32 to vector<16x1xf32>
    %398 = arith.mulf %396, %397 : vector<16x1xf32>
    %399 = arith.mulf %390, %390 : vector<16x32xf32>
    %cst_167 = arith.constant dense<0.000000e+00> : vector<16xf32>
    %400 = vector.multi_reduction <add>, %399, %cst_167 [1] : vector<16x32xf32> to vector<16xf32>
    %401 = vector.shape_cast %400 : vector<16xf32> to vector<16x1xf32>
    %cst_168 = arith.constant 3.125000e-02 : f32
    %402 = vector.broadcast %cst_168 : f32 to vector<16x1xf32>
    %403 = arith.mulf %401, %402 : vector<16x1xf32>
    %404 = arith.mulf %398, %398 : vector<16x1xf32>
    %405 = arith.subf %403, %404 : vector<16x1xf32>
    %406 = vector.broadcast %398 : vector<16x1xf32> to vector<16x32xf32>
    %407 = arith.subf %390, %406 : vector<16x32xf32>
    %cst_169 = arith.constant 9.99999974E-6 : f32
    %408 = vector.broadcast %cst_169 : f32 to vector<16x1xf32>
    %409 = arith.addf %405, %408 : vector<16x1xf32>
    %410 = math.rsqrt %409 : vector<16x1xf32>
    %411 = vector.broadcast %410 : vector<16x1xf32> to vector<16x32xf32>
    %412 = arith.mulf %407, %411 : vector<16x32xf32>
    %413 = vector.broadcast %392 : vector<1x32xf32> to vector<16x32xf32>
    %414 = arith.mulf %412, %413 : vector<16x32xf32>
    %415 = vector.broadcast %394 : vector<1x32xf32> to vector<16x32xf32>
    %416 = arith.addf %414, %415 : vector<16x32xf32>
    %c1_170 = arith.constant 1 : index
    %c0_171 = arith.constant 0 : index
    %c0_172 = arith.constant 0 : index
    %417 = vector.load %arg11[%c1_170, %c0_171, %c0_172] : memref<2x32x128xbf16, #tpu.memory_space<vmem>>, vector<1x32x128xbf16>
    %418 = vector.shape_cast %417 : vector<1x32x128xbf16> to vector<32x128xbf16>
    %419 = arith.truncf %416 : vector<16x32xf32> to vector<16x32xbf16>
    %cst_173 = arith.constant dense<0.000000e+00> : vector<16x128xf32>
    %420 = tpu.matmul %419, %418, %cst_173 {dimension_numbers = #tpu.dot_dimension_numbers<[1], [0], [0], [1], [0, 0, 1, 1], [], []>} : vector<16x32xbf16>, vector<32x128xbf16>, vector<16x128xf32> -> vector<16x128xf32>
    %c1_174 = arith.constant 1 : index
    %c0_175 = arith.constant 0 : index
    %c0_176 = arith.constant 0 : index
    %421 = vector.load %arg12[%c1_174, %c0_175, %c0_176] : memref<2x1x128xf32, #tpu.memory_space<vmem>>, vector<1x1x128xf32>
    %422 = vector.shape_cast %421 : vector<1x1x128xf32> to vector<1x128xf32>
    %423 = vector.broadcast %422 : vector<1x128xf32> to vector<16x128xf32>
    %424 = arith.addf %420, %423 : vector<16x128xf32>
    %cst_177 = arith.constant 1.702000e+00 : f32
    %425 = vector.broadcast %cst_177 : f32 to vector<16x128xf32>
    %426 = arith.mulf %425, %424 : vector<16x128xf32>
    %427 = arith.negf %426 : vector<16x128xf32>
    %428 = math.exp %427 : vector<16x128xf32>
    %cst_178 = arith.constant 1.000000e+00 : f32
    %429 = vector.broadcast %cst_178 : f32 to vector<16x128xf32>
    %430 = arith.addf %429, %428 : vector<16x128xf32>
    %431 = arith.divf %429, %430 : vector<16x128xf32>
    %432 = arith.mulf %424, %431 : vector<16x128xf32>
    %c1_179 = arith.constant 1 : index
    %c0_180 = arith.constant 0 : index
    %c0_181 = arith.constant 0 : index
    %433 = vector.load %arg13[%c1_179, %c0_180, %c0_181] : memref<2x128x32xbf16, #tpu.memory_space<vmem>>, vector<1x128x32xbf16>
    %434 = vector.shape_cast %433 : vector<1x128x32xbf16> to vector<128x32xbf16>
    %435 = arith.truncf %432 : vector<16x128xf32> to vector<16x128xbf16>
    %cst_182 = arith.constant dense<0.000000e+00> : vector<16x32xf32>
    %436 = tpu.matmul %435, %434, %cst_182 {dimension_numbers = #tpu.dot_dimension_numbers<[1], [0], [0], [1], [0, 0, 1, 1], [], []>} : vector<16x128xbf16>, vector<128x32xbf16>, vector<16x32xf32> -> vector<16x32xf32>
    %437 = arith.addf %390, %436 : vector<16x32xf32>
    %c1_183 = arith.constant 1 : index
    %c0_184 = arith.constant 0 : index
    %c0_185 = arith.constant 0 : index
    %438 = vector.load %arg14[%c1_183, %c0_184, %c0_185] : memref<2x1x32xf32, #tpu.memory_space<vmem>>, vector<1x1x32xf32>
    %439 = vector.shape_cast %438 : vector<1x1x32xf32> to vector<1x32xf32>
    %440 = vector.broadcast %439 : vector<1x32xf32> to vector<16x32xf32>
    %441 = arith.addf %437, %440 : vector<16x32xf32>
    %c0_186 = arith.constant 0 : index
    %c0_187 = arith.constant 0 : index
    %442 = vector.load %arg15[%c0_186, %c0_187] : memref<1x32xf32, #tpu.memory_space<vmem>>, vector<1x32xf32>
    %c0_188 = arith.constant 0 : index
    %c0_189 = arith.constant 0 : index
    %443 = vector.load %arg16[%c0_188, %c0_189] : memref<1x32xf32, #tpu.memory_space<vmem>>, vector<1x32xf32>
    %cst_190 = arith.constant dense<0.000000e+00> : vector<16xf32>
    %444 = vector.multi_reduction <add>, %441, %cst_190 [1] : vector<16x32xf32> to vector<16xf32>
    %445 = vector.shape_cast %444 : vector<16xf32> to vector<16x1xf32>
    %cst_191 = arith.constant 3.125000e-02 : f32
    %446 = vector.broadcast %cst_191 : f32 to vector<16x1xf32>
    %447 = arith.mulf %445, %446 : vector<16x1xf32>
    %448 = arith.mulf %441, %441 : vector<16x32xf32>
    %cst_192 = arith.constant dense<0.000000e+00> : vector<16xf32>
    %449 = vector.multi_reduction <add>, %448, %cst_192 [1] : vector<16x32xf32> to vector<16xf32>
    %450 = vector.shape_cast %449 : vector<16xf32> to vector<16x1xf32>
    %cst_193 = arith.constant 3.125000e-02 : f32
    %451 = vector.broadcast %cst_193 : f32 to vector<16x1xf32>
    %452 = arith.mulf %450, %451 : vector<16x1xf32>
    %453 = arith.mulf %447, %447 : vector<16x1xf32>
    %454 = arith.subf %452, %453 : vector<16x1xf32>
    %455 = vector.broadcast %447 : vector<16x1xf32> to vector<16x32xf32>
    %456 = arith.subf %441, %455 : vector<16x32xf32>
    %cst_194 = arith.constant 9.99999974E-6 : f32
    %457 = vector.broadcast %cst_194 : f32 to vector<16x1xf32>
    %458 = arith.addf %454, %457 : vector<16x1xf32>
    %459 = math.rsqrt %458 : vector<16x1xf32>
    %460 = vector.broadcast %459 : vector<16x1xf32> to vector<16x32xf32>
    %461 = arith.mulf %456, %460 : vector<16x32xf32>
    %462 = vector.broadcast %442 : vector<1x32xf32> to vector<16x32xf32>
    %463 = arith.mulf %461, %462 : vector<16x32xf32>
    %464 = vector.broadcast %443 : vector<1x32xf32> to vector<16x32xf32>
    %465 = arith.addf %463, %464 : vector<16x32xf32>
    %c0_195 = arith.constant 0 : index
    %c0_196 = arith.constant 0 : index
    %466 = vector.load %arg19[%c0_195, %c0_196] : memref<16x32xf32, #tpu.memory_space<vmem>>, vector<16x32xf32>
    tpu.vector_store %arg19[%c0_195, %c0_196], %465 {strides = array<i32>} : memref<16x32xf32, #tpu.memory_space<vmem>>, vector<16x32xf32>,
    %c0_197 = arith.constant 0 : index
    %467 = memref.load %arg2[%c0_197] : memref<2xi32, #tpu.memory_space<smem>>
    %c0_i32 = arith.constant 0 : i32
    %468 = arith.addi %c0_i32, %467 : i32
    %469 = arith.index_cast %468 : i32 to index
    %c0_198 = arith.constant 0 : index
    %470 = vector.load %arg19[%469, %c0_198] : memref<16x32xf32, #tpu.memory_space<vmem>>, vector<1x32xf32>
    %c1_199 = arith.constant 1 : index
    %471 = memref.load %arg2[%c1_199] : memref<2xi32, #tpu.memory_space<smem>>
    %c8_i32 = arith.constant 8 : i32
    %472 = arith.addi %c8_i32, %471 : i32
    %473 = arith.index_cast %472 : i32 to index
    %c0_200 = arith.constant 0 : index
    %474 = vector.load %arg19[%473, %c0_200] : memref<16x32xf32, #tpu.memory_space<vmem>>, vector<1x32xf32>
    %475 = tpu.concatenate %470, %474 in 0 : vector<1x32xf32>, vector<1x32xf32> -> vector<2x32xf32>
    %c0_201 = arith.constant 0 : index
    %c0_202 = arith.constant 0 : index
    %476 = vector.load %arg17[%c0_201, %c0_202] : memref<32x16xbf16, #tpu.memory_space<vmem>>, vector<32x16xbf16>
    %477 = arith.truncf %475 : vector<2x32xf32> to vector<2x32xbf16>
    %cst_203 = arith.constant dense<0.000000e+00> : vector<2x16xf32>
    %478 = tpu.matmul %477, %476, %cst_203 {dimension_numbers = #tpu.dot_dimension_numbers<[1], [0], [0], [1], [0, 0, 1, 1], [], []>} : vector<2x32xbf16>, vector<32x16xbf16>, vector<2x16xf32> -> vector<2x16xf32>
    %c0_204 = arith.constant 0 : index
    %c0_205 = arith.constant 0 : index
    %479 = vector.load %arg18[%c0_204, %c0_205] : memref<2x16xf32, #tpu.memory_space<vmem>>, vector<2x16xf32>
    tpu.vector_store %arg18[%c0_204, %c0_205], %478 {strides = array<i32>} : memref<2x16xf32, #tpu.memory_space<vmem>>, vector<2x16xf32>,
    return
  }
}

</mosaic_0001>

<bundles_post_ra>
// kernel: tpu_custom_call.1
= control target key start
LH: loop header
LB: loop body
LE: loop exit
PB: predicated region body
PF: predicated region fallthrough
CT: control target
= control target key end

     0   :  { %s4753_s0 = inlined_call_operand.vmem [shape: f32[2,8,32], index: 0, kind: input, shape index: {}]   ;;  %s4754_s1 = inlined_call_operand.vmem [shape: f32[8,32], index: 1, kind: input, shape index: {}]   ;;  %s4755_s2 = inlined_call_operand.vmem [shape: s32[2], index: 2, kind: input, shape index: {}]   ;;  %s4756_s3 = inlined_call_operand.vmem [shape: f32[2,1,32], index: 3, kind: input, shape index: {}]   ;;  %s4757_s4 = inlined_call_operand.vmem [shape: f32[2,1,32], index: 4, kind: input, shape index: {}]   ;;  %s4758_s5 = inlined_call_operand.vmem [shape: bf16[2,32,96], index: 5, kind: input, shape index: {}]   ;;  %s4759_s6 = inlined_call_operand.vmem [shape: f32[2,1,96], index: 6, kind: input, shape index: {}]   ;;  %s4760_s7 = inlined_call_operand.vmem [shape: bf16[2,4,8,32], index: 7, kind: input, shape index: {}]   ;;  %s4761_s8 = inlined_call_operand.vmem [shape: f32[2,1,32], index: 8, kind: input, shape index: {}]   ;;  %s4762_s9 = inlined_call_operand.vmem [shape: f32[2,1,32], index: 9, kind: input, shape index: {}]   ;;  %s4763_s10 = inlined_call_operand.vmem [shape: f32[2,1,32], index: 10, kind: input, shape index: {}]   ;;  %s4764_s11 = inlined_call_operand.vmem [shape: bf16[2,32,128], index: 11, kind: input, shape index: {}]   ;;  %s4765_s12 = inlined_call_operand.vmem [shape: f32[2,1,128], index: 12, kind: input, shape index: {}]   ;;  %s4766_s13 = inlined_call_operand.vmem [shape: bf16[2,128,32], index: 13, kind: input, shape index: {}]   ;;  %s4767_s14 = inlined_call_operand.vmem [shape: f32[2,1,32], index: 14, kind: input, shape index: {}]   ;;  %s4768_s15 = inlined_call_operand.vmem [shape: f32[1,32], index: 15, kind: input, shape index: {}]   ;;  %s4769_s16 = inlined_call_operand.vmem [shape: f32[1,32], index: 16, kind: input, shape index: {}]   ;;  %s4770_s17 = inlined_call_operand.vmem [shape: bf16[32,16], index: 17, kind: input, shape index: {}]   ;;  %s4771_s18 = inlined_call_operand.hbm [shape: f32[2,16], index: 18, kind: output, shape index: {}]  }
   0x1   :  { %4779 = sst [smem:[#allocation9_spill]] %s4753_s0 }
   0x2   :  { %4780 = sst [smem:[#allocation10_spill]] %s4754_s1 }
   0x3   :  { %4781 = sst [smem:[#allocation11_spill]] %s4755_s2 }
   0x4   :  { %23 = vsyncpa [#allocation5], 0 }
   0x5   :  { %24 = vsyncpa [#allocation4], 0  ;;  %s4782_s29 = sld [smem:[#allocation11_spill]] }
   0xb   :  { %s35_s30 = sshll.u32 %s4782_s29, 4  ;;  %s36_s30 = int_to_ptr.vmem [resolvable:$true] %s35_s30 }
   0xc   :  { %s3901_s0 = scalar_lea.vmem %s36_s30, 16  ;;  %p3906_p1 = scmp.lt.s32.totalorder %s36_s30, %s36_s30 }
   0xd   :  { %p3902_p0 = scmp.ne.s32.totalorder %s36_s30, %s3901_s0  ;;  %p3907_p2 = scmp.lt.s32.totalorder %s3901_s0, %s3901_s0 }
   0xf   :  { %p3908_p3 = por %p3907_p2, %p3906_p1 }
  0x11   :  { %p3909_p4 = pnand %p3908_p3, %p3902_p0 }
  0x13   :  { %3912 = shalt.err (!%p3909_p4)
}
  0x14   :  { %s3939_s19 = smov [#allocation3]  }
  0x15   :  { %38 = dma.vmem_to_smem %s36_s30, 16, %s3939_s19, [#allocation5]  }
  0x16   :  { %3935 = dma.done.wait [#allocation5], 16  }
  0x17   :  { %3936 = vsyncadd [#allocation5], 4294967280 }
  0x18   :  { %72 = sfence }
  0x19   :  { %s4783_s21 = sld [smem:[#allocation9_spill]]  ;;  %s4784_s23 = sld [smem:[#allocation10_spill]]  ;;  %vm86_vm0 = vcmask 261120   ;;  %v3775_v11 = vld [vmem:[%s4758_s5] sm:$0xff]   ;;  %v3940_v12 = vmov 0.0   ;;  %vm3941_vm1 = vmmov 0   ;;  %v79_v54 = vlaneseq }
  0x1a   :  { %3440 = vmatprep.subr.bf16.mxu1 %v3940_v12  ;;  %3444 = vmatprep.mubr.msk.bf16.mxu1 %vm3941_vm1, %v3940_v12  ;;  %v3776_v13 = vld [vmem:[%s4758_s5 + $0x8] sm:$0xff]   ;;  %v3193_v31 = vld [vmem:[%s4756_s3] ss:$0 sm:$0xff]  ;;  %s3942_s22 = smov 96   ;;  %vm206_vm2 = vcmask 64512   ;;  %s3943_s2 = smov 64  }
  0x1b   :  { %3441 = vmatpush3.bf16.msra.mxu1 %v3775_v11  ;;  %3454 = vmatprep.subr.bf16.mxu0 %v3940_v12  ;;  %v3194_v36 = vld [vmem:[%s4757_s4] ss:$0 sm:$0xff]  ;;  %v80_v55 = vshrl.u32 %v79_v54, 7  ;;  %v82_v56 = vand.u32 127, %v79_v54  ;;  %vm337_vm4 = vcmask 1043456   ;;  %s3945_s24 = smov 120  }
  0x1c   :  { %3442 = vmatprep.subr.bf16.mxu1 %v3940_v12  ;;  %3456 = vmatprep.mubr.msk.bf16.mxu0 %vm3941_vm1, %v3940_v12  ;;  %v3195_v41 = vld [vmem:[%s4759_s6] ss:$0 sm:$0xff]  ;;  %s3946_s25 = smov 56   ;;  %s3947_s26 = smov 80   ;;  %vm3111_vm5 = vcmask 1040384   ;;  %vm3173_vm6 = vcmask 123904  }
  0x1d   :  { %vm4123_vm3 = vcmp.le.s32.totalorder %v82_v56, %v80_v55  ;;  %s3948_s27 = smov 112   ;;  %s3949_s19 = smov 48  }
  0x1e   :  { %s4777_s1 = smov 72   ;;  %s4775_s20 = smov 104  }
  0x1f   :  { %v74_v0 = vld [vmem:[%s4783_s21] sm:$0xff]  ;;  %v75_v2 = vld [vmem:[%s4783_s21 + $0x8] sm:$0xff]  ;;  %3443 = vmatpush3.bf16.msra.mxu1 %v3776_v13  ;;  %s4773_s29 = smov 40  }
  0x20   :  { %v76_v1 = vld [vmem:[%s4784_s23] sm:$0xff]  ;;  %3448 = vmatprep.subr.bf16.mxu1 %v3940_v12  ;;  %s3944_s23 = smov 88  }
  0x21   :  { %v4061_v3 = vadd.f32 %v76_v1, %v74_v0  ;;  %v4063_v4 = vadd.f32 %v76_v1, %v75_v2 }
  0x23   :  { %v87_v5 = vsel %vm86_vm0, %v4061_v3, 0.0  ;;  %v95_v6 = vmul.f32 %v4061_v3, %v4061_v3  ;;  %v90_v7 = vsel %vm86_vm0, %v4063_v4, 0.0  ;;  %v96_v8 = vmul.f32 %v4063_v4, %v4063_v4 }
  0x24   :  { %88 = vadd.xlane.f32.xlu0 %v87_v5 }
  0x25   :  { %v97_v9 = vsel %vm86_vm0, %v95_v6, 0.0  ;;  %v100_v10 = vsel %vm86_vm0, %v96_v8, 0.0 }
  0x26   :  { %98 = vadd.xlane.f32.xlu1 %v97_v9 }
  0x28   :  { %91 = vadd.xlane.f32.xlu0 %v90_v7 }
  0x2a   :  { %101 = vadd.xlane.f32.xlu1 %v100_v10 }
  0xb1   :  { %v89_v14 = vpop.xlane.xlu0 %88 }
  0xb2   :  { %v93_v15 = vmul.f32 0.03125, %v89_v14 }
  0xb3   :  { %v99_v16 = vpop.xlane.xlu1 %98 }
  0xb4   :  { %v105_v17 = vmul.f32 %v93_v15, %v93_v15  ;;  %v103_v18 = vmul.f32 0.03125, %v99_v16  ;;  %v109_v28 = vsub.f32 %v4061_v3, %v93_v15 }
  0xb5   :  { %v92_v19 = vpop.xlane.xlu0 %91 }
  0xb6   :  { %v107_v20 = vsub.f32 %v103_v18, %v105_v17  ;;  %v94_v21 = vmul.f32 0.03125, %v92_v19 }
  0xb7   :  { %v102_v22 = vpop.xlane.xlu1 %101 }
  0xb8   :  { %v111_v23 = vadd.f32 1e-05, %v107_v20  ;;  %v106_v24 = vmul.f32 %v94_v21, %v94_v21  ;;  %v104_v25 = vmul.f32 0.03125, %v102_v22  ;;  %v110_v32 = vsub.f32 %v4063_v4, %v94_v21 }
  0xba   :  { %3801 = vrsqrt.f32 %v111_v23  ;;  %v108_v26 = vsub.f32 %v104_v25, %v106_v24 }
  0xbc   :  { %v112_v27 = vadd.f32 1e-05, %v108_v26 }
  0xbe   :  { %3803 = vrsqrt.f32 %v112_v27 }
  0xc4   :  { %v3802_v29 = vpop.eup %3801 }
  0xc5   :  { %v115_v30 = vmul.f32 %v3802_v29, %v109_v28 }
  0xc7   :  { %v123_v35 = vmul.f32 %v3193_v31, %v115_v30 }
  0xc8   :  { %v3804_v33 = vpop.eup %3803 }
  0xc9   :  { %v116_v34 = vmul.f32 %v3804_v33, %v110_v32  ;;  %v131_v38 = vadd.f32 %v3194_v36, %v123_v35 }
  0xcb   :  { %v124_v37 = vmul.f32 %v3193_v31, %v116_v34 }
  0xcd   :  { %v132_v39 = vadd.f32 %v3194_v36, %v124_v37 }
  0xcf   :  { %v137_v40 = vpack.c.bf16 %v132_v39, %v131_v38 }
  0xd1   :  { %3445 = vmatmul.mubr.msk.bf16.vlgmr.msra.gmra.mrb[0].mxu1 %vm86_vm0, %v137_v40 }
  0xd2   :  { %3450 = vmatprep.mubr.msk.bf16.mxu1 %vm3941_vm1, %v3940_v12 }
 0x1a4   :  { %v194_v42 = vpop.f32.mrb[0].mxu1 }
 0x1a5   :  { %v195_v43 = vadd.f32 %v3195_v41, %v194_v42  ;;  %v3446_v44 = vpop.f32.mrb[1].mxu1 }
 0x1a6   :  { %v197_v45 = vpop.f32.mrb[2].mxu1 }
 0x1a7   :  { %v4103_v46 = vpack.c.bf16 %v195_v43, %v195_v43  ;;  %v198_v47 = vadd.f32 %v3195_v41, %v197_v45  ;;  %v3447_v48 = vpop.f32.mrb[3].mxu1 }
 0x1a9   :  { %v4105_v49 = vpack.c.bf16 %v198_v47, %v198_v47  ;;  %204 = vrot.lane.b32.xlu0 %v4103_v46, %s3942_s22 }
 0x1ab   :  { %254 = vrot.lane.b32.xlu1 %v4105_v49, %s3942_s22 }
 0x21b   :  { %v205_v50 = vpop.permute.xlu0 %204 }
 0x21c   :  { %v211_v51 = vsel %vm206_vm2, %v205_v50, 0 }
 0x21d   :  { %3449 = vmatpush3.bf16.xpose.msra.mxu1 %v211_v51  ;;  %v255_v52 = vpop.permute.xlu1 %254 }
 0x21e   :  { %v260_v53 = vsel %vm206_vm2, %v255_v52, 0  ;;  %3460 = vmatprep.subr.bf16.mxu1 %v3940_v12 }
 0x21f   :  { %3455 = vmatpush3.bf16.xpose.msra.mxu0 %v260_v53 }
 0x220   :  { %3466 = vmatprep.subr.bf16.mxu0 %v3940_v12 }
 0x224   :  { %3451 = vmatmul.mubr.msk.bf16.vlgmr.msra.gmra.mrb[4].mxu1 %vm206_vm2, %v4103_v46 }
 0x225   :  { %3462 = vmatprep.mubr.msk.bf16.mxu1 %vm3941_vm1, %v3940_v12 }
 0x226   :  { %3457 = vmatmul.mubr.msk.bf16.vlgmr.msra.gmra.mrb[0].mxu0 %vm206_vm2, %v4105_v49 }
 0x227   :  { %3468 = vmatprep.mubr.msk.bf16.mxu0 %vm3941_vm1, %v3940_v12 }
 0x2f7   :  { %v247_v57 = vpop.f32.mrb[4].mxu1 }
 0x2f8   :  { %v302_v59 = vmul.f32 0.35355338, %v247_v57  ;;  %v3452_v60 = vpop.f32.mrb[5].mxu1 }
 0x2f9   :  { %v250_v61 = vpop.f32.mrb[6].mxu1  ;;  %v296_v62 = vpop.f32.mrb[0].mxu0 }
 0x2fa   :  { %v303_v63 = vmul.f32 0.35355338, %v296_v62  ;;  %v3453_v0 = vpop.f32.mrb[7].mxu1  ;;  %v3458_v1 = vpop.f32.mrb[1].mxu0  ;;  %v306_v2 = vsel %vm4123_vm3, %v302_v59, -1e+30 }
 0x2fb   :  { %v299_v5 = vpop.f32.mrb[2].mxu0  ;;  %v308_v6 = vsel %vm206_vm2, %v306_v2, -inf }
 0x2fc   :  { %v3459_v7 = vpop.f32.mrb[3].mxu0  ;;  %309 = vmax.xlane.f32.xlu1 %v308_v6  ;;  %v307_v8 = vsel %vm4123_vm3, %v303_v63, -1e+30 }
 0x2fd   :  { %v311_v9 = vsel %vm206_vm2, %v307_v8, -inf }
 0x2fe   :  { %312 = vmax.xlane.f32.xlu0 %v311_v9 }
 0x30d   :  { %381 = vrot.lane.b32.xlu1 %v4105_v49, %s3943_s2 }
 0x311   :  { %433 = vrot.lane.b32.xlu1 %v4103_v46, %s3944_s23 }
 0x389   :  { %v310_v10 = vpop.xlane.xlu1 %309 }
 0x38a   :  { %v314_v11 = vsub.f32 %v306_v2, %v310_v10 }
 0x38b   :  { %v313_v13 = vpop.xlane.xlu0 %312 }
 0x38c   :  { %v316_v14 = vmul.f32 1.442695, %v314_v11  ;;  %v315_v15 = vsub.f32 %v307_v8, %v313_v13 }
 0x38d   :  { %v382_v16 = vpop.permute.xlu1 %381 }
 0x38e   :  { %3805 = vpow2.f32 %v316_v14  ;;  %v318_v17 = vmul.f32 1.442695, %v315_v15  ;;  %v387_v18 = vsel %vm337_vm4, %v382_v16, 0 }
 0x38f   :  { %3467 = vmatpush3.bf16.msra.mxu0 %v387_v18 }
 0x390   :  { %3807 = vpow2.f32 %v318_v17  ;;  %3478 = vmatprep.subr.bf16.mxu0 %v3940_v12 }
 0x391   :  { %v434_v23 = vpop.permute.xlu1 %433 }
 0x392   :  { %v439_v34 = vsel %vm206_vm2, %v434_v23, 0 }
 0x398   :  { %v3806_v19 = vpop.eup %3805 }
 0x399   :  { %v320_v20 = vsel %vm206_vm2, %v3806_v19, 0.0 }
 0x39a   :  { %v3808_v21 = vpop.eup %3807  ;;  %321 = vadd.xlane.f32.xlu0 %v320_v20 }
 0x39b   :  { %v323_v22 = vsel %vm206_vm2, %v3808_v21, 0.0 }
 0x39c   :  { %324 = vadd.xlane.f32.xlu1 %v323_v22 }
 0x3ad   :  { %483 = vrot.lane.b32.xlu1 %v4105_v49, %s3944_s23 }
 0x3b0   :  { %332 = vrot.lane.b32.xlu0 %v4103_v46, %s3943_s2 }
 0x3b1   :  { %481 = vrot.lane.b32.xlu1 %v4105_v49, %s3945_s24 }
 0x3b4   :  { %431 = vrot.lane.b32.xlu0 %v4103_v46, %s3945_s24 }
 0x427   :  { %v322_v24 = vpop.xlane.xlu0 %321 }
 0x428   :  { %3809 = vrcp.f32 %v322_v24 }
 0x429   :  { %v325_v25 = vpop.xlane.xlu1 %324 }
 0x42a   :  { %3811 = vrcp.f32 %v325_v25 }
 0x42b   :  { %v333_v26 = vpop.permute.xlu0 %332 }
 0x42c   :  { %v339_v27 = vsel %vm337_vm4, %v333_v26, 0  ;;  %v429_v26 = vld [vmem:[%s4760_s7] sm:$0xf] }
 0x42d   :  { %3461 = vmatpush3.bf16.msra.mxu1 %v339_v27  ;;  %v484_v33 = vpop.permute.xlu1 %483 }
 0x42e   :  { %3472 = vmatprep.subr.bf16.mxu1 %v3940_v12  ;;  %v489_v36 = vsel %vm206_vm2, %v484_v33, 0 }
 0x42f   :  { %v432_v37 = vpop.permute.xlu0 %431 }
 0x431   :  { %v482_v38 = vpop.permute.xlu1 %481 }
 0x432   :  { %v3810_v28 = vpop.eup %3809 }
 0x433   :  { %v328_v29 = vmul.f32 %v3810_v28, %v3806_v19 }
 0x434   :  { %v3812_v30 = vpop.eup %3811 }
 0x435   :  { %v329_v31 = vmul.f32 %v3812_v30, %v3808_v21  ;;  %v330_v32 = vpack.c.bf16 %v328_v29, %v328_v29  ;;  %v3207_v21 = vld [vmem:[%s4760_s7 + $0x4] sm:$0xf]  ;;  %v709_v29 = vsel %vm337_vm4, %v429_v26, 0 }
 0x436   :  { %v662_v24 = vsel %vm337_vm4, %v3207_v21, 0 }
 0x437   :  { %3463 = vmatmul.mubr.msk.bf16.vlgmr.msra.gmra.mrb[8].mxu1 %vm206_vm2, %v330_v32  ;;  %v331_v35 = vpack.c.bf16 %v329_v31, %v329_v31 }
 0x438   :  { %3473 = vmatpush3.bf16.xpose.msra.mxu1 %v439_v34  ;;  %3474 = vmatprep.mubr.msk.bf16.mxu1 %vm3941_vm1, %v3940_v12 }
 0x439   :  { %3469 = vmatmul.mubr.msk.bf16.vlgmr.msra.gmra.mrb[4].mxu0 %vm206_vm2, %v331_v35  ;;  %3484 = vmatprep.subr.bf16.mxu1 %v3940_v12 }
 0x43a   :  { %3479 = vmatpush3.bf16.xpose.msra.mxu0 %v489_v36  ;;  %3480 = vmatprep.mubr.msk.bf16.mxu0 %vm3941_vm1, %v3940_v12 }
 0x43b   :  { %3490 = vmatprep.subr.bf16.mxu0 %v3940_v12 }
 0x43f   :  { %3475 = vmatmul.mubr.msk.bf16.vlgmr.msra.gmra.mrb[12].mxu1 %vm206_vm2, %v432_v37 }
 0x440   :  { %3486 = vmatprep.mubr.msk.bf16.mxu1 %vm3941_vm1, %v3940_v12 }
 0x441   :  { %3481 = vmatmul.mubr.msk.bf16.vlgmr.msra.gmra.mrb[8].mxu0 %vm206_vm2, %v482_v38 }
 0x442   :  { %3492 = vmatprep.mubr.msk.bf16.mxu0 %vm3941_vm1, %v3940_v12 }
 0x50a   :  { %v4167_v39 = vpop.f32.mrb[8].mxu1 }
 0x50b   :  { %v3464_v40 = vpop.f32.mrb[9].mxu1 }
 0x50c   :  { %v378_v41 = vpop.f32.mrb[10].mxu1  ;;  %v4169_v42 = vpop.f32.mrb[4].mxu0 }
 0x50d   :  { %v430_v43 = vpack.c.bf16 %v4169_v42, %v4167_v39  ;;  %v3465_v44 = vpop.f32.mrb[11].mxu1  ;;  %v3470_v45 = vpop.f32.mrb[5].mxu0 }
 0x50e   :  { %v426_v47 = vpop.f32.mrb[6].mxu0 }
 0x50f   :  { %v3471_v48 = vpop.f32.mrb[7].mxu0 }
 0x512   :  { %v475_v50 = vpop.f32.mrb[12].mxu1 }
 0x513   :  { %v531_v51 = vmul.f32 0.35355338, %v475_v50  ;;  %v3476_v52 = vpop.f32.mrb[13].mxu1 }
 0x514   :  { %v478_v53 = vpop.f32.mrb[14].mxu1  ;;  %v525_v54 = vpop.f32.mrb[8].mxu0 }
 0x515   :  { %v532_v55 = vmul.f32 0.35355338, %v525_v54  ;;  %v3477_v56 = vpop.f32.mrb[15].mxu1  ;;  %v3482_v57 = vpop.f32.mrb[9].mxu0  ;;  %v533_v59 = vsel %vm4123_vm3, %v531_v51, -1e+30 }
 0x516   :  { %v528_v60 = vpop.f32.mrb[10].mxu0  ;;  %v535_v61 = vsel %vm206_vm2, %v533_v59, -inf }
 0x517   :  { %v3483_v62 = vpop.f32.mrb[11].mxu0  ;;  %536 = vmax.xlane.f32.xlu0 %v535_v61  ;;  %v534_v63 = vsel %vm4123_vm3, %v532_v55, -1e+30 }
 0x518   :  { %v538_v0 = vsel %vm206_vm2, %v534_v63, -inf }
 0x519   :  { %539 = vmax.xlane.f32.xlu1 %v538_v0 }
 0x52a   :  { %607 = vrot.lane.b32.xlu1 %v4105_v49, %s3946_s25 }
 0x52e   :  { %754 = vrot.lane.b32.xlu1 %v4103_v46, %s3947_s26 }
 0x532   :  { %804 = vrot.lane.b32.xlu1 %v4105_v49, %s3947_s26 }
 0x536   :  { %802 = vrot.lane.b32.xlu1 %v4105_v49, %s3948_s27 }
 0x5a4   :  { %v537_v1 = vpop.xlane.xlu0 %536 }
 0x5a5   :  { %v541_v2 = vsub.f32 %v533_v59, %v537_v1 }
 0x5a6   :  { %v540_v5 = vpop.xlane.xlu1 %539 }
 0x5a7   :  { %v543_v6 = vmul.f32 1.442695, %v541_v2  ;;  %v542_v7 = vsub.f32 %v534_v63, %v540_v5 }
 0x5a9   :  { %3813 = vpow2.f32 %v543_v6  ;;  %v545_v8 = vmul.f32 1.442695, %v542_v7 }
 0x5aa   :  { %v608_v9 = vpop.permute.xlu1 %607 }
 0x5ab   :  { %3815 = vpow2.f32 %v545_v8  ;;  %v613_v10 = vsel %vm337_vm4, %v608_v9, 0 }
 0x5ac   :  { %3491 = vmatpush3.bf16.msra.mxu0 %v613_v10 }
 0x5ad   :  { %3502 = vmatprep.subr.bf16.mxu0 %v3940_v12 }
 0x5ae   :  { %v755_v30 = vpop.permute.xlu1 %754 }
 0x5af   :  { %v760_v42 = vsel %vm206_vm2, %v755_v30, 0 }
 0x5b2   :  { %v805_v31 = vpop.permute.xlu1 %804 }
 0x5b3   :  { %v3814_v11 = vpop.eup %3813  ;;  %v810_v32 = vsel %vm206_vm2, %v805_v31, 0 }
 0x5b4   :  { %v547_v13 = vsel %vm206_vm2, %v3814_v11, 0.0 }
 0x5b5   :  { %v3816_v14 = vpop.eup %3815  ;;  %548 = vadd.xlane.f32.xlu0 %v547_v13 }
 0x5b6   :  { %v550_v15 = vsel %vm206_vm2, %v3816_v14, 0.0  ;;  %v803_v33 = vpop.permute.xlu1 %802 }
 0x5b9   :  { %551 = vadd.xlane.f32.xlu0 %v550_v15 }
 0x5cf   :  { %559 = vrot.lane.b32.xlu0 %v4103_v46, %s3946_s25 }
 0x5d3   :  { %752 = vrot.lane.b32.xlu0 %v4103_v46, %s3948_s27 }
 0x642   :  { %v549_v16 = vpop.xlane.xlu0 %548 }
 0x643   :  { %3817 = vrcp.f32 %v549_v16 }
 0x646   :  { %v552_v17 = vpop.xlane.xlu0 %551 }
 0x647   :  { %3819 = vrcp.f32 %v552_v17 }
 0x64a   :  { %v560_v18 = vpop.permute.xlu0 %559 }
 0x64b   :  { %v565_v19 = vsel %vm337_vm4, %v560_v18, 0 }
 0x64c   :  { %3485 = vmatpush3.bf16.msra.mxu1 %v565_v19 }
 0x64d   :  { %v3818_v20 = vpop.eup %3817  ;;  %3496 = vmatprep.subr.bf16.mxu1 %v3940_v12 }
 0x64e   :  { %v555_v22 = vmul.f32 %v3818_v20, %v3814_v11  ;;  %v753_v47 = vpop.permute.xlu0 %752 }
 0x650   :  { %v557_v23 = vpack.c.bf16 %v555_v22, %v555_v22 }
 0x651   :  { %v3820_v25 = vpop.eup %3819 }
 0x652   :  { %v556_v27 = vmul.f32 %v3820_v25, %v3816_v14  ;;  %3487 = vmatmul.mubr.msk.bf16.vlgmr.msra.gmra.mrb[16].mxu1 %vm206_vm2, %v557_v23 }
 0x653   :  { %3497 = vmatpush3.bf16.msra.mxu1 %v662_v24  ;;  %3498 = vmatprep.mubr.msk.bf16.mxu1 %vm3941_vm1, %v3940_v12 }
 0x654   :  { %v558_v28 = vpack.c.bf16 %v556_v27, %v556_v27  ;;  %3508 = vmatprep.subr.bf16.mxu1 %v3940_v12 }
 0x656   :  { %3493 = vmatmul.mubr.msk.bf16.vlgmr.msra.gmra.mrb[12].mxu0 %vm206_vm2, %v558_v28 }
 0x657   :  { %3503 = vmatpush3.bf16.msra.mxu0 %v709_v29  ;;  %3504 = vmatprep.mubr.msk.bf16.mxu0 %vm3941_vm1, %v3940_v12 }
 0x658   :  { %3514 = vmatprep.subr.bf16.mxu0 %v3940_v12 }
 0x65e   :  { %3505 = vmatmul.mubr.msk.bf16.vlgmr.msra.gmra.mrb[16].mxu0 %vm206_vm2, %v430_v43 }
 0x65f   :  { %3516 = vmatprep.mubr.msk.bf16.mxu0 %vm3941_vm1, %v3940_v12 }
 0x660   :  { %3515 = vmatpush3.bf16.xpose.msra.mxu0 %v810_v32 }
 0x661   :  { %3526 = vmatprep.subr.bf16.mxu0 %v3940_v12 }
 0x667   :  { %3517 = vmatmul.mubr.msk.bf16.vlgmr.msra.gmra.mrb[20].mxu0 %vm206_vm2, %v803_v33 }
 0x668   :  { %3528 = vmatprep.mubr.msk.bf16.mxu0 %vm3941_vm1, %v3940_v12 }
 0x725   :  { %v601_v34 = vpop.f32.mrb[16].mxu1 }
 0x726   :  { %v3488_v35 = vpop.f32.mrb[17].mxu1 }
 0x727   :  { %v604_v36 = vpop.f32.mrb[18].mxu1 }
 0x728   :  { %v3489_v37 = vpop.f32.mrb[19].mxu1 }
 0x729   :  { %v649_v38 = vpop.f32.mrb[12].mxu0 }
 0x72a   :  { %v657_v39 = vpack.c.bf16 %v649_v38, %v601_v34  ;;  %v3494_v40 = vpop.f32.mrb[13].mxu0 }
 0x72b   :  { %v652_v41 = vpop.f32.mrb[14].mxu0  ;;  %v3214_v40 = vld [vmem:[%s4760_s7 + $0x8] sm:$0xf] }
 0x72c   :  { %v3495_v43 = vpop.f32.mrb[15].mxu0  ;;  %3499 = vmatmul.mubr.msk.bf16.vlgmr.msra.gmra.mrb[20].mxu1 %vm206_vm2, %v657_v39  ;;  %v983_v41 = vsel %vm337_vm4, %v3214_v40, 0 }
 0x72d   :  { %3509 = vmatpush3.bf16.xpose.msra.mxu1 %v760_v42  ;;  %3510 = vmatprep.mubr.msk.bf16.mxu1 %vm3941_vm1, %v3940_v12 }
 0x72e   :  { %3520 = vmatprep.subr.bf16.mxu1 %v3940_v12 }
 0x731   :  { %v745_v44 = vpop.f32.mrb[16].mxu0 }
 0x732   :  { %v3506_v45 = vpop.f32.mrb[17].mxu0 }
 0x733   :  { %v748_v48 = vpop.f32.mrb[18].mxu0 }
 0x734   :  { %v3507_v50 = vpop.f32.mrb[19].mxu0  ;;  %3511 = vmatmul.mubr.msk.bf16.vlgmr.msra.gmra.mrb[24].mxu1 %vm206_vm2, %v753_v47 }
 0x735   :  { %3522 = vmatprep.mubr.msk.bf16.mxu1 %vm3941_vm1, %v3940_v12 }
 0x73a   :  { %v846_v51 = vpop.f32.mrb[20].mxu0 }
 0x73b   :  { %v853_v52 = vmul.f32 0.35355338, %v846_v51  ;;  %v3518_v53 = vpop.f32.mrb[21].mxu0 }
 0x73c   :  { %v849_v54 = vpop.f32.mrb[22].mxu0 }
 0x73d   :  { %v3519_v55 = vpop.f32.mrb[23].mxu0  ;;  %v855_v56 = vsel %vm4123_vm3, %v853_v52, -1e+30 }
 0x73e   :  { %v859_v57 = vsel %vm206_vm2, %v855_v56, -inf }
 0x73f   :  { %860 = vmax.xlane.f32.xlu1 %v859_v57 }
 0x750   :  { %928 = vrot.lane.b32.xlu1 %v4105_v49, %s3949_s19 }
 0x754   :  { %1030 = vrot.lane.b32.xlu1 %v4103_v46, %s4777_s1 }
 0x758   :  { %1080 = vrot.lane.b32.xlu1 %v4105_v49, %s4777_s1  ;;  %s3101_s1 = sld [smem:[#allocation3]] }
 0x75c   :  { %1078 = vrot.lane.b32.xlu1 %v4105_v49, %s4775_s20 }
 0x7cc   :  { %v861_v59 = vpop.xlane.xlu1 %860 }
 0x7cd   :  { %v863_v62 = vsub.f32 %v855_v56, %v861_v59 }
 0x7cf   :  { %v866_v63 = vmul.f32 1.442695, %v863_v62 }
 0x7d0   :  { %v929_v60 = vpop.permute.xlu1 %928 }
 0x7d1   :  { %v934_v61 = vsel %vm337_vm4, %v929_v60, 0  ;;  %3821 = vpow2.f32 %v866_v63 }
 0x7d2   :  { %3527 = vmatpush3.bf16.msra.mxu0 %v934_v61 }
 0x7d3   :  { %3538 = vmatprep.subr.bf16.mxu0 %v3940_v12 }
 0x7d4   :  { %v1031_v26 = vpop.permute.xlu1 %1030 }
 0x7d5   :  { %v1036_v28 = vsel %vm206_vm2, %v1031_v26, 0 }
 0x7d8   :  { %v1081_v51 = vpop.permute.xlu1 %1080 }
 0x7d9   :  { %v1086_v56 = vsel %vm206_vm2, %v1081_v51, 0 }
 0x7db   :  { %v3822_v16 = vpop.eup %3821 }
 0x7dc   :  { %v871_v17 = vsel %vm206_vm2, %v3822_v16, 0.0  ;;  %v1079_v59 = vpop.permute.xlu1 %1078 }
 0x7ff   :  { %v698_v0 = vpop.f32.mrb[20].mxu1 }
 0x800   :  { %v4245_v1 = vadd.f32 %v745_v44, %v698_v0  ;;  %v3500_v2 = vpop.f32.mrb[21].mxu1 }
 0x801   :  { %v701_v5 = vpop.f32.mrb[22].mxu1 }
 0x802   :  { %v4247_v6 = vadd.f32 %v748_v48, %v701_v5  ;;  %v3501_v7 = vpop.f32.mrb[23].mxu1 }
 0x807   :  { %v796_v8 = vpop.f32.mrb[24].mxu1 }
 0x808   :  { %v852_v9 = vmul.f32 0.35355338, %v796_v8  ;;  %v3512_v10 = vpop.f32.mrb[25].mxu1 }
 0x809   :  { %v799_v11 = vpop.f32.mrb[26].mxu1 }
 0x80a   :  { %v3513_v13 = vpop.f32.mrb[27].mxu1  ;;  %v854_v14 = vsel %vm4123_vm3, %v852_v9, -1e+30 }
 0x80b   :  { %v856_v15 = vsel %vm206_vm2, %v854_v14, -inf }
 0x80c   :  { %857 = vmax.xlane.f32.xlu0 %v856_v15 }
 0x810   :  { %872 = vadd.xlane.f32.xlu0 %v871_v17 }
 0x899   :  { %v858_v18 = vpop.xlane.xlu0 %857 }
 0x89a   :  { %v862_v19 = vsub.f32 %v854_v14, %v858_v18 }
 0x89c   :  { %v864_v20 = vmul.f32 1.442695, %v862_v19 }
 0x89d   :  { %v873_v21 = vpop.xlane.xlu0 %872 }
 0x89e   :  { %3823 = vpow2.f32 %v864_v20 }
 0x89f   :  { %3825 = vrcp.f32 %v873_v21 }
 0x8a8   :  { %v3824_v22 = vpop.eup %3823 }
 0x8a9   :  { %v3826_v23 = vpop.eup %3825  ;;  %v868_v24 = vsel %vm206_vm2, %v3824_v22, 0.0 }
 0x8aa   :  { %v877_v25 = vmul.f32 %v3826_v23, %v3822_v16  ;;  %869 = vadd.xlane.f32.xlu0 %v868_v24 }
 0x8ac   :  { %v879_v27 = vpack.c.bf16 %v877_v25, %v877_v25 }
 0x8ae   :  { %3529 = vmatmul.mubr.msk.bf16.vlgmr.msra.gmra.mrb[24].mxu0 %vm206_vm2, %v879_v27 }
 0x8af   :  { %3539 = vmatpush3.bf16.xpose.msra.mxu0 %v1036_v28  ;;  %3540 = vmatprep.mubr.msk.bf16.mxu0 %vm3941_vm1, %v3940_v12 }
 0x8b0   :  { %3550 = vmatprep.subr.bf16.mxu0 %v3940_v12 }
 0x8c0   :  { %880 = vrot.lane.b32.xlu0 %v4103_v46, %s3949_s19 }
 0x8c4   :  { %1028 = vrot.lane.b32.xlu0 %v4103_v46, %s4775_s20 }
 0x937   :  { %v870_v29 = vpop.xlane.xlu0 %869 }
 0x938   :  { %3827 = vrcp.f32 %v870_v29 }
 0x93b   :  { %v881_v30 = vpop.permute.xlu0 %880 }
 0x93c   :  { %v886_v31 = vsel %vm337_vm4, %v881_v30, 0 }
 0x93d   :  { %3521 = vmatpush3.bf16.msra.mxu1 %v886_v31 }
 0x93e   :  { %3532 = vmatprep.subr.bf16.mxu1 %v3940_v12 }
 0x93f   :  { %v1029_v32 = vpop.permute.xlu0 %1028 }
 0x940   :  { %3541 = vmatmul.mubr.msk.bf16.vlgmr.msra.gmra.mrb[28].mxu0 %vm206_vm2, %v1029_v32  ;;  %v3220_v32 = vld [vmem:[%s4760_s7 + $0xc] sm:$0xf] }
 0x941   :  { %3552 = vmatprep.mubr.msk.bf16.mxu0 %vm3941_vm1, %v3940_v12 }
 0x942   :  { %v3828_v33 = vpop.eup %3827 }
 0x943   :  { %v876_v34 = vmul.f32 %v3828_v33, %v3824_v22  ;;  %v1259_v33 = vsel %vm337_vm4, %v3220_v32, 0  ;;  %v3784_v32 = vld [vmem:[%s4766_s13 + $0x28] sm:$0xff]  }
 0x945   :  { %v878_v35 = vpack.c.bf16 %v876_v34, %v876_v34 }
 0x947   :  { %3523 = vmatmul.mubr.msk.bf16.vlgmr.msra.gmra.mrb[28].mxu1 %vm206_vm2, %v878_v35 }
 0x948   :  { %3534 = vmatprep.mubr.msk.bf16.mxu1 %vm3941_vm1, %v3940_v12  ;;  %3533 = vmatpush3.bf16.msra.mxu1 %v983_v41 }
 0x949   :  { %3544 = vmatprep.subr.bf16.mxu1 %v3940_v12 }
 0x981   :  { %v970_v36 = vpop.f32.mrb[24].mxu0 }
 0x982   :  { %v3530_v37 = vpop.f32.mrb[25].mxu0 }
 0x983   :  { %v973_v38 = vpop.f32.mrb[26].mxu0 }
 0x984   :  { %v3531_v39 = vpop.f32.mrb[27].mxu0 }
 0xa13   :  { %v1072_v42 = vpop.f32.mrb[28].mxu0 }
 0xa14   :  { %v1128_v43 = vmul.f32 0.35355338, %v1072_v42  ;;  %v3542_v44 = vpop.f32.mrb[29].mxu0 }
 0xa15   :  { %v1075_v45 = vpop.f32.mrb[30].mxu0 }
 0xa16   :  { %v3543_v47 = vpop.f32.mrb[31].mxu0  ;;  %v1130_v48 = vsel %vm4123_vm3, %v1128_v43, -1e+30 }
 0xa17   :  { %v1132_v50 = vsel %vm206_vm2, %v1130_v48, -inf  ;;  %v3222_v47 = vld [vmem:[%s4761_s8] ss:$0 sm:$0xff] }
 0xa18   :  { %1133 = vmax.xlane.f32.xlu0 %v1132_v50 }
 0xa1a   :  { %v922_v52 = vpop.f32.mrb[28].mxu1 }
 0xa1b   :  { %v978_v53 = vpack.c.bf16 %v970_v36, %v922_v52  ;;  %v3524_v54 = vpop.f32.mrb[29].mxu1 }
 0xa1c   :  { %v925_v55 = vpop.f32.mrb[30].mxu1 }
 0xa1d   :  { %v3525_v57 = vpop.f32.mrb[31].mxu1  ;;  %3535 = vmatmul.mubr.msk.bf16.vlgmr.msra.gmra.mrb[32].mxu1 %vm206_vm2, %v978_v53 }
 0xa1e   :  { %3545 = vmatpush3.bf16.xpose.msra.mxu1 %v1086_v56  ;;  %3546 = vmatprep.mubr.msk.bf16.mxu1 %vm3941_vm1, %v3940_v12 }
 0xa1f   :  { %3556 = vmatprep.subr.bf16.mxu1 %v3940_v12 }
 0xa25   :  { %3547 = vmatmul.mubr.msk.bf16.vlgmr.msra.gmra.mrb[36].mxu1 %vm206_vm2, %v1079_v59 }
 0xa26   :  { %3558 = vmatprep.mubr.msk.bf16.mxu1 %vm3941_vm1, %v3940_v12 }
 0xaa5   :  { %v1134_v60 = vpop.xlane.xlu0 %1133 }
 0xaa6   :  { %v1138_v61 = vsub.f32 %v1130_v48, %v1134_v60 }
 0xaa8   :  { %v1140_v62 = vmul.f32 1.442695, %v1138_v61  ;;  %v3777_v61 = vld [vmem:[%s4764_s11] sm:$0xff]  }
 0xaaa   :  { %3829 = vpow2.f32 %v1140_v62  ;;  %v3778_v62 = vld [vmem:[%s4764_s11 + $0x8] sm:$0xff]  }
 0xab4   :  { %v3830_v63 = vpop.eup %3829 }
 0xab5   :  { %v1144_v0 = vsel %vm206_vm2, %v3830_v63, 0.0 }
 0xab6   :  { %1145 = vadd.xlane.f32.xlu0 %v1144_v0 }
 0xaf0   :  { %v1019_v2 = vpop.f32.mrb[32].mxu1 }
 0xaf1   :  { %v1026_v5 = vadd.f32 %v1019_v2, %v4245_v1  ;;  %v3536_v7 = vpop.f32.mrb[33].mxu1 }
 0xaf2   :  { %v1022_v8 = vpop.f32.mrb[34].mxu1 }
 0xaf3   :  { %v4290_v9 = vadd.f32 %v1022_v8, %v4247_v6  ;;  %v3537_v10 = vpop.f32.mrb[35].mxu1 }
 0xaf8   :  { %v1122_v11 = vpop.f32.mrb[36].mxu1 }
 0xaf9   :  { %v1129_v13 = vmul.f32 0.35355338, %v1122_v11  ;;  %v3548_v14 = vpop.f32.mrb[37].mxu1 }
 0xafa   :  { %v1125_v15 = vpop.f32.mrb[38].mxu1 }
 0xafb   :  { %v3549_v16 = vpop.f32.mrb[39].mxu1  ;;  %v1131_v17 = vsel %vm4123_vm3, %v1129_v13, -1e+30 }
 0xafc   :  { %v1135_v18 = vsel %vm206_vm2, %v1131_v17, -inf }
 0xafd   :  { %1136 = vmax.xlane.f32.xlu1 %v1135_v18 }
 0xb0e   :  { %1204 = vrot.lane.b32.xlu1 %v4105_v49, %s4773_s29 }
 0xb43   :  { %v1146_v24 = vpop.xlane.xlu0 %1145 }
 0xb8a   :  { %v1137_v1 = vpop.xlane.xlu1 %1136 }
 0xb8b   :  { %v1139_v19 = vsub.f32 %v1131_v17, %v1137_v1 }
 0xb8d   :  { %v1142_v6 = vmul.f32 1.442695, %v1139_v19  ;;  %v3223_v19 = vld [vmem:[%s4762_s9] ss:$0 sm:$0xff] }
 0xb8e   :  { %v1205_v20 = vpop.permute.xlu1 %1204 }
 0xb8f   :  { %3831 = vpow2.f32 %v1142_v6  ;;  %v1210_v21 = vsel %vm337_vm4, %v1205_v20, 0 }
 0xb90   :  { %3557 = vmatpush3.bf16.msra.mxu1 %v1210_v21  ;;  %3833 = vrcp.f32 %v1146_v24  ;;  %v3224_v24 = vld [vmem:[%s4763_s10] ss:$0 sm:$0xff] }
 0xb91   :  { %3568 = vmatprep.subr.bf16.mxu1 %v3940_v12 }
 0xb99   :  { %v3832_v22 = vpop.eup %3831 }
 0xb9a   :  { %v1147_v23 = vsel %vm206_vm2, %v3832_v22, 0.0  ;;  %v3834_v49 = vpop.eup %3833 }
 0xb9b   :  { %1148 = vadd.xlane.f32.xlu0 %v1147_v23  ;;  %v1152_v26 = vmul.f32 %v3834_v49, %v3830_v63 }
 0xb9d   :  { %v1154_v29 = vpack.c.bf16 %v1152_v26, %v1152_v26 }
 0xbb1   :  { %1156 = vrot.lane.b32.xlu0 %v4103_v46, %s4773_s29 }
 0xc28   :  { %v1149_v25 = vpop.xlane.xlu0 %1148 }
 0xc29   :  { %3835 = vrcp.f32 %v1149_v25 }
 0xc2c   :  { %v1157_v27 = vpop.permute.xlu0 %1156 }
 0xc2d   :  { %v1162_v28 = vsel %vm337_vm4, %v1157_v27, 0 }
 0xc2e   :  { %3551 = vmatpush3.bf16.msra.mxu0 %v1162_v28  ;;  %v3779_v28 = vld [vmem:[%s4766_s13] sm:$0xff]  }
 0xc2f   :  { %3562 = vmatprep.subr.bf16.mxu0 %v3940_v12 }
 0xc31   :  { %3553 = vmatmul.mubr.msk.bf16.vlgmr.msra.gmra.mrb[32].mxu0 %vm206_vm2, %v1154_v29  ;;  %v3780_v29 = vld [vmem:[%s4766_s13 + $0x8] sm:$0xff]  }
 0xc32   :  { %3564 = vmatprep.mubr.msk.bf16.mxu0 %vm3941_vm1, %v3940_v12  ;;  %3563 = vmatpush3.bf16.msra.mxu0 %v1259_v33  ;;  %v3785_v33 = vld [vmem:[%s4766_s13 + $0x30] sm:$0xff]  }
 0xc33   :  { %v3836_v30 = vpop.eup %3835  ;;  %3576 = vmatprep.subr.bf16.mxu0 %v3940_v12 }
 0xc34   :  { %v1153_v46 = vmul.f32 %v3836_v30, %v3832_v22  ;;  %v3781_v30 = vld [vmem:[%s4766_s13 + $0x10] sm:$0xff]  }
 0xc36   :  { %v1155_v31 = vpack.c.bf16 %v1153_v46, %v1153_v46  ;;  %v3782_v46 = vld [vmem:[%s4766_s13 + $0x18] sm:$0xff]  }
 0xc38   :  { %3559 = vmatmul.mubr.msk.bf16.vlgmr.msra.gmra.mrb[40].mxu1 %vm206_vm2, %v1155_v31  ;;  %v3783_v31 = vld [vmem:[%s4766_s13 + $0x20] sm:$0xff]  }
 0xc39   :  { %3572 = vmatprep.mubr.msk.bf16.mxu1 %vm3941_vm1, %v3940_v12  ;;  %3569 = vmatpush3.bf16.msra.mxu1 %v3777_v61 }
 0xc3a   :  { %3570 = vmatprep.subr.bf16.mxu1 %v3940_v12 }
 0xc3d   :  { %3571 = vmatpush3.bf16.msra.mxu1 %v3778_v62 }
 0xc3e   :  { %3596 = vmatprep.subr.bf16.mxu1 %v3940_v12 }
 0xd04   :  { %v1198_v34 = vpop.f32.mrb[32].mxu0 }
 0xd05   :  { %v3554_v35 = vpop.f32.mrb[33].mxu0 }
 0xd06   :  { %v1201_v36 = vpop.f32.mrb[34].mxu0  ;;  %v3225_v35 = vld [vmem:[%s4765_s12] ss:$0 sm:$0xff] }
 0xd07   :  { %v3555_v37 = vpop.f32.mrb[35].mxu0 }
 0xd0b   :  { %v1246_v38 = vpop.f32.mrb[40].mxu1 }
 0xd0c   :  { %v1254_v39 = vpack.c.bf16 %v1246_v38, %v1198_v34  ;;  %v3560_v40 = vpop.f32.mrb[41].mxu1  ;;  %v3786_v34 = vld [vmem:[%s4766_s13 + $0x38] sm:$0xff]  }
 0xd0d   :  { %v1249_v41 = vpop.f32.mrb[42].mxu1 }
 0xd0e   :  { %v3561_v42 = vpop.f32.mrb[43].mxu1  ;;  %3565 = vmatmul.mubr.msk.bf16.vlgmr.msra.gmra.mrb[36].mxu0 %vm206_vm2, %v1254_v39 }
 0xd0f   :  { %3592 = vmatprep.mubr.msk.bf16.mxu0 %vm3941_vm1, %v3940_v12  ;;  %3577 = vmatpush3.bf16.msra.mxu0 %v3779_v28 }
 0xd10   :  { %3578 = vmatprep.subr.bf16.mxu0 %v3940_v12 }
 0xd13   :  { %3579 = vmatpush3.bf16.msra.mxu0 %v3780_v29 }
 0xd14   :  { %3580 = vmatprep.subr.bf16.mxu0 %v3940_v12 }
 0xd17   :  { %3581 = vmatpush3.bf16.msra.mxu0 %v3781_v30 }
 0xd18   :  { %3582 = vmatprep.subr.bf16.mxu0 %v3940_v12 }
 0xd1b   :  { %3583 = vmatpush3.bf16.msra.mxu0 %v3782_v46 }
 0xd1c   :  { %3584 = vmatprep.subr.bf16.mxu0 %v3940_v12 }
 0xd1f   :  { %3585 = vmatpush3.bf16.msra.mxu0 %v3783_v31 }
 0xd20   :  { %3586 = vmatprep.subr.bf16.mxu0 %v3940_v12 }
 0xd23   :  { %3587 = vmatpush3.bf16.msra.mxu0 %v3784_v32  ;;  %v3243_v32 = vld [vmem:[%s4757_s4 + $0x1] ss:$0 sm:$0xff] }
 0xd24   :  { %3588 = vmatprep.subr.bf16.mxu0 %v3940_v12 }
 0xd27   :  { %3589 = vmatpush3.bf16.msra.mxu0 %v3785_v33 }
 0xd28   :  { %3590 = vmatprep.subr.bf16.mxu0 %v3940_v12 }
 0xd2b   :  { %3591 = vmatpush3.bf16.msra.mxu0 %v3786_v34 }
 0xd2c   :  { %3622 = vmatprep.subr.bf16.mxu0 %v3940_v12 }
 0xde1   :  { %v1295_v43 = vpop.f32.mrb[36].mxu0 }
 0xde2   :  { %v1302_v44 = vadd.f32 %v1295_v43, %v1026_v5  ;;  %v3566_v45 = vpop.f32.mrb[37].mxu0 }
 0xde3   :  { %v1298_v48 = vpop.f32.mrb[38].mxu0 }
 0xde4   :  { %v1304_v50 = vadd.f32 %v1302_v44, %v4061_v3  ;;  %v1303_v51 = vadd.f32 %v1298_v48, %v4290_v9  ;;  %v3567_v52 = vpop.f32.mrb[39].mxu0 }
 0xde6   :  { %v4323_v53 = vadd.f32 %v3222_v47, %v1304_v50  ;;  %v1305_v54 = vadd.f32 %v1303_v51, %v4063_v4 }
 0xde8   :  { %v4326_v55 = vadd.f32 %v3222_v47, %v1305_v54  ;;  %v1317_v56 = vsel %vm86_vm0, %v4323_v53, 0.0  ;;  %v1325_v3 = vmul.f32 %v4323_v53, %v4323_v53 }
 0xde9   :  { %1318 = vadd.xlane.f32.xlu1 %v1317_v56 }
 0xdea   :  { %v1320_v57 = vsel %vm86_vm0, %v4326_v55, 0.0  ;;  %v1326_v59 = vmul.f32 %v4326_v55, %v4326_v55  ;;  %v1327_v4 = vsel %vm86_vm0, %v1325_v3, 0.0 }
 0xdeb   :  { %1321 = vadd.xlane.f32.xlu0 %v1320_v57 }
 0xdec   :  { %v1330_v60 = vsel %vm86_vm0, %v1326_v59, 0.0 }
 0xded   :  { %1331 = vadd.xlane.f32.xlu1 %v1330_v60  ;;  %v3239_v60 = vld [vmem:[%s4767_s14] ss:$0 sm:$0xff] }
 0xdef   :  { %1328 = vadd.xlane.f32.xlu0 %v1327_v4 }
 0xe76   :  { %v1319_v63 = vpop.xlane.xlu1 %1318 }
 0xe77   :  { %v1323_v2 = vmul.f32 0.03125, %v1319_v63 }
 0xe78   :  { %v1322_v0 = vpop.xlane.xlu0 %1321 }
 0xe79   :  { %v1324_v5 = vmul.f32 0.03125, %v1322_v0  ;;  %v1335_v11 = vmul.f32 %v1323_v2, %v1323_v2  ;;  %v1339_v6 = vsub.f32 %v4323_v53, %v1323_v2 }
 0xe7a   :  { %v1332_v7 = vpop.xlane.xlu1 %1331 }
 0xe7b   :  { %v1336_v8 = vmul.f32 %v1324_v5, %v1324_v5  ;;  %v1334_v9 = vmul.f32 0.03125, %v1332_v7  ;;  %v1340_v18 = vsub.f32 %v4326_v55, %v1324_v5 }
 0xe7c   :  { %v1329_v10 = vpop.xlane.xlu0 %1328 }
 0xe7d   :  { %v1338_v13 = vsub.f32 %v1334_v9, %v1336_v8  ;;  %v1333_v14 = vmul.f32 0.03125, %v1329_v10 }
 0xe7f   :  { %v1342_v15 = vadd.f32 1e-05, %v1338_v13  ;;  %v1337_v16 = vsub.f32 %v1333_v14, %v1335_v11  ;;  %v3787_v11 = vld [vmem:[%s4758_s5 + $0x10] sm:$0xff]   ;;  %v3788_v13 = vld [vmem:[%s4758_s5 + $0x18] sm:$0xff]  }
 0xe81   :  { %3837 = vrsqrt.f32 %v1342_v15  ;;  %v1341_v17 = vadd.f32 1e-05, %v1337_v16 }
 0xe83   :  { %3839 = vrsqrt.f32 %v1341_v17 }
 0xe8b   :  { %v3838_v1 = vpop.eup %3837 }
 0xe8c   :  { %v1346_v20 = vmul.f32 %v3838_v1, %v1340_v18 }
 0xe8d   :  { %v3840_v21 = vpop.eup %3839 }
 0xe8e   :  { %v1345_v22 = vmul.f32 %v3840_v21, %v1339_v6  ;;  %v1354_v23 = vmul.f32 %v3223_v19, %v1346_v20 }
 0xe90   :  { %v1353_v49 = vmul.f32 %v3223_v19, %v1345_v22  ;;  %v1362_v26 = vadd.f32 %v3224_v24, %v1354_v23 }
 0xe92   :  { %v1361_v25 = vadd.f32 %v3224_v24, %v1353_v49 }
 0xe94   :  { %v1367_v27 = vpack.c.bf16 %v1362_v26, %v1361_v25 }
 0xe96   :  { %3573 = vmatmul.mubr.msk.bf16.vlgmr.msra.gmra.mrb[44].mxu1 %vm86_vm0, %v1367_v27  ;;  %v3242_v27 = vld [vmem:[%s4756_s3 + $0x1] ss:$0 sm:$0xff] }
 0xe97   :  { %3600 = vmatprep.mubr.msk.bf16.mxu1 %vm3941_vm1, %v3940_v12  ;;  %3597 = vmatpush3.bf16.msra.mxu1 %v3787_v11 }
 0xe98   :  { %3598 = vmatprep.subr.bf16.mxu1 %v3940_v12 }
 0xe9b   :  { %3599 = vmatpush3.bf16.msra.mxu1 %v3788_v13 }
 0xe9c   :  { %3604 = vmatprep.subr.bf16.mxu1 %v3940_v12 }
 0xf69   :  { %v1424_v36 = vpop.f32.mrb[44].mxu1 }
 0xf6a   :  { %v1425_v37 = vadd.f32 %v3225_v35, %v1424_v36  ;;  %v3574_v38 = vpop.f32.mrb[45].mxu1 }
 0xf6b   :  { %v1427_v39 = vpop.f32.mrb[46].mxu1 }
 0xf6c   :  { %v3229_v40 = vmul.f32 -1.702, %v1425_v37  ;;  %v1428_v41 = vadd.f32 %v3225_v35, %v1427_v39  ;;  %v3575_v42 = vpop.f32.mrb[47].mxu1 }
 0xf6e   :  { %v1435_v43 = vmul.f32 1.442695, %v3229_v40  ;;  %v3230_v44 = vmul.f32 -1.702, %v1428_v41 }
 0xf70   :  { %3841 = vpow2.f32 %v1435_v43  ;;  %v1437_v45 = vmul.f32 1.442695, %v3230_v44 }
 0xf72   :  { %3843 = vpow2.f32 %v1437_v45 }
 0xf7a   :  { %v3842_v47 = vpop.eup %3841 }
 0xf7b   :  { %v1439_v48 = vadd.f32 1.0, %v3842_v47 }
 0xf7c   :  { %v3844_v50 = vpop.eup %3843 }
 0xf7d   :  { %3845 = vrcp.f32 %v1439_v48  ;;  %v1440_v51 = vadd.f32 1.0, %v3844_v50 }
 0xf7f   :  { %3847 = vrcp.f32 %v1440_v51 }
 0xf87   :  { %v3846_v52 = vpop.eup %3845 }
 0xf88   :  { %v1445_v56 = vmul.f32 %v3846_v52, %v1425_v37  ;;  %v3249_v37 = vld [vmem:[%s4759_s6 + $0x1] ss:$0 sm:$0xff] }
 0xf89   :  { %v3848_v54 = vpop.eup %3847 }
 0xf8a   :  { %v1446_v57 = vmul.f32 %v3848_v54, %v1428_v41 }
 0xf8c   :  { %v1463_v59 = vpack.c.bf16 %v1446_v57, %v1445_v56 }
 0xf8e   :  { %3593 = vmatmul.mubr.bf16.vlgmr.msra.gmra.mrb[40].mxu0 %v1463_v59 }
 0xf8f   :  { %3624 = vmatprep.mubr.msk.bf16.mxu0 %vm3941_vm1, %v3940_v12 }
0x1061   :  { %v1546_v3 = vpop.f32.mrb[40].mxu0 }
0x1062   :  { %v1553_v4 = vadd.f32 %v1546_v3, %v4323_v53  ;;  %v3594_v61 = vpop.f32.mrb[41].mxu0 }
0x1063   :  { %v1549_v62 = vpop.f32.mrb[42].mxu0 }
0x1064   :  { %v4398_v63 = vadd.f32 %v3239_v60, %v1553_v4  ;;  %v1554_v0 = vadd.f32 %v1549_v62, %v4326_v55  ;;  %v3595_v2 = vpop.f32.mrb[43].mxu0 }
0x1066   :  { %v4401_v5 = vadd.f32 %v3239_v60, %v1554_v0  ;;  %v1568_v7 = vsel %vm86_vm0, %v4398_v63, 0.0  ;;  %v1576_v8 = vmul.f32 %v4398_v63, %v4398_v63 }
0x1067   :  { %1569 = vadd.xlane.f32.xlu0 %v1568_v7 }
0x1068   :  { %v1571_v9 = vsel %vm86_vm0, %v4401_v5, 0.0  ;;  %v1577_v53 = vmul.f32 %v4401_v5, %v4401_v5  ;;  %v1578_v10 = vsel %vm86_vm0, %v1576_v8, 0.0 }
0x1069   :  { %1572 = vadd.xlane.f32.xlu1 %v1571_v9 }
0x106a   :  { %v1581_v55 = vsel %vm86_vm0, %v1577_v53, 0.0 }
0x106b   :  { %1579 = vadd.xlane.f32.xlu0 %v1578_v10 }
0x106d   :  { %1582 = vadd.xlane.f32.xlu1 %v1581_v55 }
0x10f4   :  { %v1570_v14 = vpop.xlane.xlu0 %1569 }
0x10f5   :  { %v1574_v15 = vmul.f32 0.03125, %v1570_v14 }
0x10f6   :  { %v1573_v16 = vpop.xlane.xlu1 %1572 }
0x10f7   :  { %v1575_v17 = vmul.f32 0.03125, %v1573_v16  ;;  %v1586_v1 = vmul.f32 %v1574_v15, %v1574_v15  ;;  %v1590_v25 = vsub.f32 %v4398_v63, %v1574_v15 }
0x10f8   :  { %v1580_v18 = vpop.xlane.xlu0 %1579 }
0x10f9   :  { %v1584_v19 = vmul.f32 0.03125, %v1580_v18  ;;  %v1587_v20 = vmul.f32 %v1575_v17, %v1575_v17  ;;  %v1591_v28 = vsub.f32 %v4401_v5, %v1575_v17 }
0x10fa   :  { %v1583_v6 = vpop.xlane.xlu1 %1582 }
0x10fb   :  { %v1588_v21 = vsub.f32 %v1584_v19, %v1586_v1  ;;  %v1585_v22 = vmul.f32 0.03125, %v1583_v6 }
0x10fd   :  { %v1592_v23 = vadd.f32 1e-05, %v1588_v21  ;;  %v1589_v24 = vsub.f32 %v1585_v22, %v1587_v20 }
0x10ff   :  { %3849 = vrsqrt.f32 %v1592_v23  ;;  %v1593_v49 = vadd.f32 1e-05, %v1589_v24 }
0x1101   :  { %3851 = vrsqrt.f32 %v1593_v49 }
0x1109   :  { %v3850_v26 = vpop.eup %3849 }
0x110a   :  { %v1596_v29 = vmul.f32 %v3850_v26, %v1590_v25 }
0x110b   :  { %v3852_v30 = vpop.eup %3851 }
0x110c   :  { %v1597_v46 = vmul.f32 %v3852_v30, %v1591_v28  ;;  %v1604_v31 = vmul.f32 %v3242_v27, %v1596_v29 }
0x110e   :  { %v1605_v33 = vmul.f32 %v3242_v27, %v1597_v46  ;;  %v1612_v34 = vadd.f32 %v3243_v32, %v1604_v31 }
0x1110   :  { %v1613_v35 = vadd.f32 %v3243_v32, %v1605_v33 }
0x1112   :  { %v1619_v36 = vpack.c.bf16 %v1613_v35, %v1612_v34 }
0x1114   :  { %3601 = vmatmul.mubr.msk.bf16.vlgmr.msra.gmra.mrb[48].mxu1 %vm86_vm0, %v1619_v36 }
0x1115   :  { %3606 = vmatprep.mubr.msk.bf16.mxu1 %vm3941_vm1, %v3940_v12 }
0x11e7   :  { %v1677_v38 = vpop.f32.mrb[48].mxu1 }
0x11e8   :  { %v1678_v39 = vadd.f32 %v3249_v37, %v1677_v38  ;;  %v3602_v40 = vpop.f32.mrb[49].mxu1 }
0x11e9   :  { %v1680_v41 = vpop.f32.mrb[50].mxu1 }
0x11ea   :  { %v4435_v42 = vpack.c.bf16 %v1678_v39, %v1678_v39  ;;  %v1681_v43 = vadd.f32 %v3249_v37, %v1680_v41  ;;  %v3603_v44 = vpop.f32.mrb[51].mxu1 }
0x11ec   :  { %v4437_v45 = vpack.c.bf16 %v1681_v43, %v1681_v43  ;;  %1687 = vrot.lane.b32.xlu0 %v4435_v42, %s3942_s22 }
0x11ee   :  { %1736 = vrot.lane.b32.xlu1 %v4437_v45, %s3942_s22 }
0x125e   :  { %v1688_v47 = vpop.permute.xlu0 %1687 }
0x125f   :  { %v1693_v48 = vsel %vm206_vm2, %v1688_v47, 0 }
0x1260   :  { %3605 = vmatpush3.bf16.xpose.msra.mxu1 %v1693_v48  ;;  %v1737_v50 = vpop.permute.xlu1 %1736 }
0x1261   :  { %3610 = vmatprep.subr.bf16.mxu1 %v3940_v12  ;;  %v1742_v51 = vsel %vm206_vm2, %v1737_v50, 0 }
0x1267   :  { %3607 = vmatmul.mubr.msk.bf16.vlgmr.msra.gmra.mrb[52].mxu1 %vm206_vm2, %v4435_v42 }
0x1268   :  { %3611 = vmatpush3.bf16.xpose.msra.mxu1 %v1742_v51  ;;  %3612 = vmatprep.mubr.msk.bf16.mxu1 %vm3941_vm1, %v3940_v12 }
0x1269   :  { %3616 = vmatprep.subr.bf16.mxu1 %v3940_v12 }
0x126f   :  { %3613 = vmatmul.mubr.msk.bf16.vlgmr.msra.gmra.mrb[56].mxu1 %vm206_vm2, %v4437_v45 }
0x1270   :  { %3618 = vmatprep.mubr.msk.bf16.mxu1 %vm3941_vm1, %v3940_v12 }
0x133a   :  { %v1729_v52 = vpop.f32.mrb[52].mxu1 }
0x133b   :  { %v1784_v54 = vmul.f32 0.35355338, %v1729_v52  ;;  %v3608_v56 = vpop.f32.mrb[53].mxu1 }
0x133c   :  { %v1732_v57 = vpop.f32.mrb[54].mxu1 }
0x133d   :  { %v3609_v59 = vpop.f32.mrb[55].mxu1  ;;  %v1786_v3 = vsel %vm4123_vm3, %v1784_v54, -1e+30 }
0x133e   :  { %v1788_v60 = vsel %vm206_vm2, %v1786_v3, -inf }
0x133f   :  { %1789 = vmax.xlane.f32.xlu1 %v1788_v60 }
0x1342   :  { %v1778_v4 = vpop.f32.mrb[56].mxu1 }
0x1343   :  { %v1785_v61 = vmul.f32 0.35355338, %v1778_v4  ;;  %v3614_v62 = vpop.f32.mrb[57].mxu1 }
0x1344   :  { %v1781_v0 = vpop.f32.mrb[58].mxu1 }
0x1345   :  { %v3615_v2 = vpop.f32.mrb[59].mxu1  ;;  %v1787_v7 = vsel %vm4123_vm3, %v1785_v61, -1e+30 }
0x1346   :  { %v1791_v8 = vsel %vm206_vm2, %v1787_v7, -inf }
0x1347   :  { %1792 = vmax.xlane.f32.xlu0 %v1791_v8 }
0x1350   :  { %1860 = vrot.lane.b32.xlu1 %v4437_v45, %s3943_s2 }
0x1354   :  { %1913 = vrot.lane.b32.xlu1 %v4435_v42, %s3944_s23 }
0x13cc   :  { %v1790_v9 = vpop.xlane.xlu1 %1789 }
0x13cd   :  { %v1794_v53 = vsub.f32 %v1786_v3, %v1790_v9 }
0x13cf   :  { %v1796_v10 = vmul.f32 1.442695, %v1794_v53 }
0x13d0   :  { %v1861_v55 = vpop.permute.xlu1 %1860 }
0x13d1   :  { %3853 = vpow2.f32 %v1796_v10  ;;  %v1866_v11 = vsel %vm337_vm4, %v1861_v55, 0 }
0x13d2   :  { %3623 = vmatpush3.bf16.msra.mxu0 %v1866_v11 }
0x13d3   :  { %3634 = vmatprep.subr.bf16.mxu0 %v3940_v12 }
0x13d4   :  { %v1793_v13 = vpop.xlane.xlu0 %1792  ;;  %v1914_v6 = vpop.permute.xlu1 %1913 }
0x13d5   :  { %v1795_v14 = vsub.f32 %v1787_v7, %v1793_v13  ;;  %v1919_v25 = vsel %vm206_vm2, %v1914_v6, 0  ;;  %v3257_v6 = vld [vmem:[%s4760_s7 + $0x10] sm:$0xf] }
0x13d7   :  { %v1798_v15 = vmul.f32 1.442695, %v1795_v14 }
0x13d9   :  { %3855 = vpow2.f32 %v1798_v15 }
0x13db   :  { %v3854_v16 = vpop.eup %3853 }
0x13dc   :  { %v1800_v17 = vsel %vm206_vm2, %v3854_v16, 0.0 }
0x13dd   :  { %1801 = vadd.xlane.f32.xlu0 %v1800_v17 }
0x13e3   :  { %v3856_v18 = vpop.eup %3855 }
0x13e4   :  { %v1803_v1 = vsel %vm206_vm2, %v3856_v18, 0.0 }
0x13e5   :  { %1804 = vadd.xlane.f32.xlu1 %v1803_v1 }
0x13f3   :  { %1812 = vrot.lane.b32.xlu0 %v4435_v42, %s3943_s2 }
0x13f6   :  { %1963 = vrot.lane.b32.xlu1 %v4437_v45, %s3944_s23  ;;  %s4787_s23 = smov 72  }
0x13f7   :  { %1911 = vrot.lane.b32.xlu0 %v4435_v42, %s3945_s24 }
0x13fa   :  { %1961 = vrot.lane.b32.xlu1 %v4437_v45, %s3945_s24  ;;  %s4788_s24 = smov 104  }
0x146a   :  { %v1802_v19 = vpop.xlane.xlu0 %1801 }
0x146b   :  { %3857 = vrcp.f32 %v1802_v19 }
0x146e   :  { %v1813_v20 = vpop.permute.xlu0 %1812 }
0x146f   :  { %v1818_v21 = vsel %vm337_vm4, %v1813_v20, 0 }
0x1470   :  { %3617 = vmatpush3.bf16.msra.mxu1 %v1818_v21 }
0x1471   :  { %3628 = vmatprep.subr.bf16.mxu1 %v3940_v12 }
0x1472   :  { %v1805_v22 = vpop.xlane.xlu1 %1804  ;;  %v1912_v30 = vpop.permute.xlu0 %1911 }
0x1473   :  { %3859 = vrcp.f32 %v1805_v22  ;;  %v2189_v22 = vsel %vm337_vm4, %v3257_v6, 0 }
0x1475   :  { %v3858_v23 = vpop.eup %3857 }
0x1476   :  { %v1808_v24 = vmul.f32 %v3858_v23, %v3854_v16  ;;  %v1964_v28 = vpop.permute.xlu1 %1963 }
0x1477   :  { %v1969_v46 = vsel %vm206_vm2, %v1964_v28, 0 }
0x1478   :  { %v1810_v49 = vpack.c.bf16 %v1808_v24, %v1808_v24 }
0x147a   :  { %3619 = vmatmul.mubr.msk.bf16.vlgmr.msra.gmra.mrb[60].mxu1 %vm206_vm2, %v1810_v49  ;;  %v1962_v31 = vpop.permute.xlu1 %1961 }
0x147b   :  { %3629 = vmatpush3.bf16.xpose.msra.mxu1 %v1919_v25  ;;  %3630 = vmatprep.mubr.msk.bf16.mxu1 %vm3941_vm1, %v3940_v12 }
0x147c   :  { %3640 = vmatprep.subr.bf16.mxu1 %v3940_v12 }
0x147d   :  { %v3860_v26 = vpop.eup %3859 }
0x147e   :  { %v1809_v27 = vmul.f32 %v3860_v26, %v3856_v18  ;;  %v3262_v26 = vld [vmem:[%s4760_s7 + $0x14] sm:$0xf] }
0x1480   :  { %v1811_v29 = vpack.c.bf16 %v1809_v27, %v1809_v27  ;;  %v2142_v27 = vsel %vm337_vm4, %v3262_v26, 0 }
0x1482   :  { %3625 = vmatmul.mubr.msk.bf16.vlgmr.msra.gmra.mrb[44].mxu0 %vm206_vm2, %v1811_v29  ;;  %3631 = vmatmul.mubr.msk.bf16.vlgmr.msra.gmra.mrb[64].mxu1 %vm206_vm2, %v1912_v30 }
0x1483   :  { %3635 = vmatpush3.bf16.xpose.msra.mxu0 %v1969_v46  ;;  %3636 = vmatprep.mubr.msk.bf16.mxu0 %vm3941_vm1, %v3940_v12 }
0x1484   :  { %3646 = vmatprep.subr.bf16.mxu0 %v3940_v12  ;;  %3642 = vmatprep.mubr.msk.bf16.mxu1 %vm3941_vm1, %v3940_v12 }
0x148a   :  { %3637 = vmatmul.mubr.msk.bf16.vlgmr.msra.gmra.mrb[48].mxu0 %vm206_vm2, %v1962_v31 }
0x148b   :  { %3648 = vmatprep.mubr.msk.bf16.mxu0 %vm3941_vm1, %v3940_v12 }
0x154d   :  { %v4495_v32 = vpop.f32.mrb[60].mxu1 }
0x154e   :  { %v3620_v33 = vpop.f32.mrb[61].mxu1 }
0x154f   :  { %v1857_v34 = vpop.f32.mrb[62].mxu1 }
0x1550   :  { %v3621_v35 = vpop.f32.mrb[63].mxu1 }
0x1555   :  { %v4497_v36 = vpop.f32.mrb[44].mxu0  ;;  %v1955_v37 = vpop.f32.mrb[64].mxu1 }
0x1556   :  { %v1910_v38 = vpack.c.bf16 %v4497_v36, %v4495_v32  ;;  %v2011_v39 = vmul.f32 0.35355338, %v1955_v37  ;;  %v3626_v40 = vpop.f32.mrb[45].mxu0  ;;  %v3632_v41 = vpop.f32.mrb[65].mxu1 }
0x1557   :  { %v1905_v43 = vpop.f32.mrb[46].mxu0  ;;  %v1958_v44 = vpop.f32.mrb[66].mxu1 }
0x1558   :  { %v3627_v47 = vpop.f32.mrb[47].mxu0  ;;  %v3633_v48 = vpop.f32.mrb[67].mxu1  ;;  %v2013_v50 = vsel %vm4123_vm3, %v2011_v39, -1e+30 }
0x1559   :  { %v2015_v51 = vsel %vm206_vm2, %v2013_v50, -inf }
0x155a   :  { %2016 = vmax.xlane.f32.xlu0 %v2015_v51 }
0x155d   :  { %v2005_v52 = vpop.f32.mrb[48].mxu0 }
0x155e   :  { %v2012_v54 = vmul.f32 0.35355338, %v2005_v52  ;;  %v3638_v56 = vpop.f32.mrb[49].mxu0 }
0x155f   :  { %v2008_v57 = vpop.f32.mrb[50].mxu0 }
0x1560   :  { %v3639_v59 = vpop.f32.mrb[51].mxu0  ;;  %v2014_v3 = vsel %vm4123_vm3, %v2012_v54, -1e+30 }
0x1561   :  { %v2018_v60 = vsel %vm206_vm2, %v2014_v3, -inf }
0x1562   :  { %2019 = vmax.xlane.f32.xlu1 %v2018_v60 }
0x1573   :  { %2087 = vrot.lane.b32.xlu1 %v4437_v45, %s3946_s25 }
0x1577   :  { %2234 = vrot.lane.b32.xlu1 %v4435_v42, %s3947_s26 }
0x157b   :  { %2284 = vrot.lane.b32.xlu1 %v4437_v45, %s3947_s26 }
0x157f   :  { %2282 = vrot.lane.b32.xlu1 %v4437_v45, %s3948_s27 }
0x15e7   :  { %v2017_v4 = vpop.xlane.xlu0 %2016 }
0x15e8   :  { %v2021_v61 = vsub.f32 %v2013_v50, %v2017_v4 }
0x15ea   :  { %v2023_v62 = vmul.f32 1.442695, %v2021_v61 }
0x15ec   :  { %3861 = vpow2.f32 %v2023_v62 }
0x15ef   :  { %v2020_v0 = vpop.xlane.xlu1 %2019 }
0x15f0   :  { %v2022_v2 = vsub.f32 %v2014_v3, %v2020_v0 }
0x15f2   :  { %v2025_v7 = vmul.f32 1.442695, %v2022_v2 }
0x15f3   :  { %v2088_v8 = vpop.permute.xlu1 %2087 }
0x15f4   :  { %3863 = vpow2.f32 %v2025_v7  ;;  %v2093_v9 = vsel %vm337_vm4, %v2088_v8, 0 }
0x15f5   :  { %3647 = vmatpush3.bf16.msra.mxu0 %v2093_v9 }
0x15f6   :  { %v3862_v53 = vpop.eup %3861  ;;  %3658 = vmatprep.subr.bf16.mxu0 %v3940_v12 }
0x15f7   :  { %v2027_v10 = vsel %vm206_vm2, %v3862_v53, 0.0  ;;  %v2235_v23 = vpop.permute.xlu1 %2234 }
0x15f8   :  { %2028 = vadd.xlane.f32.xlu0 %v2027_v10  ;;  %v2240_v35 = vsel %vm206_vm2, %v2235_v23, 0 }
0x15fb   :  { %v2285_v24 = vpop.permute.xlu1 %2284 }
0x15fc   :  { %v2290_v49 = vsel %vm206_vm2, %v2285_v24, 0 }
0x15fe   :  { %v3864_v55 = vpop.eup %3863 }
0x15ff   :  { %v2030_v11 = vsel %vm206_vm2, %v3864_v55, 0.0  ;;  %v2283_v25 = vpop.permute.xlu1 %2282 }
0x1600   :  { %2031 = vadd.xlane.f32.xlu0 %v2030_v11 }
0x1616   :  { %2039 = vrot.lane.b32.xlu0 %v4435_v42, %s3946_s25 }
0x161a   :  { %2232 = vrot.lane.b32.xlu0 %v4435_v42, %s3948_s27  ;;  %s4789_s27 = smov 40  }
0x1685   :  { %v2029_v13 = vpop.xlane.xlu0 %2028 }
0x1686   :  { %3865 = vrcp.f32 %v2029_v13 }
0x168d   :  { %v2032_v14 = vpop.xlane.xlu0 %2031 }
0x168e   :  { %3867 = vrcp.f32 %v2032_v14 }
0x1690   :  { %v3866_v15 = vpop.eup %3865 }
0x1691   :  { %v2035_v16 = vmul.f32 %v3866_v15, %v3862_v53  ;;  %v2040_v17 = vpop.permute.xlu0 %2039 }
0x1692   :  { %v2045_v18 = vsel %vm337_vm4, %v2040_v17, 0 }
0x1693   :  { %3641 = vmatpush3.bf16.msra.mxu1 %v2045_v18  ;;  %v2037_v1 = vpack.c.bf16 %v2035_v16, %v2035_v16 }
0x1694   :  { %3652 = vmatprep.subr.bf16.mxu1 %v3940_v12 }
0x1695   :  { %v2233_v39 = vpop.permute.xlu0 %2232 }
0x1696   :  { %3643 = vmatmul.mubr.msk.bf16.vlgmr.msra.gmra.mrb[68].mxu1 %vm206_vm2, %v2037_v1 }
0x1697   :  { %3654 = vmatprep.mubr.msk.bf16.mxu1 %vm3941_vm1, %v3940_v12  ;;  %3653 = vmatpush3.bf16.msra.mxu1 %v2142_v27 }
0x1698   :  { %v3868_v19 = vpop.eup %3867  ;;  %3664 = vmatprep.subr.bf16.mxu1 %v3940_v12 }
0x1699   :  { %v2036_v20 = vmul.f32 %v3868_v19, %v3864_v55 }
0x169b   :  { %v2038_v21 = vpack.c.bf16 %v2036_v20, %v2036_v20 }
0x169d   :  { %3649 = vmatmul.mubr.msk.bf16.vlgmr.msra.gmra.mrb[52].mxu0 %vm206_vm2, %v2038_v21 }
0x169e   :  { %3659 = vmatpush3.bf16.msra.mxu0 %v2189_v22  ;;  %3660 = vmatprep.mubr.msk.bf16.mxu0 %vm3941_vm1, %v3940_v12 }
0x169f   :  { %3670 = vmatprep.subr.bf16.mxu0 %v3940_v12 }
0x16a5   :  { %3661 = vmatmul.mubr.msk.bf16.vlgmr.msra.gmra.mrb[56].mxu0 %vm206_vm2, %v1910_v38 }
0x16a6   :  { %3672 = vmatprep.mubr.msk.bf16.mxu0 %vm3941_vm1, %v3940_v12 }
0x16a7   :  { %3671 = vmatpush3.bf16.xpose.msra.mxu0 %v2290_v49 }
0x16a8   :  { %3682 = vmatprep.subr.bf16.mxu0 %v3940_v12 }
0x16ae   :  { %3673 = vmatmul.mubr.msk.bf16.vlgmr.msra.gmra.mrb[60].mxu0 %vm206_vm2, %v2283_v25 }
0x16af   :  { %3684 = vmatprep.mubr.msk.bf16.mxu0 %vm3941_vm1, %v3940_v12 }
0x1769   :  { %v2081_v28 = vpop.f32.mrb[68].mxu1 }
0x176a   :  { %v3644_v29 = vpop.f32.mrb[69].mxu1 }
0x176b   :  { %v2084_v30 = vpop.f32.mrb[70].mxu1 }
0x176c   :  { %v3645_v46 = vpop.f32.mrb[71].mxu1 }
0x1770   :  { %v2129_v31 = vpop.f32.mrb[52].mxu0 }
0x1771   :  { %v2137_v32 = vpack.c.bf16 %v2129_v31, %v2081_v28  ;;  %v3650_v33 = vpop.f32.mrb[53].mxu0 }
0x1772   :  { %v2132_v34 = vpop.f32.mrb[54].mxu0  ;;  %v3269_v33 = vld [vmem:[%s4760_s7 + $0x18] sm:$0xf] }
0x1773   :  { %v3651_v36 = vpop.f32.mrb[55].mxu0  ;;  %3655 = vmatmul.mubr.msk.bf16.vlgmr.msra.gmra.mrb[72].mxu1 %vm206_vm2, %v2137_v32  ;;  %v2463_v34 = vsel %vm337_vm4, %v3269_v33, 0 }
0x1774   :  { %3665 = vmatpush3.bf16.xpose.msra.mxu1 %v2240_v35  ;;  %3666 = vmatprep.mubr.msk.bf16.mxu1 %vm3941_vm1, %v3940_v12 }
0x1775   :  { %3676 = vmatprep.subr.bf16.mxu1 %v3940_v12 }
0x1778   :  { %v2225_v37 = vpop.f32.mrb[56].mxu0 }
0x1779   :  { %v3662_v38 = vpop.f32.mrb[57].mxu0 }
0x177a   :  { %v2228_v40 = vpop.f32.mrb[58].mxu0 }
0x177b   :  { %v3663_v41 = vpop.f32.mrb[59].mxu0  ;;  %3667 = vmatmul.mubr.msk.bf16.vlgmr.msra.gmra.mrb[76].mxu1 %vm206_vm2, %v2233_v39 }
0x177c   :  { %3678 = vmatprep.mubr.msk.bf16.mxu1 %vm3941_vm1, %v3940_v12 }
0x1781   :  { %v2326_v43 = vpop.f32.mrb[60].mxu0 }
0x1782   :  { %v2333_v44 = vmul.f32 0.35355338, %v2326_v43  ;;  %v3674_v47 = vpop.f32.mrb[61].mxu0 }
0x1783   :  { %v2329_v48 = vpop.f32.mrb[62].mxu0 }
0x1784   :  { %v3675_v50 = vpop.f32.mrb[63].mxu0  ;;  %v2335_v51 = vsel %vm4123_vm3, %v2333_v44, -1e+30 }
0x1785   :  { %v2339_v52 = vsel %vm206_vm2, %v2335_v51, -inf }
0x1786   :  { %2340 = vmax.xlane.f32.xlu1 %v2339_v52 }
0x1797   :  { %2408 = vrot.lane.b32.xlu1 %v4437_v45, %s3949_s19 }
0x179b   :  { %2510 = vrot.lane.b32.xlu1 %v4435_v42, %s4787_s23 }
0x179f   :  { %2560 = vrot.lane.b32.xlu1 %v4437_v45, %s4787_s23 }
0x17a3   :  { %2558 = vrot.lane.b32.xlu1 %v4437_v45, %s4788_s24 }
0x1813   :  { %v2341_v54 = vpop.xlane.xlu1 %2340 }
0x1814   :  { %v2343_v59 = vsub.f32 %v2335_v51, %v2341_v54 }
0x1816   :  { %v2346_v3 = vmul.f32 1.442695, %v2343_v59 }
0x1817   :  { %v2409_v56 = vpop.permute.xlu1 %2408 }
0x1818   :  { %v2414_v57 = vsel %vm337_vm4, %v2409_v56, 0  ;;  %3869 = vpow2.f32 %v2346_v3 }
0x1819   :  { %3683 = vmatpush3.bf16.msra.mxu0 %v2414_v57 }
0x181a   :  { %3694 = vmatprep.subr.bf16.mxu0 %v3940_v12 }
0x181b   :  { %v2511_v21 = vpop.permute.xlu1 %2510 }
0x181c   :  { %v2516_v23 = vsel %vm206_vm2, %v2511_v21, 0 }
0x181f   :  { %v2561_v43 = vpop.permute.xlu1 %2560 }
0x1820   :  { %v2566_v51 = vsel %vm206_vm2, %v2561_v43, 0 }
0x1822   :  { %v3870_v13 = vpop.eup %3869 }
0x1823   :  { %v2351_v14 = vsel %vm206_vm2, %v3870_v13, 0.0  ;;  %v2559_v54 = vpop.permute.xlu1 %2558 }
0x1846   :  { %v2178_v60 = vpop.f32.mrb[72].mxu1 }
0x1847   :  { %v4573_v4 = vadd.f32 %v2225_v37, %v2178_v60  ;;  %v3656_v61 = vpop.f32.mrb[73].mxu1 }
0x1848   :  { %v2181_v62 = vpop.f32.mrb[74].mxu1 }
0x1849   :  { %v4575_v0 = vadd.f32 %v2228_v40, %v2181_v62  ;;  %v3657_v2 = vpop.f32.mrb[75].mxu1 }
0x184e   :  { %v2276_v7 = vpop.f32.mrb[76].mxu1 }
0x184f   :  { %v2332_v8 = vmul.f32 0.35355338, %v2276_v7  ;;  %v3668_v9 = vpop.f32.mrb[77].mxu1 }
0x1850   :  { %v2279_v53 = vpop.f32.mrb[78].mxu1 }
0x1851   :  { %v3669_v10 = vpop.f32.mrb[79].mxu1  ;;  %v2334_v55 = vsel %vm4123_vm3, %v2332_v8, -1e+30 }
0x1852   :  { %v2336_v11 = vsel %vm206_vm2, %v2334_v55, -inf }
0x1853   :  { %2337 = vmax.xlane.f32.xlu0 %v2336_v11 }
0x1857   :  { %2352 = vadd.xlane.f32.xlu0 %v2351_v14 }
0x18e0   :  { %v2338_v15 = vpop.xlane.xlu0 %2337 }
0x18e1   :  { %v2342_v16 = vsub.f32 %v2334_v55, %v2338_v15 }
0x18e3   :  { %v2344_v17 = vmul.f32 1.442695, %v2342_v16 }
0x18e4   :  { %v2353_v18 = vpop.xlane.xlu0 %2352 }
0x18e5   :  { %3871 = vpow2.f32 %v2344_v17 }
0x18e6   :  { %3873 = vrcp.f32 %v2353_v18 }
0x18ef   :  { %v3872_v1 = vpop.eup %3871 }
0x18f0   :  { %v3874_v19 = vpop.eup %3873  ;;  %v2348_v6 = vsel %vm206_vm2, %v3872_v1, 0.0 }
0x18f1   :  { %v2357_v20 = vmul.f32 %v3874_v19, %v3870_v13  ;;  %2349 = vadd.xlane.f32.xlu0 %v2348_v6 }
0x18f3   :  { %v2359_v22 = vpack.c.bf16 %v2357_v20, %v2357_v20 }
0x18f5   :  { %3685 = vmatmul.mubr.msk.bf16.vlgmr.msra.gmra.mrb[64].mxu0 %vm206_vm2, %v2359_v22 }
0x18f6   :  { %3695 = vmatpush3.bf16.xpose.msra.mxu0 %v2516_v23  ;;  %3696 = vmatprep.mubr.msk.bf16.mxu0 %vm3941_vm1, %v3940_v12 }
0x18f7   :  { %3706 = vmatprep.subr.bf16.mxu0 %v3940_v12 }
0x1907   :  { %2360 = vrot.lane.b32.xlu0 %v4435_v42, %s3949_s19 }
0x190b   :  { %2508 = vrot.lane.b32.xlu0 %v4435_v42, %s4788_s24 }
0x197e   :  { %v2350_v24 = vpop.xlane.xlu0 %2349 }
0x197f   :  { %3875 = vrcp.f32 %v2350_v24 }
0x1982   :  { %v2361_v49 = vpop.permute.xlu0 %2360 }
0x1983   :  { %v2366_v25 = vsel %vm337_vm4, %v2361_v49, 0 }
0x1984   :  { %3677 = vmatpush3.bf16.msra.mxu1 %v2366_v25  ;;  %v3275_v25 = vld [vmem:[%s4760_s7 + $0x1c] sm:$0xf] }
0x1985   :  { %3688 = vmatprep.subr.bf16.mxu1 %v3940_v12 }
0x1986   :  { %v2509_v26 = vpop.permute.xlu0 %2508 }
0x1987   :  { %3697 = vmatmul.mubr.msk.bf16.vlgmr.msra.gmra.mrb[68].mxu0 %vm206_vm2, %v2509_v26  ;;  %v2739_v26 = vsel %vm337_vm4, %v3275_v25, 0  ;;  %v3797_v25 = vld [vmem:[%s4766_s13 + $0x70] sm:$0xff]  }
0x1988   :  { %3708 = vmatprep.mubr.msk.bf16.mxu0 %vm3941_vm1, %v3940_v12 }
0x1989   :  { %v3876_v27 = vpop.eup %3875 }
0x198a   :  { %v2356_v28 = vmul.f32 %v3876_v27, %v3872_v1 }
0x198c   :  { %v2358_v29 = vpack.c.bf16 %v2356_v28, %v2356_v28 }
0x198e   :  { %3679 = vmatmul.mubr.msk.bf16.vlgmr.msra.gmra.mrb[80].mxu1 %vm206_vm2, %v2358_v29 }
0x198f   :  { %3690 = vmatprep.mubr.msk.bf16.mxu1 %vm3941_vm1, %v3940_v12  ;;  %3689 = vmatpush3.bf16.msra.mxu1 %v2463_v34 }
0x1990   :  { %3700 = vmatprep.subr.bf16.mxu1 %v3940_v12 }
0x19c8   :  { %v2450_v30 = vpop.f32.mrb[64].mxu0 }
0x19c9   :  { %v3686_v46 = vpop.f32.mrb[65].mxu0 }
0x19ca   :  { %v2453_v31 = vpop.f32.mrb[66].mxu0 }
0x19cb   :  { %v3687_v32 = vpop.f32.mrb[67].mxu0 }
0x1a5a   :  { %v2552_v35 = vpop.f32.mrb[68].mxu0 }
0x1a5b   :  { %v2608_v36 = vmul.f32 0.35355338, %v2552_v35  ;;  %v3698_v37 = vpop.f32.mrb[69].mxu0 }
0x1a5c   :  { %v2555_v38 = vpop.f32.mrb[70].mxu0 }
0x1a5d   :  { %v3699_v39 = vpop.f32.mrb[71].mxu0  ;;  %v2610_v40 = vsel %vm4123_vm3, %v2608_v36, -1e+30  ;;  %v3278_v38 = vld [vmem:[%s4761_s8 + $0x1] ss:$0 sm:$0xff] }
0x1a5e   :  { %v2612_v41 = vsel %vm206_vm2, %v2610_v40, -inf }
0x1a5f   :  { %2613 = vmax.xlane.f32.xlu0 %v2612_v41 }
0x1a61   :  { %v2402_v44 = vpop.f32.mrb[80].mxu1 }
0x1a62   :  { %v2458_v47 = vpack.c.bf16 %v2450_v30, %v2402_v44  ;;  %v3680_v48 = vpop.f32.mrb[81].mxu1 }
0x1a63   :  { %v2405_v50 = vpop.f32.mrb[82].mxu1 }
0x1a64   :  { %v3681_v52 = vpop.f32.mrb[83].mxu1  ;;  %3691 = vmatmul.mubr.msk.bf16.vlgmr.msra.gmra.mrb[84].mxu1 %vm206_vm2, %v2458_v47 }
0x1a65   :  { %3701 = vmatpush3.bf16.xpose.msra.mxu1 %v2566_v51  ;;  %3702 = vmatprep.mubr.msk.bf16.mxu1 %vm3941_vm1, %v3940_v12 }
0x1a66   :  { %3712 = vmatprep.subr.bf16.mxu1 %v3940_v12 }
0x1a6c   :  { %3703 = vmatmul.mubr.msk.bf16.vlgmr.msra.gmra.mrb[88].mxu1 %vm206_vm2, %v2559_v54 }
0x1a6d   :  { %3714 = vmatprep.mubr.msk.bf16.mxu1 %vm3941_vm1, %v3940_v12 }
0x1aec   :  { %v2614_v56 = vpop.xlane.xlu0 %2613 }
0x1aed   :  { %v2618_v57 = vsub.f32 %v2610_v40, %v2614_v56  ;;  %v3789_v56 = vld [vmem:[%s4764_s11 + $0x10] sm:$0xff]  }
0x1aef   :  { %v2620_v59 = vmul.f32 1.442695, %v2618_v57  ;;  %v3790_v57 = vld [vmem:[%s4764_s11 + $0x18] sm:$0xff]  }
0x1af1   :  { %3877 = vpow2.f32 %v2620_v59 }
0x1afb   :  { %v3878_v3 = vpop.eup %3877 }
0x1afc   :  { %v2624_v60 = vsel %vm206_vm2, %v3878_v3, 0.0 }
0x1afd   :  { %2625 = vadd.xlane.f32.xlu0 %v2624_v60 }
0x1b37   :  { %v2499_v61 = vpop.f32.mrb[84].mxu1 }
0x1b38   :  { %v2506_v62 = vadd.f32 %v2499_v61, %v4573_v4  ;;  %v3692_v2 = vpop.f32.mrb[85].mxu1 }
0x1b39   :  { %v2502_v7 = vpop.f32.mrb[86].mxu1 }
0x1b3a   :  { %v2507_v8 = vadd.f32 %v2502_v7, %v4575_v0  ;;  %v3693_v9 = vpop.f32.mrb[87].mxu1 }
0x1b3f   :  { %v2602_v53 = vpop.f32.mrb[88].mxu1 }
0x1b40   :  { %v2609_v10 = vmul.f32 0.35355338, %v2602_v53  ;;  %v3704_v55 = vpop.f32.mrb[89].mxu1 }
0x1b41   :  { %v2605_v11 = vpop.f32.mrb[90].mxu1 }
0x1b42   :  { %v3705_v13 = vpop.f32.mrb[91].mxu1  ;;  %v2611_v14 = vsel %vm4123_vm3, %v2609_v10, -1e+30 }
0x1b43   :  { %v2615_v15 = vsel %vm206_vm2, %v2611_v14, -inf }
0x1b44   :  { %2616 = vmax.xlane.f32.xlu1 %v2615_v15 }
0x1b55   :  { %2684 = vrot.lane.b32.xlu1 %v4437_v45, %s4789_s27 }
0x1b8a   :  { %v2626_v19 = vpop.xlane.xlu0 %2625 }
0x1bd1   :  { %v2617_v4 = vpop.xlane.xlu1 %2616 }
0x1bd2   :  { %v2619_v16 = vsub.f32 %v2611_v14, %v2617_v4  ;;  %v3281_v4 = vld [vmem:[%s4762_s9 + $0x1] ss:$0 sm:$0xff]  ;;  %s3322_s9 = sld [smem:[#allocation3 + $0x1]] }
0x1bd4   :  { %v2622_v17 = vmul.f32 1.442695, %v2619_v16 }
0x1bd5   :  { %v2685_v18 = vpop.permute.xlu1 %2684 }
0x1bd6   :  { %3879 = vpow2.f32 %v2622_v17  ;;  %v2690_v0 = vsel %vm337_vm4, %v2685_v18, 0 }
0x1bd7   :  { %3713 = vmatpush3.bf16.msra.mxu1 %v2690_v0  ;;  %3881 = vrcp.f32 %v2626_v19 }
0x1bd8   :  { %3724 = vmatprep.subr.bf16.mxu1 %v3940_v12  ;;  %s3191_s4 = scalar_lea.vmem [#allocation2], %s3322_s9 }
0x1be0   :  { %v3880_v1 = vpop.eup %3879 }
0x1be1   :  { %v2627_v58 = vsel %vm206_vm2, %v3880_v1, 0.0  ;;  %v3882_v45 = vpop.eup %3881 }
0x1be2   :  { %2628 = vadd.xlane.f32.xlu0 %v2627_v58  ;;  %v2632_v20 = vmul.f32 %v3882_v45, %v3878_v3  ;;  %v3282_v58 = vld [vmem:[%s4763_s10 + $0x1] ss:$0 sm:$0xff] }
0x1be4   :  { %v2634_v23 = vpack.c.bf16 %v2632_v20, %v2632_v20 }
0x1bf8   :  { %2636 = vrot.lane.b32.xlu0 %v4435_v42, %s4789_s27 }
0x1c6f   :  { %v2629_v6 = vpop.xlane.xlu0 %2628 }
0x1c70   :  { %3883 = vrcp.f32 %v2629_v6 }
0x1c73   :  { %v2637_v21 = vpop.permute.xlu0 %2636 }
0x1c74   :  { %v2642_v22 = vsel %vm337_vm4, %v2637_v21, 0  ;;  %v3791_v21 = vld [vmem:[%s4766_s13 + $0x40] sm:$0xff]  }
0x1c75   :  { %3707 = vmatpush3.bf16.msra.mxu0 %v2642_v22  ;;  %v3792_v22 = vld [vmem:[%s4766_s13 + $0x48] sm:$0xff]  }
0x1c76   :  { %3718 = vmatprep.subr.bf16.mxu0 %v3940_v12 }
0x1c78   :  { %3709 = vmatmul.mubr.msk.bf16.vlgmr.msra.gmra.mrb[72].mxu0 %vm206_vm2, %v2634_v23  ;;  %v3793_v23 = vld [vmem:[%s4766_s13 + $0x50] sm:$0xff]  }
0x1c79   :  { %3720 = vmatprep.mubr.msk.bf16.mxu0 %vm3941_vm1, %v3940_v12  ;;  %3719 = vmatpush3.bf16.msra.mxu0 %v2739_v26  ;;  %v3798_v26 = vld [vmem:[%s4766_s13 + $0x78] sm:$0xff]  }
0x1c7a   :  { %v3884_v24 = vpop.eup %3883  ;;  %3732 = vmatprep.subr.bf16.mxu0 %v3940_v12 }
0x1c7b   :  { %v2633_v42 = vmul.f32 %v3884_v24, %v3880_v1  ;;  %v3794_v24 = vld [vmem:[%s4766_s13 + $0x58] sm:$0xff]  }
0x1c7d   :  { %v2635_v49 = vpack.c.bf16 %v2633_v42, %v2633_v42  ;;  %v3795_v42 = vld [vmem:[%s4766_s13 + $0x60] sm:$0xff]  }
0x1c7f   :  { %3715 = vmatmul.mubr.msk.bf16.vlgmr.msra.gmra.mrb[92].mxu1 %vm206_vm2, %v2635_v49  ;;  %v3796_v49 = vld [vmem:[%s4766_s13 + $0x68] sm:$0xff]  }
0x1c80   :  { %3728 = vmatprep.mubr.msk.bf16.mxu1 %vm3941_vm1, %v3940_v12  ;;  %3725 = vmatpush3.bf16.msra.mxu1 %v3789_v56 }
0x1c81   :  { %3726 = vmatprep.subr.bf16.mxu1 %v3940_v12 }
0x1c84   :  { %3727 = vmatpush3.bf16.msra.mxu1 %v3790_v57 }
0x1c85   :  { %3752 = vmatprep.subr.bf16.mxu1 %v3940_v12 }
0x1d4b   :  { %v2678_v27 = vpop.f32.mrb[72].mxu0 }
0x1d4c   :  { %v3710_v28 = vpop.f32.mrb[73].mxu0 }
0x1d4d   :  { %v2681_v29 = vpop.f32.mrb[74].mxu0 }
0x1d4e   :  { %v3711_v30 = vpop.f32.mrb[75].mxu0 }
0x1d52   :  { %v2726_v46 = vpop.f32.mrb[92].mxu1 }
0x1d53   :  { %v2734_v31 = vpack.c.bf16 %v2726_v46, %v2678_v27  ;;  %v3716_v32 = vpop.f32.mrb[93].mxu1  ;;  %v3288_v27 = vld [vmem:[%s4765_s12 + $0x1] ss:$0 sm:$0xff] }
0x1d54   :  { %v2729_v33 = vpop.f32.mrb[94].mxu1 }
0x1d55   :  { %v3717_v34 = vpop.f32.mrb[95].mxu1  ;;  %3721 = vmatmul.mubr.msk.bf16.vlgmr.msra.gmra.mrb[76].mxu0 %vm206_vm2, %v2734_v31 }
0x1d56   :  { %3748 = vmatprep.mubr.msk.bf16.mxu0 %vm3941_vm1, %v3940_v12  ;;  %3733 = vmatpush3.bf16.msra.mxu0 %v3791_v21 }
0x1d57   :  { %3734 = vmatprep.subr.bf16.mxu0 %v3940_v12 }
0x1d5a   :  { %3735 = vmatpush3.bf16.msra.mxu0 %v3792_v22  ;;  %v3321_v22 = vld [vmem:[%s4769_s16] ss:$0 sm:$0xff]  ;;  %s3953_s16 = smov [#allocation6]  }
0x1d5b   :  { %3736 = vmatprep.subr.bf16.mxu0 %v3940_v12  ;;  %s3181_s6 = sshll.u32 %s3953_s16, 4  ;;  %s3182_s6 = int_to_ptr.vmem [resolvable:$true] %s3181_s6 }
0x1d5c   :  { %s3913_s10 = scalar_lea.vmem %s3182_s6, 32  ;;  %p3918_p6 = scmp.lt.s32.totalorder %s3182_s6, %s3182_s6 }
0x1d5d   :  { %p3914_p5 = scmp.ne.s32.totalorder %s3182_s6, %s3913_s10  ;;  %p3919_p7 = scmp.lt.s32.totalorder %s3913_s10, %s3913_s10 }
0x1d5e   :  { %3737 = vmatpush3.bf16.msra.mxu0 %v3793_v23 }
0x1d5f   :  { %3738 = vmatprep.subr.bf16.mxu0 %v3940_v12  ;;  %p3920_p8 = por %p3919_p7, %p3918_p6 }
0x1d61   :  { %p3921_p9 = pnand %p3920_p8, %p3914_p5 }
0x1d62   :  { %3739 = vmatpush3.bf16.msra.mxu0 %v3794_v24 }
0x1d63   :  { %3740 = vmatprep.subr.bf16.mxu0 %v3940_v12 }
0x1d66   :  { %3741 = vmatpush3.bf16.msra.mxu0 %v3795_v42 }
0x1d67   :  { %3742 = vmatprep.subr.bf16.mxu0 %v3940_v12 }
0x1d6a   :  { %3743 = vmatpush3.bf16.msra.mxu0 %v3796_v49 }
0x1d6b   :  { %3744 = vmatprep.subr.bf16.mxu0 %v3940_v12 }
0x1d6e   :  { %3745 = vmatpush3.bf16.msra.mxu0 %v3797_v25 }
0x1d6f   :  { %3746 = vmatprep.subr.bf16.mxu0 %v3940_v12 }
0x1d72   :  { %3747 = vmatpush3.bf16.msra.mxu0 %v3798_v26 }
0x1e28   :  { %v2775_v35 = vpop.f32.mrb[76].mxu0 }
0x1e29   :  { %v2782_v36 = vadd.f32 %v2775_v35, %v2506_v62  ;;  %v3722_v37 = vpop.f32.mrb[77].mxu0 }
0x1e2a   :  { %v2778_v39 = vpop.f32.mrb[78].mxu0 }
0x1e2b   :  { %v2784_v40 = vadd.f32 %v2782_v36, %v4398_v63  ;;  %v2783_v41 = vadd.f32 %v2778_v39, %v2507_v8  ;;  %v3723_v43 = vpop.f32.mrb[79].mxu0 }
0x1e2d   :  { %v4648_v44 = vadd.f32 %v3278_v38, %v2784_v40  ;;  %v2785_v47 = vadd.f32 %v2783_v41, %v4401_v5 }
0x1e2f   :  { %v4651_v48 = vadd.f32 %v3278_v38, %v2785_v47  ;;  %v2800_v50 = vsel %vm86_vm0, %v4648_v44, 0.0  ;;  %v2808_v63 = vmul.f32 %v4648_v44, %v4648_v44 }
0x1e30   :  { %2801 = vadd.xlane.f32.xlu1 %v2800_v50 }
0x1e31   :  { %v2803_v51 = vsel %vm86_vm0, %v4651_v48, 0.0  ;;  %v2809_v52 = vmul.f32 %v4651_v48, %v4651_v48  ;;  %v2810_v5 = vsel %vm86_vm0, %v2808_v63, 0.0  ;;  %v3319_v63 = vld [vmem:[%s4767_s14 + $0x1] ss:$0 sm:$0xff] }
0x1e32   :  { %2804 = vadd.xlane.f32.xlu0 %v2803_v51 }
0x1e33   :  { %v2813_v54 = vsel %vm86_vm0, %v2809_v52, 0.0 }
0x1e34   :  { %2814 = vadd.xlane.f32.xlu1 %v2813_v54 }
0x1e36   :  { %2811 = vadd.xlane.f32.xlu0 %v2810_v5 }
0x1ebd   :  { %v2802_v59 = vpop.xlane.xlu1 %2801 }
0x1ebe   :  { %v2806_v60 = vmul.f32 0.03125, %v2802_v59 }
0x1ebf   :  { %v2805_v3 = vpop.xlane.xlu0 %2804 }
0x1ec0   :  { %v2807_v61 = vmul.f32 0.03125, %v2805_v3  ;;  %v2818_v9 = vmul.f32 %v2806_v60, %v2806_v60  ;;  %v2822_v16 = vsub.f32 %v4648_v44, %v2806_v60 }
0x1ec1   :  { %v2815_v62 = vpop.xlane.xlu1 %2814 }
0x1ec2   :  { %v2819_v2 = vmul.f32 %v2807_v61, %v2807_v61  ;;  %v2817_v7 = vmul.f32 0.03125, %v2815_v62  ;;  %v2823_v14 = vsub.f32 %v4651_v48, %v2807_v61 }
0x1ec3   :  { %v2812_v8 = vpop.xlane.xlu0 %2811 }
0x1ec4   :  { %v2821_v53 = vsub.f32 %v2817_v7, %v2819_v2  ;;  %v2816_v10 = vmul.f32 0.03125, %v2812_v8 }
0x1ec6   :  { %v2825_v55 = vadd.f32 1e-05, %v2821_v53  ;;  %v2820_v11 = vsub.f32 %v2816_v10, %v2818_v9  ;;  %v3800_v9 = vld [vmem:[%s4770_s17 + $0x8] sm:$0xff]  }
0x1ec8   :  { %3885 = vrsqrt.f32 %v2825_v55  ;;  %v2824_v13 = vadd.f32 1e-05, %v2820_v11 }
0x1eca   :  { %3887 = vrsqrt.f32 %v2824_v13 }
0x1ed2   :  { %v3886_v15 = vpop.eup %3885 }
0x1ed3   :  { %v2829_v17 = vmul.f32 %v3886_v15, %v2823_v14 }
0x1ed4   :  { %v3888_v18 = vpop.eup %3887 }
0x1ed5   :  { %v2828_v0 = vmul.f32 %v3888_v18, %v2822_v16  ;;  %v2837_v1 = vmul.f32 %v3281_v4, %v2829_v17 }
0x1ed7   :  { %v2836_v19 = vmul.f32 %v3281_v4, %v2828_v0  ;;  %v2845_v6 = vadd.f32 %v3282_v58, %v2837_v1 }
0x1ed9   :  { %v2844_v45 = vadd.f32 %v3282_v58, %v2836_v19 }
0x1edb   :  { %v2851_v20 = vpack.c.bf16 %v2845_v6, %v2844_v45 }
0x1edd   :  { %3729 = vmatmul.mubr.msk.bf16.vlgmr.msra.gmra.mrb[96].mxu1 %vm86_vm0, %v2851_v20 }
0x1ede   :  { %3756 = vmatprep.mubr.msk.bf16.mxu1 %vm3941_vm1, %v3940_v12 }
0x1fb0   :  { %v2909_v28 = vpop.f32.mrb[96].mxu1 }
0x1fb1   :  { %v2910_v29 = vadd.f32 %v3288_v27, %v2909_v28  ;;  %v3730_v30 = vpop.f32.mrb[97].mxu1 }
0x1fb2   :  { %v2912_v46 = vpop.f32.mrb[98].mxu1 }
0x1fb3   :  { %v3292_v31 = vmul.f32 -1.702, %v2910_v29  ;;  %v2913_v32 = vadd.f32 %v3288_v27, %v2912_v46  ;;  %v3731_v33 = vpop.f32.mrb[99].mxu1 }
0x1fb5   :  { %v2920_v34 = vmul.f32 1.442695, %v3292_v31  ;;  %v3293_v35 = vmul.f32 -1.702, %v2913_v32 }
0x1fb7   :  { %3889 = vpow2.f32 %v2920_v34  ;;  %v2922_v36 = vmul.f32 1.442695, %v3293_v35 }
0x1fb9   :  { %3891 = vpow2.f32 %v2922_v36 }
0x1fc1   :  { %v3890_v37 = vpop.eup %3889 }
0x1fc2   :  { %v2924_v38 = vadd.f32 1.0, %v3890_v37 }
0x1fc3   :  { %v3892_v39 = vpop.eup %3891 }
0x1fc4   :  { %3893 = vrcp.f32 %v2924_v38  ;;  %v2925_v40 = vadd.f32 1.0, %v3892_v39 }
0x1fc6   :  { %3895 = vrcp.f32 %v2925_v40 }
0x1fce   :  { %v3894_v41 = vpop.eup %3893 }
0x1fcf   :  { %v2930_v47 = vmul.f32 %v3894_v41, %v2910_v29 }
0x1fd0   :  { %v3896_v43 = vpop.eup %3895 }
0x1fd1   :  { %v2931_v50 = vmul.f32 %v3896_v43, %v2913_v32 }
0x1fd3   :  { %v2949_v51 = vpack.c.bf16 %v2931_v50, %v2930_v47 }
0x1fd5   :  { %3749 = vmatmul.mubr.bf16.vlgmr.msra.gmra.mrb[80].mxu0 %v2949_v51 }
0x20a8   :  { %v3032_v52 = vpop.f32.mrb[80].mxu0 }
0x20a9   :  { %v3039_v54 = vadd.f32 %v3032_v52, %v4648_v44  ;;  %v3750_v5 = vpop.f32.mrb[81].mxu0 }
0x20aa   :  { %v3035_v56 = vpop.f32.mrb[82].mxu0 }
0x20ab   :  { %v3049_v57 = vadd.f32 %v3319_v63, %v3039_v54  ;;  %v3040_v59 = vadd.f32 %v3035_v56, %v4651_v48  ;;  %v3751_v3 = vpop.f32.mrb[83].mxu0  ;;  %v3799_v48 = vld [vmem:[%s4770_s17] sm:$0xff]  }
0x20ac   :  { %3753 = vmatpush3.bf16.msra.mxu1 %v3799_v48 }
0x20ad   :  { %v3050_v60 = vadd.f32 %v3319_v63, %v3040_v59  ;;  %v3053_v61 = vsel %vm86_vm0, %v3049_v57, 0.0  ;;  %v3061_v62 = vmul.f32 %v3049_v57, %v3049_v57  ;;  %3754 = vmatprep.subr.bf16.mxu1 %v3940_v12  ;;  %v3320_v12 = vld [vmem:[%s4768_s15] ss:$0 sm:$0xff]  ;;  %s3102_s15 = scalar_lea.vmem [#allocation2], %s3101_s1 }
0x20ae   :  { %3054 = vadd.xlane.f32.xlu0 %v3053_v61 }
0x20af   :  { %v3056_v2 = vsel %vm86_vm0, %v3050_v60, 0.0  ;;  %v3062_v7 = vmul.f32 %v3050_v60, %v3050_v60  ;;  %v3063_v8 = vsel %vm86_vm0, %v3061_v62, 0.0 }
0x20b0   :  { %3057 = vadd.xlane.f32.xlu1 %v3056_v2  ;;  %3755 = vmatpush3.bf16.msra.mxu1 %v3800_v9 }
0x20b1   :  { %v3066_v44 = vsel %vm86_vm0, %v3062_v7, 0.0 }
0x20b2   :  { %3064 = vadd.xlane.f32.xlu0 %v3063_v8 }
0x20b4   :  { %3067 = vadd.xlane.f32.xlu1 %v3066_v44 }
0x213b   :  { %v3055_v53 = vpop.xlane.xlu0 %3054 }
0x213c   :  { %v3059_v10 = vmul.f32 0.03125, %v3055_v53 }
0x213d   :  { %v3058_v55 = vpop.xlane.xlu1 %3057 }
0x213e   :  { %v3060_v11 = vmul.f32 0.03125, %v3058_v55  ;;  %v3071_v14 = vmul.f32 %v3059_v10, %v3059_v10  ;;  %v3075_v19 = vsub.f32 %v3049_v57, %v3059_v10 }
0x213f   :  { %v3065_v13 = vpop.xlane.xlu0 %3064 }
0x2140   :  { %v3069_v15 = vmul.f32 0.03125, %v3065_v13  ;;  %v3072_v16 = vmul.f32 %v3060_v11, %v3060_v11  ;;  %v3076_v6 = vsub.f32 %v3050_v60, %v3060_v11 }
0x2141   :  { %v3068_v4 = vpop.xlane.xlu1 %3067 }
0x2142   :  { %v3073_v17 = vsub.f32 %v3069_v15, %v3071_v14  ;;  %v3070_v18 = vmul.f32 0.03125, %v3068_v4 }
0x2144   :  { %v3077_v0 = vadd.f32 1e-05, %v3073_v17  ;;  %v3074_v1 = vsub.f32 %v3070_v18, %v3072_v16 }
0x2146   :  { %3897 = vrsqrt.f32 %v3077_v0  ;;  %v3078_v58 = vadd.f32 1e-05, %v3074_v1 }
0x2148   :  { %3899 = vrsqrt.f32 %v3078_v58 }
0x2150   :  { %v3898_v45 = vpop.eup %3897 }
0x2151   :  { %v3081_v20 = vmul.f32 %v3898_v45, %v3075_v19 }
0x2152   :  { %v3900_v21 = vpop.eup %3899 }
0x2153   :  { %v3089_v23 = vmul.f32 %v3320_v12, %v3081_v20  ;;  %v3082_v24 = vmul.f32 %v3900_v21, %v3076_v6 }
0x2155   :  { %v3097_v42 = vadd.f32 %v3321_v22, %v3089_v23  ;;  %v3090_v49 = vmul.f32 %v3320_v12, %v3082_v24 }
0x2157   :  { %3099 = vst.msk [vmem:[#allocation2] sm:$0xff] %vm86_vm0, %v3097_v42  ;;  %v3098_v25 = vadd.f32 %v3321_v22, %v3090_v49 }
0x2159   :  { %3100 = vst.msk [vmem:[#allocation2 + $0x8] sm:$0xff] %vm86_vm0, %v3098_v25 }
0x2160   :  { %v3323_v26 = vld [vmem:[%s3191_s4 + $0x8] sm:$0x1]  ;;  %v3103_v28 = vld [vmem:[%s3102_s15] sm:$0x1] }
0x2161   :  { %v3109_v27 = vrot.slane %v3323_v26, 7 }
0x2163   :  { %v3112_v29 = vsel %vm3111_vm5, %v3103_v28, %v3109_v27 }
0x2164   :  { %v3117_v30 = vpack.c.bf16 %v3112_v29, %v3112_v29 }
0x2166   :  { %3757 = vmatmul.mubr.msk.bf16.vlgmr.msra.gmra.mrb[100].mxu1 %vm86_vm0, %v3117_v30 }
0x2239   :  { %v3167_v46 = vpop.f32.mrb[100].mxu1 }
0x223a   :  { %v3758_v31 = vpop.f32.mrb[101].mxu1  ;;  %3174 = vst.msk [vmem:[#allocation6] sm:$0x3] %vm3173_vm6, %v3167_v46 }
0x223b   :  { %v3170_v32 = vpop.f32.mrb[102].mxu1 }
0x223c   :  { %3924 = shalt.err (!%p3921_p9)
}
0x223d   :  { %s3925_s23 = scalar_lea.hbm %s4771_s18, 32 }
0x223e   :  { %p3926_p10 = scmp.ne.s32.totalorder %s4771_s18, %s3925_s23  ;;  %p3929_p11 = scmp.lt.u32.totalorder %s3925_s23, %s4771_s18 }
0x2240   :  { %p3931_p12 = pnand %p3929_p11, %p3926_p10 }
0x2242   :  { %3934 = shalt.err (!%p3931_p12)
}
0x2243   :  { %3184 = dma.vmem_to_hbm [thread:$0]  %s3182_s6, 32, %s4771_s18, [#allocation4]   ;;  %v3759_v33 = vpop.f32.mrb[103].mxu1 }
0x2244   :  { %3937 = dma.done.wait [#allocation4], 32  }
0x2245   :  { %3938 = vsyncadd [#allocation4], 4294967264 }
0x2246   :  { %3188 = vsyncpa [#allocation4], 1 }
0x2247   :  { %3189 = vsyncpa [#allocation5], 1 }

</bundles_post_ra>
